<compile_context>
chip_gen: v7x
topology: tpu7x:2x2x1
jax: 0.10.0
libtpu: 0.0.40
codegen_flags: <defaults>
</compile_context>

<pallas_src>
import functools

import jax
import jax.numpy as jnp
from jax import lax
from jax.experimental import pallas as pl
from jax.experimental.pallas import tpu as pltpu

VMEM = pltpu.MemorySpace.VMEM
DN = (((1,), (0,)), ((), ()))          # contract lhs dim 1 with rhs dim 0


def _leaky(x):
    return jnp.where(x > 0, x, 0.01 * x)


def _bn_affine(slabs, gamma, beta, n_rows):
    """Single-pass training-mode BatchNorm1d stats -> (scale, shift).

    var = E[x^2] - E[x]^2 (biased, eps=1e-5), affine folded into y*inv + shift.
    """
    s = jnp.sum(slabs[0], axis=0, keepdims=True)
    ss = jnp.sum(slabs[0] * slabs[0], axis=0, keepdims=True)
    for y in slabs[1:]:
        s = s + jnp.sum(y, axis=0, keepdims=True)
        ss = ss + jnp.sum(y * y, axis=0, keepdims=True)
    n = float(n_rows)
    mean = s / n
    var = jnp.maximum(ss / n - mean * mean, 0.0)
    inv = lax.rsqrt(var + 1e-5) * gamma
    shift = beta - mean * inv
    return inv, shift


def _make_fused_kernel(B, H, Hg, T, base_t, timestep, PAD, S, ks):
    f32 = jnp.float32
    bf16 = jnp.bfloat16
    BH = B * Hg
    G = 3 * BH

    def kernel(xcol1_ref, w1_ref, g1_ref, be1_ref,
               w2_ref, g2_ref, be2_ref,
               w3_ref, g3_ref, be3_ref,
               w4_ref, g4_ref, be4_ref,
               wih_ref, whh_ref, bih_ref, bhh_ref, h0_ref,
               wk_ref, wkb_ref,
               nce_corr_ref, ht_ref,
               bufA, bufB, gi_ref):
        # ------ zero only the causal left-pad rows (the only rows read, never written)
        zpad = jnp.zeros((PAD, H), f32)
        for b in range(B):
            bufA[b * S:b * S + PAD, :] = zpad
            bufB[b * S:b * S + PAD, :] = zpad

        # ------ conv1 (stride-5 / k=5, Cin=1; im2col done in glue) + BN + LeakyReLU ---
        y1 = lax.dot_general(xcol1_ref[...], w1_ref[...], DN,
                             preferred_element_type=f32)                      # [B*T, H]
        inv, shift = _bn_affine([y1], g1_ref[...], be1_ref[...], B * T)
        y1 = _leaky(y1 * inv + shift)
        for b in range(B):
            bufA[b * S + PAD:b * S + PAD + T, :] = y1[b * T:(b + 1) * T, :]

        # ------ causal conv layers 2..4: merged-tap im2col -> one deep bf16 matmul ----
        def causal_layer(src, w_ref, g_ref, bt_ref, K, dst):
            w = w_ref[...]                                   # [K*Cin, Cout], bf16
            outs = []
            for b in range(B):
                base = b * S + PAD - (K - 1)                 # static offsets
                cols = jnp.concatenate(
                    [src[base + k:base + k + T, :] for k in range(K)], axis=1)  # [T,K*Cin]
                outs.append(lax.dot_general(cols.astype(bf16), w, DN,
                                            preferred_element_type=f32))        # [T,Cout]
            inv, shift = _bn_affine(outs, g_ref[...], bt_ref[...], B * T)
            for b in range(B):
                dst[b * S + PAD:b * S + PAD + T, :] = _leaky(outs[b] * inv + shift)

        causal_layer(bufA, w2_ref, g2_ref, be2_ref, ks[1], bufB)
        causal_layer(bufB, w3_ref, g3_ref, be3_ref, ks[2], bufA)
        causal_layer(bufA, w4_ref, g4_ref, be4_ref, ks[3], bufB)   # z now lives in bufB

        # ------ GRU over forward_seq = z[:, :base_t, :], batched over B ---------------
        # Gate/column layout (built by wih_big/whh_big in the wrapper):
        #   [ r(b0)..r(bB-1) | z(b0)..z(bB-1) | n(b0)..n(bB-1) ],  each block Hg wide.
        fs_wide = jnp.concatenate(
            [bufB[b * S + PAD:b * S + PAD + base_t, :] for b in range(B)],
            axis=1)                                                           # [base_t, B*H]
        gi_ref[0:base_t, :] = lax.dot_general(
            fs_wide, wih_ref[...], DN, preferred_element_type=f32) + bih_ref[...]

        whh = whh_ref[...]                                   # [B*Hg, 3*B*Hg]
        bhh = bhh_ref[...]                                   # [1, 3*B*Hg]

        def gru_step(t, h):                                  # h: [1, B*Hg]
            gi = gi_ref[pl.ds(t, 1), :]                                          # [1, G]
            gh = lax.dot_general(h, whh, DN, preferred_element_type=f32) + bhh   # [1, G]
            rz = jax.nn.sigmoid(gi[:, :2 * BH] + gh[:, :2 * BH])  # fused r/z sigmoid
            r = rz[:, :BH]
            zg = rz[:, BH:]
            n = jnp.tanh(gi[:, 2 * BH:] + r * gh[:, 2 * BH:])
            return (1.0 - zg) * n + zg * h

        h = lax.fori_loop(0, base_t, gru_step, h0_ref[...])
        # final hidden == output[:, base_t-1, :] == c_t ; keep it as a value.
        c_t = jnp.concatenate([h[:, b * Hg:(b + 1) * Hg] for b in range(B)], axis=0)  # [B,Hg]
        ht_ref[...] = c_t

        # ------ Wk predictions (one batched 128-lane matmul) + InfoNCE ----------------
        pred_all = lax.dot_general(c_t, wk_ref[...], DN,
                                   preferred_element_type=f32) + wkb_ref[...]  # [B, ts*H]

        row_iota = lax.broadcasted_iota(jnp.int32, (B, B), 0)
        col_iota = lax.broadcasted_iota(jnp.int32, (B, B), 1)
        eye = jnp.where(row_iota == col_iota, 1.0, 0.0).astype(f32)

        nce = jnp.zeros((1, 1), f32)
        corr = jnp.zeros((1, 1), f32)
        for j in range(timestep):
            # encode_samples[j] = z[:, timestep + ((j+1) % timestep), :]  (torch index quirk)
            t_idx = timestep + ((j + 1) % timestep)
            enc_j = jnp.concatenate(
                [bufB[b * S + PAD + t_idx:b * S + PAD + t_idx + 1, :] for b in range(B)],
                axis=0)                                                          # [B, H]
            pred_j = pred_all[:, j * H:(j + 1) * H]                              # [B, H]
            total = lax.dot_general(enc_j, pred_j, (((1,), (1,)), ((), ())),
                                    preferred_element_type=f32)                  # [B, B]
            m = jnp.max(total, axis=-1, keepdims=True)
            e = jnp.exp(total - m)
            ssum = jnp.sum(e, axis=-1, keepdims=True)
            log_sm = total - m - jnp.log(ssum)                                   # log_softmax(-1)
            nce = nce + jnp.sum(log_sm * eye, axis=(0, 1), keepdims=True)
            if j == timestep - 1:
                # torch overwrites `correct` every iteration -> only last j survives.
                # (intentional: mirrors the reference code; do not "fix")
                # argmax(softmax(total,-1), dim=0) == argmax(log_softmax(total,-1), dim=0)
                col_max = jnp.max(log_sm, axis=0, keepdims=True)
                first_max = jnp.min(jnp.where(log_sm >= col_max, row_iota, B),
                                    axis=0, keepdims=True)                        # [1, B]
                hits = jnp.where(
                    first_max == lax.broadcasted_iota(jnp.int32, (1, B), 1), 1.0, 0.0)
                corr = jnp.sum(hits, axis=(0, 1), keepdims=True)

        nce_corr_ref[...] = jnp.concatenate([nce, corr], axis=1)                 # one store

    return kernel


# ------------------------------------------------------------------------------------
# Parameters (all per-forward transposes / reshapes / dtype casts hoisted here)
# ------------------------------------------------------------------------------------
def init_params(key, timestep, dim_hidden=32):
    H = dim_hidden
    Hg = H // 2
    ks = [5, 4, 3, 4]
    keys = jax.random.split(key, 10)

    def w(k, shape, scale):
        return (scale * jax.random.normal(k, shape)).astype(jnp.float32)

    conv1_w = w(keys[0], (H, 1, ks[0]), 0.3)      # PyTorch layout [Cout, Cin, K]
    conv2_w = w(keys[1], (H, H, ks[1]), 0.1)
    conv3_w = w(keys[2], (H, H, ks[2]), 0.1)
    conv4_w = w(keys[3], (H, H, ks[3]), 0.1)
    gru_wih = w(keys[4], (3 * Hg, H), 0.1)        # PyTorch layout [3*Hg, in]
    gru_whh = w(keys[5], (3 * Hg, Hg), 0.1)
    gru_bih = w(keys[6], (3 * Hg,), 0.1)
    gru_bhh = w(keys[7], (3 * Hg,), 0.1)
    wk_w = w(keys[8], (timestep, H, Hg), 0.1)     # nn.Linear weights [H, Hg]
    wk_b = w(keys[9], (timestep, H), 0.1)

    def conv_merged(cw):
        # [Cout, Cin, K] -> [K*Cin, Cout] (tap-major rows, matches in-kernel im2col),
        # stored bf16 so MXU inputs are bf16 with f32 accumulation.
        K, Cin, Cout = cw.shape[2], cw.shape[1], cw.shape[0]
        return jnp.transpose(cw, (2, 1, 0)).reshape(K * Cin, Cout).astype(jnp.bfloat16)

    params = {
        'w1': jnp.transpose(conv1_w[:, 0, :], (1, 0)),                 # [K, Cout], f32
        'w2': conv_merged(conv2_w),
        'w3': conv_merged(conv3_w),
        'w4': conv_merged(conv4_w),
        'wih_t': jnp.transpose(gru_wih),                               # [H, 3Hg]
        'whh_t': jnp.transpose(gru_whh),                               # [Hg, 3Hg]
        'bih': gru_bih.reshape(1, 3 * Hg),
        'bhh': gru_bhh.reshape(1, 3 * Hg),
        # Wk batched: [Hg, timestep*H] so pred_all = c_t @ wk_all is one 128-wide matmul
        'wk_all': jnp.transpose(wk_w, (2, 0, 1)).reshape(Hg, timestep * H),
        'wkb_all': wk_b.reshape(1, timestep * H),
    }
    for i in range(1, 5):                         # BatchNorm1d default affine init
        params[f'bn{i}_gamma'] = jnp.ones((1, H), jnp.float32)
        params[f'bn{i}_beta'] = jnp.zeros((1, H), jnp.float32)
    return params


# ------------------------------------------------------------------------------------
# Forward (mirrors MyModel_cpc.forward): returns (accuracy, nce, hidden)
# ------------------------------------------------------------------------------------
@functools.partial(jax.jit, static_argnames=("timestep", "seq_len", "dim_hidden",
                                             "context_size", "down_freq"))
def my_model_cpc_forward(x, hidden, params, t_samples, *, timestep, seq_len,
                         dim_hidden, context_size=1000, down_freq=5):
    B = x.shape[0]
    H = dim_hidden
    Hg = H // 2
    ks = [5, 4, 3, 4]
    base_t = context_size // down_freq
    Lc = context_size + timestep * down_freq

    # x_in = x[:, :, t - context_size + 1 : t + timestep*down_freq + 1]
    start = (t_samples - context_size + 1).astype(jnp.int32)
    x_in = lax.dynamic_slice_in_dim(x, start, Lc, axis=2)              # [B, 1, Lc]

    # ConstantPad1d((n_padding, 0)) -- module quirk: n_padding from constructor seq_len
    n_padding = 5 - seq_len % 5
    x_pad = jnp.pad(x_in[:, 0, :], ((0, 0), (n_padding, 0)))           # [B, Lpad]
    T = x_pad.shape[1] // 5
    xcol1 = x_pad[:, :T * 5].reshape(B * T, 5)                         # stride-5/k=5 im2col

    PAD = 8                                   # sublane-aligned causal pad (>= max(K)-1 = 3)
    S = ((PAD + T + 7) // 8) * 8              # per-batch row stride, multiple of 8
    base_t_pad = ((base_t + 7) // 8) * 8
    G = 3 * B * Hg

    # ---- batched GRU weights: block-diagonal over B, gate-major column layout ----
    #   gi/gh columns = [ r(b0)..r(bB-1) | z(...) | n(...) ], each Hg wide.
    eyeB = jnp.eye(B, dtype=jnp.float32)
    wih_big = jnp.einsum('ab,hgi->ahgbi', eyeB,
                         params['wih_t'].reshape(H, 3, Hg)).reshape(B * H, G)
    whh_big = jnp.einsum('ab,hgi->ahgbi', eyeB,
                         params['whh_t'].reshape(Hg, 3, Hg)).reshape(B * Hg, G)
    bih_big = jnp.broadcast_to(params['bih'].reshape(3, 1, Hg), (3, B, Hg)).reshape(1, G)
    bhh_big = jnp.broadcast_to(params['bhh'].reshape(3, 1, Hg), (3, B, Hg)).reshape(1, G)
    h0_wide = hidden[0].reshape(1, B * Hg)

    kernel = _make_fused_kernel(B, H, Hg, T, base_t, timestep, PAD, S, ks)
    nce_corr, hT = pl.pallas_call(
        kernel,
        out_shape=(jax.ShapeDtypeStruct((1, 2), jnp.float32),
                   jax.ShapeDtypeStruct((B, Hg), jnp.float32)),
        in_specs=[pl.BlockSpec(memory_space=VMEM)] * 20,
        out_specs=(pl.BlockSpec(memory_space=VMEM),
                   pl.BlockSpec(memory_space=VMEM)),
        scratch_shapes=[pltpu.VMEM((B * S, H), jnp.float32),           # activation ping
                        pltpu.VMEM((B * S, H), jnp.float32),           # activation pong
                        pltpu.VMEM((base_t_pad, G), jnp.float32)],     # hoisted GRU gi
    )(xcol1,
      params['w1'], params['bn1_gamma'], params['bn1_beta'],
      params['w2'], params['bn2_gamma'], params['bn2_beta'],
      params['w3'], params['bn3_gamma'], params['bn3_beta'],
      params['w4'], params['bn4_gamma'], params['bn4_beta'],
      wih_big, whh_big, bih_big, bhh_big, h0_wide,
      params['wk_all'], params['wkb_all'])

    nce = nce_corr[0, 0] / (-1.0 * B * timestep)
    accuracy = nce_corr[0, 1] / B
    hidden_out = hT[None]                                              # [1, B, Hg]
    return accuracy, nce, hidden_out


if __name__ == "__main__":
    key = jax.random.PRNGKey(0)
    timestep = 4
    seq_len = 150
    dim_hidden = 32
    batch = 2
    context_size = 100     # torch module hard-codes 1000; shrunk for small demo shapes
    down_freq = 5

    k_x, k_t, k_p = jax.random.split(key, 3)
    x = jax.random.normal(k_x, (batch, 1, seq_len), jnp.float32)
    params = init_params(k_p, timestep, dim_hidden)
    hidden = jnp.zeros((1, batch, dim_hidden // 2), jnp.float32)       # init_hidden
    # deterministic stand-in for torch.randint(context_size, seq_len - timestep*down_freq - 1)
    t_samples = jax.random.randint(k_t, (), context_size,
                                   seq_len - timestep * down_freq - 1, dtype=jnp.int32)

    accuracy, nce, hidden_out = my_model_cpc_forward(
        x, hidden, params, t_samples,
        timestep=timestep, seq_len=seq_len, dim_hidden=dim_hidden,
        context_size=context_size, down_freq=down_freq)
    jax.block_until_ready((accuracy, nce, hidden_out))
    print("KERNEL_OK")
</pallas_src>

<mosaic_0001>
module attributes {stable_mosaic.version = 11 : i64} {
  func.func @kernel(%arg0: memref<50x5xf32, #tpu.memory_space<vmem>>, %arg1: memref<5x32xf32, #tpu.memory_space<vmem>>, %arg2: memref<1x32xf32, #tpu.memory_space<vmem>>, %arg3: memref<1x32xf32, #tpu.memory_space<vmem>>, %arg4: memref<128x32xbf16, #tpu.memory_space<vmem>>, %arg5: memref<1x32xf32, #tpu.memory_space<vmem>>, %arg6: memref<1x32xf32, #tpu.memory_space<vmem>>, %arg7: memref<96x32xbf16, #tpu.memory_space<vmem>>, %arg8: memref<1x32xf32, #tpu.memory_space<vmem>>, %arg9: memref<1x32xf32, #tpu.memory_space<vmem>>, %arg10: memref<128x32xbf16, #tpu.memory_space<vmem>>, %arg11: memref<1x32xf32, #tpu.memory_space<vmem>>, %arg12: memref<1x32xf32, #tpu.memory_space<vmem>>, %arg13: memref<64x96xf32, #tpu.memory_space<vmem>>, %arg14: memref<32x96xf32, #tpu.memory_space<vmem>>, %arg15: memref<1x96xf32, #tpu.memory_space<vmem>>, %arg16: memref<1x96xf32, #tpu.memory_space<vmem>>, %arg17: memref<1x32xf32, #tpu.memory_space<vmem>>, %arg18: memref<16x128xf32, #tpu.memory_space<vmem>>, %arg19: memref<1x128xf32, #tpu.memory_space<vmem>>, %arg20: memref<1x2xf32, #tpu.memory_space<vmem>>, %arg21: memref<2x16xf32, #tpu.memory_space<vmem>>, %arg22: memref<80x32xf32, #tpu.memory_space<vmem>>, %arg23: memref<80x32xf32, #tpu.memory_space<vmem>>, %arg24: memref<24x96xf32, #tpu.memory_space<vmem>>) attributes {dimension_semantics = [], scalar_prefetch = 0 : i64, scratch_operands = 3 : i64, tpu.core_type = #tpu.core_type<tc>} {
    %cst = arith.constant 0.000000e+00 : f32
    %0 = vector.broadcast %cst : f32 to vector<8x32xf32>
    %c0 = arith.constant 0 : index
    %c0_0 = arith.constant 0 : index
    %1 = vector.load %arg22[%c0, %c0_0] : memref<80x32xf32, #tpu.memory_space<vmem>>, vector<8x32xf32>
    tpu.vector_store %arg22[%c0, %c0_0], %0 {strides = array<i32>} : memref<80x32xf32, #tpu.memory_space<vmem>>, vector<8x32xf32>,
    %c0_1 = arith.constant 0 : index
    %c0_2 = arith.constant 0 : index
    %2 = vector.load %arg23[%c0_1, %c0_2] : memref<80x32xf32, #tpu.memory_space<vmem>>, vector<8x32xf32>
    tpu.vector_store %arg23[%c0_1, %c0_2], %0 {strides = array<i32>} : memref<80x32xf32, #tpu.memory_space<vmem>>, vector<8x32xf32>,
    %c40 = arith.constant 40 : index
    %c0_3 = arith.constant 0 : index
    %3 = vector.load %arg22[%c40, %c0_3] : memref<80x32xf32, #tpu.memory_space<vmem>>, vector<8x32xf32>
    tpu.vector_store %arg22[%c40, %c0_3], %0 {strides = array<i32>} : memref<80x32xf32, #tpu.memory_space<vmem>>, vector<8x32xf32>,
    %c40_4 = arith.constant 40 : index
    %c0_5 = arith.constant 0 : index
    %4 = vector.load %arg23[%c40_4, %c0_5] : memref<80x32xf32, #tpu.memory_space<vmem>>, vector<8x32xf32>
    tpu.vector_store %arg23[%c40_4, %c0_5], %0 {strides = array<i32>} : memref<80x32xf32, #tpu.memory_space<vmem>>, vector<8x32xf32>,
    %c0_6 = arith.constant 0 : index
    %c0_7 = arith.constant 0 : index
    %5 = vector.load %arg0[%c0_6, %c0_7] : memref<50x5xf32, #tpu.memory_space<vmem>>, vector<50x5xf32>
    %c0_8 = arith.constant 0 : index
    %c0_9 = arith.constant 0 : index
    %6 = vector.load %arg1[%c0_8, %c0_9] : memref<5x32xf32, #tpu.memory_space<vmem>>, vector<5x32xf32>
    %cst_10 = arith.constant dense<0.000000e+00> : vector<50x32xf32>
    %7 = tpu.matmul %5, %6, %cst_10 {dimension_numbers = #tpu.dot_dimension_numbers<[1], [0], [0], [1], [0, 0, 1, 1], [], []>} : vector<50x5xf32>, vector<5x32xf32>, vector<50x32xf32> -> vector<50x32xf32>
    %c0_11 = arith.constant 0 : index
    %c0_12 = arith.constant 0 : index
    %8 = vector.load %arg2[%c0_11, %c0_12] : memref<1x32xf32, #tpu.memory_space<vmem>>, vector<1x32xf32>
    %c0_13 = arith.constant 0 : index
    %c0_14 = arith.constant 0 : index
    %9 = vector.load %arg3[%c0_13, %c0_14] : memref<1x32xf32, #tpu.memory_space<vmem>>, vector<1x32xf32>
    %cst_15 = arith.constant dense<0.000000e+00> : vector<32xf32>
    %10 = vector.multi_reduction <add>, %7, %cst_15 [0] : vector<50x32xf32> to vector<32xf32>
    %11 = vector.shape_cast %10 : vector<32xf32> to vector<1x32xf32>
    %12 = arith.mulf %7, %7 : vector<50x32xf32>
    %cst_16 = arith.constant dense<0.000000e+00> : vector<32xf32>
    %13 = vector.multi_reduction <add>, %12, %cst_16 [0] : vector<50x32xf32> to vector<32xf32>
    %14 = vector.shape_cast %13 : vector<32xf32> to vector<1x32xf32>
    %cst_17 = arith.constant 5.000000e+01 : f32
    %15 = vector.broadcast %cst_17 : f32 to vector<1x32xf32>
    %16 = arith.divf %11, %15 : vector<1x32xf32>
    %cst_18 = arith.constant 5.000000e+01 : f32
    %17 = vector.broadcast %cst_18 : f32 to vector<1x32xf32>
    %18 = arith.divf %14, %17 : vector<1x32xf32>
    %19 = arith.mulf %16, %16 : vector<1x32xf32>
    %20 = arith.subf %18, %19 : vector<1x32xf32>
    %cst_19 = arith.constant 0.000000e+00 : f32
    %21 = vector.broadcast %cst_19 : f32 to vector<1x32xf32>
    %22 = arith.maximumf %20, %21 : vector<1x32xf32>
    %cst_20 = arith.constant 9.99999974E-6 : f32
    %23 = vector.broadcast %cst_20 : f32 to vector<1x32xf32>
    %24 = arith.addf %22, %23 : vector<1x32xf32>
    %25 = math.rsqrt %24 : vector<1x32xf32>
    %26 = arith.mulf %25, %8 : vector<1x32xf32>
    %27 = arith.mulf %16, %26 : vector<1x32xf32>
    %28 = arith.subf %9, %27 : vector<1x32xf32>
    %29 = vector.broadcast %26 : vector<1x32xf32> to vector<50x32xf32>
    %30 = arith.mulf %7, %29 : vector<50x32xf32>
    %31 = vector.broadcast %28 : vector<1x32xf32> to vector<50x32xf32>
    %32 = arith.addf %30, %31 : vector<50x32xf32>
    %cst_21 = arith.constant 0.000000e+00 : f32
    %33 = vector.broadcast %cst_21 : f32 to vector<50x32xf32>
    %34 = arith.cmpf ogt, %32, %33 : vector<50x32xf32>
    %cst_22 = arith.constant 0.00999999977 : f32
    %35 = vector.broadcast %cst_22 : f32 to vector<50x32xf32>
    %36 = arith.mulf %35, %32 : vector<50x32xf32>
    %37 = arith.select %34, %32, %36 : vector<50x32xi1>, vector<50x32xf32>
    %38 = vector.extract_strided_slice %37 {offsets = [0, 0], sizes = [25, 32], strides = [1, 1]} : vector<50x32xf32> to vector<25x32xf32>
    %c8 = arith.constant 8 : index
    %c0_23 = arith.constant 0 : index
    %39 = vector.load %arg22[%c8, %c0_23] : memref<80x32xf32, #tpu.memory_space<vmem>>, vector<25x32xf32>
    tpu.vector_store %arg22[%c8, %c0_23], %38 {strides = array<i32>} : memref<80x32xf32, #tpu.memory_space<vmem>>, vector<25x32xf32>,
    %40 = vector.extract_strided_slice %37 {offsets = [25, 0], sizes = [25, 32], strides = [1, 1]} : vector<50x32xf32> to vector<25x32xf32>
    %c48 = arith.constant 48 : index
    %c0_24 = arith.constant 0 : index
    %41 = vector.load %arg22[%c48, %c0_24] : memref<80x32xf32, #tpu.memory_space<vmem>>, vector<25x32xf32>
    tpu.vector_store %arg22[%c48, %c0_24], %40 {strides = array<i32>} : memref<80x32xf32, #tpu.memory_space<vmem>>, vector<25x32xf32>,
    %c0_25 = arith.constant 0 : index
    %c0_26 = arith.constant 0 : index
    %42 = vector.load %arg4[%c0_25, %c0_26] : memref<128x32xbf16, #tpu.memory_space<vmem>>, vector<128x32xbf16>
    %c5 = arith.constant 5 : index
    %c0_27 = arith.constant 0 : index
    %43 = vector.load %arg22[%c5, %c0_27] : memref<80x32xf32, #tpu.memory_space<vmem>>, vector<25x32xf32>
    %c6 = arith.constant 6 : index
    %c0_28 = arith.constant 0 : index
    %44 = vector.load %arg22[%c6, %c0_28] : memref<80x32xf32, #tpu.memory_space<vmem>>, vector<25x32xf32>
    %c7 = arith.constant 7 : index
    %c0_29 = arith.constant 0 : index
    %45 = vector.load %arg22[%c7, %c0_29] : memref<80x32xf32, #tpu.memory_space<vmem>>, vector<25x32xf32>
    %c8_30 = arith.constant 8 : index
    %c0_31 = arith.constant 0 : index
    %46 = vector.load %arg22[%c8_30, %c0_31] : memref<80x32xf32, #tpu.memory_space<vmem>>, vector<25x32xf32>
    %47 = tpu.concatenate %43, %44, %45, %46 in 1 : vector<25x32xf32>, vector<25x32xf32>, vector<25x32xf32>, vector<25x32xf32> -> vector<25x128xf32>
    %48 = arith.truncf %47 : vector<25x128xf32> to vector<25x128xbf16>
    %cst_32 = arith.constant dense<0.000000e+00> : vector<25x32xf32>
    %49 = tpu.matmul %48, %42, %cst_32 {dimension_numbers = #tpu.dot_dimension_numbers<[1], [0], [0], [1], [0, 0, 1, 1], [], []>} : vector<25x128xbf16>, vector<128x32xbf16>, vector<25x32xf32> -> vector<25x32xf32>
    %c45 = arith.constant 45 : index
    %c0_33 = arith.constant 0 : index
    %50 = vector.load %arg22[%c45, %c0_33] : memref<80x32xf32, #tpu.memory_space<vmem>>, vector<25x32xf32>
    %c46 = arith.constant 46 : index
    %c0_34 = arith.constant 0 : index
    %51 = vector.load %arg22[%c46, %c0_34] : memref<80x32xf32, #tpu.memory_space<vmem>>, vector<25x32xf32>
    %c47 = arith.constant 47 : index
    %c0_35 = arith.constant 0 : index
    %52 = vector.load %arg22[%c47, %c0_35] : memref<80x32xf32, #tpu.memory_space<vmem>>, vector<25x32xf32>
    %c48_36 = arith.constant 48 : index
    %c0_37 = arith.constant 0 : index
    %53 = vector.load %arg22[%c48_36, %c0_37] : memref<80x32xf32, #tpu.memory_space<vmem>>, vector<25x32xf32>
    %54 = tpu.concatenate %50, %51, %52, %53 in 1 : vector<25x32xf32>, vector<25x32xf32>, vector<25x32xf32>, vector<25x32xf32> -> vector<25x128xf32>
    %55 = arith.truncf %54 : vector<25x128xf32> to vector<25x128xbf16>
    %cst_38 = arith.constant dense<0.000000e+00> : vector<25x32xf32>
    %56 = tpu.matmul %55, %42, %cst_38 {dimension_numbers = #tpu.dot_dimension_numbers<[1], [0], [0], [1], [0, 0, 1, 1], [], []>} : vector<25x128xbf16>, vector<128x32xbf16>, vector<25x32xf32> -> vector<25x32xf32>
    %c0_39 = arith.constant 0 : index
    %c0_40 = arith.constant 0 : index
    %57 = vector.load %arg5[%c0_39, %c0_40] : memref<1x32xf32, #tpu.memory_space<vmem>>, vector<1x32xf32>
    %c0_41 = arith.constant 0 : index
    %c0_42 = arith.constant 0 : index
    %58 = vector.load %arg6[%c0_41, %c0_42] : memref<1x32xf32, #tpu.memory_space<vmem>>, vector<1x32xf32>
    %cst_43 = arith.constant dense<0.000000e+00> : vector<32xf32>
    %59 = vector.multi_reduction <add>, %49, %cst_43 [0] : vector<25x32xf32> to vector<32xf32>
    %60 = vector.shape_cast %59 : vector<32xf32> to vector<1x32xf32>
    %61 = arith.mulf %49, %49 : vector<25x32xf32>
    %cst_44 = arith.constant dense<0.000000e+00> : vector<32xf32>
    %62 = vector.multi_reduction <add>, %61, %cst_44 [0] : vector<25x32xf32> to vector<32xf32>
    %63 = vector.shape_cast %62 : vector<32xf32> to vector<1x32xf32>
    %cst_45 = arith.constant dense<0.000000e+00> : vector<32xf32>
    %64 = vector.multi_reduction <add>, %56, %cst_45 [0] : vector<25x32xf32> to vector<32xf32>
    %65 = vector.shape_cast %64 : vector<32xf32> to vector<1x32xf32>
    %66 = arith.addf %60, %65 : vector<1x32xf32>
    %67 = arith.mulf %56, %56 : vector<25x32xf32>
    %cst_46 = arith.constant dense<0.000000e+00> : vector<32xf32>
    %68 = vector.multi_reduction <add>, %67, %cst_46 [0] : vector<25x32xf32> to vector<32xf32>
    %69 = vector.shape_cast %68 : vector<32xf32> to vector<1x32xf32>
    %70 = arith.addf %63, %69 : vector<1x32xf32>
    %cst_47 = arith.constant 5.000000e+01 : f32
    %71 = vector.broadcast %cst_47 : f32 to vector<1x32xf32>
    %72 = arith.divf %66, %71 : vector<1x32xf32>
    %cst_48 = arith.constant 5.000000e+01 : f32
    %73 = vector.broadcast %cst_48 : f32 to vector<1x32xf32>
    %74 = arith.divf %70, %73 : vector<1x32xf32>
    %75 = arith.mulf %72, %72 : vector<1x32xf32>
    %76 = arith.subf %74, %75 : vector<1x32xf32>
    %cst_49 = arith.constant 0.000000e+00 : f32
    %77 = vector.broadcast %cst_49 : f32 to vector<1x32xf32>
    %78 = arith.maximumf %76, %77 : vector<1x32xf32>
    %cst_50 = arith.constant 9.99999974E-6 : f32
    %79 = vector.broadcast %cst_50 : f32 to vector<1x32xf32>
    %80 = arith.addf %78, %79 : vector<1x32xf32>
    %81 = math.rsqrt %80 : vector<1x32xf32>
    %82 = arith.mulf %81, %57 : vector<1x32xf32>
    %83 = arith.mulf %72, %82 : vector<1x32xf32>
    %84 = arith.subf %58, %83 : vector<1x32xf32>
    %85 = vector.broadcast %82 : vector<1x32xf32> to vector<25x32xf32>
    %86 = arith.mulf %49, %85 : vector<25x32xf32>
    %87 = vector.broadcast %84 : vector<1x32xf32> to vector<25x32xf32>
    %88 = arith.addf %86, %87 : vector<25x32xf32>
    %cst_51 = arith.constant 0.000000e+00 : f32
    %89 = vector.broadcast %cst_51 : f32 to vector<25x32xf32>
    %90 = arith.cmpf ogt, %88, %89 : vector<25x32xf32>
    %cst_52 = arith.constant 0.00999999977 : f32
    %91 = vector.broadcast %cst_52 : f32 to vector<25x32xf32>
    %92 = arith.mulf %91, %88 : vector<25x32xf32>
    %93 = arith.select %90, %88, %92 : vector<25x32xi1>, vector<25x32xf32>
    %c8_53 = arith.constant 8 : index
    %c0_54 = arith.constant 0 : index
    %94 = vector.load %arg23[%c8_53, %c0_54] : memref<80x32xf32, #tpu.memory_space<vmem>>, vector<25x32xf32>
    tpu.vector_store %arg23[%c8_53, %c0_54], %93 {strides = array<i32>} : memref<80x32xf32, #tpu.memory_space<vmem>>, vector<25x32xf32>,
    %95 = vector.broadcast %82 : vector<1x32xf32> to vector<25x32xf32>
    %96 = arith.mulf %56, %95 : vector<25x32xf32>
    %97 = vector.broadcast %84 : vector<1x32xf32> to vector<25x32xf32>
    %98 = arith.addf %96, %97 : vector<25x32xf32>
    %cst_55 = arith.constant 0.000000e+00 : f32
    %99 = vector.broadcast %cst_55 : f32 to vector<25x32xf32>
    %100 = arith.cmpf ogt, %98, %99 : vector<25x32xf32>
    %cst_56 = arith.constant 0.00999999977 : f32
    %101 = vector.broadcast %cst_56 : f32 to vector<25x32xf32>
    %102 = arith.mulf %101, %98 : vector<25x32xf32>
    %103 = arith.select %100, %98, %102 : vector<25x32xi1>, vector<25x32xf32>
    %c48_57 = arith.constant 48 : index
    %c0_58 = arith.constant 0 : index
    %104 = vector.load %arg23[%c48_57, %c0_58] : memref<80x32xf32, #tpu.memory_space<vmem>>, vector<25x32xf32>
    tpu.vector_store %arg23[%c48_57, %c0_58], %103 {strides = array<i32>} : memref<80x32xf32, #tpu.memory_space<vmem>>, vector<25x32xf32>,
    %c0_59 = arith.constant 0 : index
    %c0_60 = arith.constant 0 : index
    %105 = vector.load %arg7[%c0_59, %c0_60] : memref<96x32xbf16, #tpu.memory_space<vmem>>, vector<96x32xbf16>
    %c6_61 = arith.constant 6 : index
    %c0_62 = arith.constant 0 : index
    %106 = vector.load %arg23[%c6_61, %c0_62] : memref<80x32xf32, #tpu.memory_space<vmem>>, vector<25x32xf32>
    %c7_63 = arith.constant 7 : index
    %c0_64 = arith.constant 0 : index
    %107 = vector.load %arg23[%c7_63, %c0_64] : memref<80x32xf32, #tpu.memory_space<vmem>>, vector<25x32xf32>
    %c8_65 = arith.constant 8 : index
    %c0_66 = arith.constant 0 : index
    %108 = vector.load %arg23[%c8_65, %c0_66] : memref<80x32xf32, #tpu.memory_space<vmem>>, vector<25x32xf32>
    %109 = tpu.concatenate %106, %107, %108 in 1 : vector<25x32xf32>, vector<25x32xf32>, vector<25x32xf32> -> vector<25x96xf32>
    %110 = arith.truncf %109 : vector<25x96xf32> to vector<25x96xbf16>
    %cst_67 = arith.constant dense<0.000000e+00> : vector<25x32xf32>
    %111 = tpu.matmul %110, %105, %cst_67 {dimension_numbers = #tpu.dot_dimension_numbers<[1], [0], [0], [1], [0, 0, 1, 1], [], []>} : vector<25x96xbf16>, vector<96x32xbf16>, vector<25x32xf32> -> vector<25x32xf32>
    %c46_68 = arith.constant 46 : index
    %c0_69 = arith.constant 0 : index
    %112 = vector.load %arg23[%c46_68, %c0_69] : memref<80x32xf32, #tpu.memory_space<vmem>>, vector<25x32xf32>
    %c47_70 = arith.constant 47 : index
    %c0_71 = arith.constant 0 : index
    %113 = vector.load %arg23[%c47_70, %c0_71] : memref<80x32xf32, #tpu.memory_space<vmem>>, vector<25x32xf32>
    %c48_72 = arith.constant 48 : index
    %c0_73 = arith.constant 0 : index
    %114 = vector.load %arg23[%c48_72, %c0_73] : memref<80x32xf32, #tpu.memory_space<vmem>>, vector<25x32xf32>
    %115 = tpu.concatenate %112, %113, %114 in 1 : vector<25x32xf32>, vector<25x32xf32>, vector<25x32xf32> -> vector<25x96xf32>
    %116 = arith.truncf %115 : vector<25x96xf32> to vector<25x96xbf16>
    %cst_74 = arith.constant dense<0.000000e+00> : vector<25x32xf32>
    %117 = tpu.matmul %116, %105, %cst_74 {dimension_numbers = #tpu.dot_dimension_numbers<[1], [0], [0], [1], [0, 0, 1, 1], [], []>} : vector<25x96xbf16>, vector<96x32xbf16>, vector<25x32xf32> -> vector<25x32xf32>
    %c0_75 = arith.constant 0 : index
    %c0_76 = arith.constant 0 : index
    %118 = vector.load %arg8[%c0_75, %c0_76] : memref<1x32xf32, #tpu.memory_space<vmem>>, vector<1x32xf32>
    %c0_77 = arith.constant 0 : index
    %c0_78 = arith.constant 0 : index
    %119 = vector.load %arg9[%c0_77, %c0_78] : memref<1x32xf32, #tpu.memory_space<vmem>>, vector<1x32xf32>
    %cst_79 = arith.constant dense<0.000000e+00> : vector<32xf32>
    %120 = vector.multi_reduction <add>, %111, %cst_79 [0] : vector<25x32xf32> to vector<32xf32>
    %121 = vector.shape_cast %120 : vector<32xf32> to vector<1x32xf32>
    %122 = arith.mulf %111, %111 : vector<25x32xf32>
    %cst_80 = arith.constant dense<0.000000e+00> : vector<32xf32>
    %123 = vector.multi_reduction <add>, %122, %cst_80 [0] : vector<25x32xf32> to vector<32xf32>
    %124 = vector.shape_cast %123 : vector<32xf32> to vector<1x32xf32>
    %cst_81 = arith.constant dense<0.000000e+00> : vector<32xf32>
    %125 = vector.multi_reduction <add>, %117, %cst_81 [0] : vector<25x32xf32> to vector<32xf32>
    %126 = vector.shape_cast %125 : vector<32xf32> to vector<1x32xf32>
    %127 = arith.addf %121, %126 : vector<1x32xf32>
    %128 = arith.mulf %117, %117 : vector<25x32xf32>
    %cst_82 = arith.constant dense<0.000000e+00> : vector<32xf32>
    %129 = vector.multi_reduction <add>, %128, %cst_82 [0] : vector<25x32xf32> to vector<32xf32>
    %130 = vector.shape_cast %129 : vector<32xf32> to vector<1x32xf32>
    %131 = arith.addf %124, %130 : vector<1x32xf32>
    %cst_83 = arith.constant 5.000000e+01 : f32
    %132 = vector.broadcast %cst_83 : f32 to vector<1x32xf32>
    %133 = arith.divf %127, %132 : vector<1x32xf32>
    %cst_84 = arith.constant 5.000000e+01 : f32
    %134 = vector.broadcast %cst_84 : f32 to vector<1x32xf32>
    %135 = arith.divf %131, %134 : vector<1x32xf32>
    %136 = arith.mulf %133, %133 : vector<1x32xf32>
    %137 = arith.subf %135, %136 : vector<1x32xf32>
    %cst_85 = arith.constant 0.000000e+00 : f32
    %138 = vector.broadcast %cst_85 : f32 to vector<1x32xf32>
    %139 = arith.maximumf %137, %138 : vector<1x32xf32>
    %cst_86 = arith.constant 9.99999974E-6 : f32
    %140 = vector.broadcast %cst_86 : f32 to vector<1x32xf32>
    %141 = arith.addf %139, %140 : vector<1x32xf32>
    %142 = math.rsqrt %141 : vector<1x32xf32>
    %143 = arith.mulf %142, %118 : vector<1x32xf32>
    %144 = arith.mulf %133, %143 : vector<1x32xf32>
    %145 = arith.subf %119, %144 : vector<1x32xf32>
    %146 = vector.broadcast %143 : vector<1x32xf32> to vector<25x32xf32>
    %147 = arith.mulf %111, %146 : vector<25x32xf32>
    %148 = vector.broadcast %145 : vector<1x32xf32> to vector<25x32xf32>
    %149 = arith.addf %147, %148 : vector<25x32xf32>
    %cst_87 = arith.constant 0.000000e+00 : f32
    %150 = vector.broadcast %cst_87 : f32 to vector<25x32xf32>
    %151 = arith.cmpf ogt, %149, %150 : vector<25x32xf32>
    %cst_88 = arith.constant 0.00999999977 : f32
    %152 = vector.broadcast %cst_88 : f32 to vector<25x32xf32>
    %153 = arith.mulf %152, %149 : vector<25x32xf32>
    %154 = arith.select %151, %149, %153 : vector<25x32xi1>, vector<25x32xf32>
    %c8_89 = arith.constant 8 : index
    %c0_90 = arith.constant 0 : index
    %155 = vector.load %arg22[%c8_89, %c0_90] : memref<80x32xf32, #tpu.memory_space<vmem>>, vector<25x32xf32>
    tpu.vector_store %arg22[%c8_89, %c0_90], %154 {strides = array<i32>} : memref<80x32xf32, #tpu.memory_space<vmem>>, vector<25x32xf32>,
    %156 = vector.broadcast %143 : vector<1x32xf32> to vector<25x32xf32>
    %157 = arith.mulf %117, %156 : vector<25x32xf32>
    %158 = vector.broadcast %145 : vector<1x32xf32> to vector<25x32xf32>
    %159 = arith.addf %157, %158 : vector<25x32xf32>
    %cst_91 = arith.constant 0.000000e+00 : f32
    %160 = vector.broadcast %cst_91 : f32 to vector<25x32xf32>
    %161 = arith.cmpf ogt, %159, %160 : vector<25x32xf32>
    %cst_92 = arith.constant 0.00999999977 : f32
    %162 = vector.broadcast %cst_92 : f32 to vector<25x32xf32>
    %163 = arith.mulf %162, %159 : vector<25x32xf32>
    %164 = arith.select %161, %159, %163 : vector<25x32xi1>, vector<25x32xf32>
    %c48_93 = arith.constant 48 : index
    %c0_94 = arith.constant 0 : index
    %165 = vector.load %arg22[%c48_93, %c0_94] : memref<80x32xf32, #tpu.memory_space<vmem>>, vector<25x32xf32>
    tpu.vector_store %arg22[%c48_93, %c0_94], %164 {strides = array<i32>} : memref<80x32xf32, #tpu.memory_space<vmem>>, vector<25x32xf32>,
    %c0_95 = arith.constant 0 : index
    %c0_96 = arith.constant 0 : index
    %166 = vector.load %arg10[%c0_95, %c0_96] : memref<128x32xbf16, #tpu.memory_space<vmem>>, vector<128x32xbf16>
    %c5_97 = arith.constant 5 : index
    %c0_98 = arith.constant 0 : index
    %167 = vector.load %arg22[%c5_97, %c0_98] : memref<80x32xf32, #tpu.memory_space<vmem>>, vector<25x32xf32>
    %c6_99 = arith.constant 6 : index
    %c0_100 = arith.constant 0 : index
    %168 = vector.load %arg22[%c6_99, %c0_100] : memref<80x32xf32, #tpu.memory_space<vmem>>, vector<25x32xf32>
    %c7_101 = arith.constant 7 : index
    %c0_102 = arith.constant 0 : index
    %169 = vector.load %arg22[%c7_101, %c0_102] : memref<80x32xf32, #tpu.memory_space<vmem>>, vector<25x32xf32>
    %c8_103 = arith.constant 8 : index
    %c0_104 = arith.constant 0 : index
    %170 = vector.load %arg22[%c8_103, %c0_104] : memref<80x32xf32, #tpu.memory_space<vmem>>, vector<25x32xf32>
    %171 = tpu.concatenate %167, %168, %169, %170 in 1 : vector<25x32xf32>, vector<25x32xf32>, vector<25x32xf32>, vector<25x32xf32> -> vector<25x128xf32>
    %172 = arith.truncf %171 : vector<25x128xf32> to vector<25x128xbf16>
    %cst_105 = arith.constant dense<0.000000e+00> : vector<25x32xf32>
    %173 = tpu.matmul %172, %166, %cst_105 {dimension_numbers = #tpu.dot_dimension_numbers<[1], [0], [0], [1], [0, 0, 1, 1], [], []>} : vector<25x128xbf16>, vector<128x32xbf16>, vector<25x32xf32> -> vector<25x32xf32>
    %c45_106 = arith.constant 45 : index
    %c0_107 = arith.constant 0 : index
    %174 = vector.load %arg22[%c45_106, %c0_107] : memref<80x32xf32, #tpu.memory_space<vmem>>, vector<25x32xf32>
    %c46_108 = arith.constant 46 : index
    %c0_109 = arith.constant 0 : index
    %175 = vector.load %arg22[%c46_108, %c0_109] : memref<80x32xf32, #tpu.memory_space<vmem>>, vector<25x32xf32>
    %c47_110 = arith.constant 47 : index
    %c0_111 = arith.constant 0 : index
    %176 = vector.load %arg22[%c47_110, %c0_111] : memref<80x32xf32, #tpu.memory_space<vmem>>, vector<25x32xf32>
    %c48_112 = arith.constant 48 : index
    %c0_113 = arith.constant 0 : index
    %177 = vector.load %arg22[%c48_112, %c0_113] : memref<80x32xf32, #tpu.memory_space<vmem>>, vector<25x32xf32>
    %178 = tpu.concatenate %174, %175, %176, %177 in 1 : vector<25x32xf32>, vector<25x32xf32>, vector<25x32xf32>, vector<25x32xf32> -> vector<25x128xf32>
    %179 = arith.truncf %178 : vector<25x128xf32> to vector<25x128xbf16>
    %cst_114 = arith.constant dense<0.000000e+00> : vector<25x32xf32>
    %180 = tpu.matmul %179, %166, %cst_114 {dimension_numbers = #tpu.dot_dimension_numbers<[1], [0], [0], [1], [0, 0, 1, 1], [], []>} : vector<25x128xbf16>, vector<128x32xbf16>, vector<25x32xf32> -> vector<25x32xf32>
    %c0_115 = arith.constant 0 : index
    %c0_116 = arith.constant 0 : index
    %181 = vector.load %arg11[%c0_115, %c0_116] : memref<1x32xf32, #tpu.memory_space<vmem>>, vector<1x32xf32>
    %c0_117 = arith.constant 0 : index
    %c0_118 = arith.constant 0 : index
    %182 = vector.load %arg12[%c0_117, %c0_118] : memref<1x32xf32, #tpu.memory_space<vmem>>, vector<1x32xf32>
    %cst_119 = arith.constant dense<0.000000e+00> : vector<32xf32>
    %183 = vector.multi_reduction <add>, %173, %cst_119 [0] : vector<25x32xf32> to vector<32xf32>
    %184 = vector.shape_cast %183 : vector<32xf32> to vector<1x32xf32>
    %185 = arith.mulf %173, %173 : vector<25x32xf32>
    %cst_120 = arith.constant dense<0.000000e+00> : vector<32xf32>
    %186 = vector.multi_reduction <add>, %185, %cst_120 [0] : vector<25x32xf32> to vector<32xf32>
    %187 = vector.shape_cast %186 : vector<32xf32> to vector<1x32xf32>
    %cst_121 = arith.constant dense<0.000000e+00> : vector<32xf32>
    %188 = vector.multi_reduction <add>, %180, %cst_121 [0] : vector<25x32xf32> to vector<32xf32>
    %189 = vector.shape_cast %188 : vector<32xf32> to vector<1x32xf32>
    %190 = arith.addf %184, %189 : vector<1x32xf32>
    %191 = arith.mulf %180, %180 : vector<25x32xf32>
    %cst_122 = arith.constant dense<0.000000e+00> : vector<32xf32>
    %192 = vector.multi_reduction <add>, %191, %cst_122 [0] : vector<25x32xf32> to vector<32xf32>
    %193 = vector.shape_cast %192 : vector<32xf32> to vector<1x32xf32>
    %194 = arith.addf %187, %193 : vector<1x32xf32>
    %cst_123 = arith.constant 5.000000e+01 : f32
    %195 = vector.broadcast %cst_123 : f32 to vector<1x32xf32>
    %196 = arith.divf %190, %195 : vector<1x32xf32>
    %cst_124 = arith.constant 5.000000e+01 : f32
    %197 = vector.broadcast %cst_124 : f32 to vector<1x32xf32>
    %198 = arith.divf %194, %197 : vector<1x32xf32>
    %199 = arith.mulf %196, %196 : vector<1x32xf32>
    %200 = arith.subf %198, %199 : vector<1x32xf32>
    %cst_125 = arith.constant 0.000000e+00 : f32
    %201 = vector.broadcast %cst_125 : f32 to vector<1x32xf32>
    %202 = arith.maximumf %200, %201 : vector<1x32xf32>
    %cst_126 = arith.constant 9.99999974E-6 : f32
    %203 = vector.broadcast %cst_126 : f32 to vector<1x32xf32>
    %204 = arith.addf %202, %203 : vector<1x32xf32>
    %205 = math.rsqrt %204 : vector<1x32xf32>
    %206 = arith.mulf %205, %181 : vector<1x32xf32>
    %207 = arith.mulf %196, %206 : vector<1x32xf32>
    %208 = arith.subf %182, %207 : vector<1x32xf32>
    %209 = vector.broadcast %206 : vector<1x32xf32> to vector<25x32xf32>
    %210 = arith.mulf %173, %209 : vector<25x32xf32>
    %211 = vector.broadcast %208 : vector<1x32xf32> to vector<25x32xf32>
    %212 = arith.addf %210, %211 : vector<25x32xf32>
    %cst_127 = arith.constant 0.000000e+00 : f32
    %213 = vector.broadcast %cst_127 : f32 to vector<25x32xf32>
    %214 = arith.cmpf ogt, %212, %213 : vector<25x32xf32>
    %cst_128 = arith.constant 0.00999999977 : f32
    %215 = vector.broadcast %cst_128 : f32 to vector<25x32xf32>
    %216 = arith.mulf %215, %212 : vector<25x32xf32>
    %217 = arith.select %214, %212, %216 : vector<25x32xi1>, vector<25x32xf32>
    %c8_129 = arith.constant 8 : index
    %c0_130 = arith.constant 0 : index
    %218 = vector.load %arg23[%c8_129, %c0_130] : memref<80x32xf32, #tpu.memory_space<vmem>>, vector<25x32xf32>
    tpu.vector_store %arg23[%c8_129, %c0_130], %217 {strides = array<i32>} : memref<80x32xf32, #tpu.memory_space<vmem>>, vector<25x32xf32>,
    %219 = vector.broadcast %206 : vector<1x32xf32> to vector<25x32xf32>
    %220 = arith.mulf %180, %219 : vector<25x32xf32>
    %221 = vector.broadcast %208 : vector<1x32xf32> to vector<25x32xf32>
    %222 = arith.addf %220, %221 : vector<25x32xf32>
    %cst_131 = arith.constant 0.000000e+00 : f32
    %223 = vector.broadcast %cst_131 : f32 to vector<25x32xf32>
    %224 = arith.cmpf ogt, %222, %223 : vector<25x32xf32>
    %cst_132 = arith.constant 0.00999999977 : f32
    %225 = vector.broadcast %cst_132 : f32 to vector<25x32xf32>
    %226 = arith.mulf %225, %222 : vector<25x32xf32>
    %227 = arith.select %224, %222, %226 : vector<25x32xi1>, vector<25x32xf32>
    %c48_133 = arith.constant 48 : index
    %c0_134 = arith.constant 0 : index
    %228 = vector.load %arg23[%c48_133, %c0_134] : memref<80x32xf32, #tpu.memory_space<vmem>>, vector<25x32xf32>
    tpu.vector_store %arg23[%c48_133, %c0_134], %227 {strides = array<i32>} : memref<80x32xf32, #tpu.memory_space<vmem>>, vector<25x32xf32>,
    %c8_135 = arith.constant 8 : index
    %c0_136 = arith.constant 0 : index
    %229 = vector.load %arg23[%c8_135, %c0_136] : memref<80x32xf32, #tpu.memory_space<vmem>>, vector<20x32xf32>
    %c48_137 = arith.constant 48 : index
    %c0_138 = arith.constant 0 : index
    %230 = vector.load %arg23[%c48_137, %c0_138] : memref<80x32xf32, #tpu.memory_space<vmem>>, vector<20x32xf32>
    %231 = tpu.concatenate %229, %230 in 1 : vector<20x32xf32>, vector<20x32xf32> -> vector<20x64xf32>
    %c0_139 = arith.constant 0 : index
    %c0_140 = arith.constant 0 : index
    %232 = vector.load %arg13[%c0_139, %c0_140] : memref<64x96xf32, #tpu.memory_space<vmem>>, vector<64x96xf32>
    %cst_141 = arith.constant dense<0.000000e+00> : vector<20x96xf32>
    %233 = tpu.matmul %231, %232, %cst_141 {dimension_numbers = #tpu.dot_dimension_numbers<[1], [0], [0], [1], [0, 0, 1, 1], [], []>} : vector<20x64xf32>, vector<64x96xf32>, vector<20x96xf32> -> vector<20x96xf32>
    %c0_142 = arith.constant 0 : index
    %c0_143 = arith.constant 0 : index
    %234 = vector.load %arg15[%c0_142, %c0_143] : memref<1x96xf32, #tpu.memory_space<vmem>>, vector<1x96xf32>
    %235 = vector.broadcast %234 : vector<1x96xf32> to vector<20x96xf32>
    %236 = arith.addf %233, %235 : vector<20x96xf32>
    %c0_144 = arith.constant 0 : index
    %c0_145 = arith.constant 0 : index
    %237 = vector.load %arg24[%c0_144, %c0_145] : memref<24x96xf32, #tpu.memory_space<vmem>>, vector<20x96xf32>
    tpu.vector_store %arg24[%c0_144, %c0_145], %236 {strides = array<i32>} : memref<24x96xf32, #tpu.memory_space<vmem>>, vector<20x96xf32>,
    %c0_146 = arith.constant 0 : index
    %c0_147 = arith.constant 0 : index
    %238 = vector.load %arg14[%c0_146, %c0_147] : memref<32x96xf32, #tpu.memory_space<vmem>>, vector<32x96xf32>
    %c0_148 = arith.constant 0 : index
    %c0_149 = arith.constant 0 : index
    %239 = vector.load %arg16[%c0_148, %c0_149] : memref<1x96xf32, #tpu.memory_space<vmem>>, vector<1x96xf32>
    %c0_150 = arith.constant 0 : index
    %c0_151 = arith.constant 0 : index
    %240 = vector.load %arg17[%c0_150, %c0_151] : memref<1x32xf32, #tpu.memory_space<vmem>>, vector<1x32xf32>
    %c0_i32 = arith.constant 0 : i32
    %c20_i32 = arith.constant 20 : i32
    %241 = arith.addi %c0_i32, %c20_i32 : i32
    %c1_i32 = arith.constant 1 : i32
    %242 = scf.for %arg25 = %c0_i32 to %241 step %c1_i32 iter_args(%arg26 = %240) -> (vector<1x32xf32>)  : i32 {
      %375 = arith.index_cast %arg25 : i32 to index
      %c0_194 = arith.constant 0 : index
      %376 = vector.load %arg24[%375, %c0_194] : memref<24x96xf32, #tpu.memory_space<vmem>>, vector<1x96xf32>
      %cst_195 = arith.constant dense<0.000000e+00> : vector<1x96xf32>
      %377 = tpu.matmul %arg26, %238, %cst_195 {dimension_numbers = #tpu.dot_dimension_numbers<[1], [0], [0], [1], [0, 0, 1, 1], [], []>} : vector<1x32xf32>, vector<32x96xf32>, vector<1x96xf32> -> vector<1x96xf32>
      %378 = arith.addf %377, %239 : vector<1x96xf32>
      %379 = vector.extract_strided_slice %376 {offsets = [0, 0], sizes = [1, 64], strides = [1, 1]} : vector<1x96xf32> to vector<1x64xf32>
      %380 = vector.extract_strided_slice %378 {offsets = [0, 0], sizes = [1, 64], strides = [1, 1]} : vector<1x96xf32> to vector<1x64xf32>
      %381 = arith.addf %379, %380 : vector<1x64xf32>
      %382 = arith.negf %381 : vector<1x64xf32>
      %383 = math.exp %382 : vector<1x64xf32>
      %cst_196 = arith.constant 1.000000e+00 : f32
      %384 = vector.broadcast %cst_196 : f32 to vector<1x64xf32>
      %385 = arith.addf %384, %383 : vector<1x64xf32>
      %386 = arith.divf %384, %385 : vector<1x64xf32>
      %387 = vector.extract_strided_slice %386 {offsets = [0, 0], sizes = [1, 32], strides = [1, 1]} : vector<1x64xf32> to vector<1x32xf32>
      %388 = vector.extract_strided_slice %386 {offsets = [0, 32], sizes = [1, 32], strides = [1, 1]} : vector<1x64xf32> to vector<1x32xf32>
      %389 = vector.extract_strided_slice %376 {offsets = [0, 64], sizes = [1, 32], strides = [1, 1]} : vector<1x96xf32> to vector<1x32xf32>
      %390 = vector.extract_strided_slice %378 {offsets = [0, 64], sizes = [1, 32], strides = [1, 1]} : vector<1x96xf32> to vector<1x32xf32>
      %391 = arith.mulf %387, %390 : vector<1x32xf32>
      %392 = arith.addf %389, %391 : vector<1x32xf32>
      %393 = math.tanh %392 : vector<1x32xf32>
      %cst_197 = arith.constant 1.000000e+00 : f32
      %394 = vector.broadcast %cst_197 : f32 to vector<1x32xf32>
      %395 = arith.subf %394, %388 : vector<1x32xf32>
      %396 = arith.mulf %395, %393 : vector<1x32xf32>
      %397 = arith.mulf %388, %arg26 : vector<1x32xf32>
      %398 = arith.addf %396, %397 : vector<1x32xf32>
      scf.yield %398 : vector<1x32xf32>
    }
    %c20_i32_152 = arith.constant 20 : i32
    %243 = vector.extract_strided_slice %242 {offsets = [0, 0], sizes = [1, 16], strides = [1, 1]} : vector<1x32xf32> to vector<1x16xf32>
    %244 = vector.extract_strided_slice %242 {offsets = [0, 16], sizes = [1, 16], strides = [1, 1]} : vector<1x32xf32> to vector<1x16xf32>
    %245 = tpu.concatenate %243, %244 in 0 : vector<1x16xf32>, vector<1x16xf32> -> vector<2x16xf32>
    %c0_153 = arith.constant 0 : index
    %c0_154 = arith.constant 0 : index
    %246 = vector.load %arg21[%c0_153, %c0_154] : memref<2x16xf32, #tpu.memory_space<vmem>>, vector<2x16xf32>
    tpu.vector_store %arg21[%c0_153, %c0_154], %245 {strides = array<i32>} : memref<2x16xf32, #tpu.memory_space<vmem>>, vector<2x16xf32>,
    %c0_155 = arith.constant 0 : index
    %c0_156 = arith.constant 0 : index
    %247 = vector.load %arg18[%c0_155, %c0_156] : memref<16x128xf32, #tpu.memory_space<vmem>>, vector<16x128xf32>
    %cst_157 = arith.constant dense<0.000000e+00> : vector<2x128xf32>
    %248 = tpu.matmul %245, %247, %cst_157 {dimension_numbers = #tpu.dot_dimension_numbers<[1], [0], [0], [1], [0, 0, 1, 1], [], []>} : vector<2x16xf32>, vector<16x128xf32>, vector<2x128xf32> -> vector<2x128xf32>
    %c0_158 = arith.constant 0 : index
    %c0_159 = arith.constant 0 : index
    %249 = vector.load %arg19[%c0_158, %c0_159] : memref<1x128xf32, #tpu.memory_space<vmem>>, vector<1x128xf32>
    %250 = vector.broadcast %249 : vector<1x128xf32> to vector<2x128xf32>
    %251 = arith.addf %248, %250 : vector<2x128xf32>
    %252 = tpu.iota {dimensions = array<i32: 0>} : vector<2x2xi32>
    %253 = tpu.iota {dimensions = array<i32: 1>} : vector<2x2xi32>
    %254 = arith.cmpi eq, %252, %253 : vector<2x2xi32>
    %cst_160 = arith.constant 1.000000e+00 : f32
    %cst_161 = arith.constant 0.000000e+00 : f32
    %255 = vector.broadcast %cst_160 : f32 to vector<2x2xf32>
    %256 = vector.broadcast %cst_161 : f32 to vector<2x2xf32>
    %257 = arith.select %254, %255, %256 : vector<2x2xi1>, vector<2x2xf32>
    %cst_162 = arith.constant 0.000000e+00 : f32
    %258 = vector.broadcast %cst_162 : f32 to vector<1x1xf32>
    %c13 = arith.constant 13 : index
    %c0_163 = arith.constant 0 : index
    %259 = vector.load %arg23[%c13, %c0_163] : memref<80x32xf32, #tpu.memory_space<vmem>>, vector<1x32xf32>
    %c53 = arith.constant 53 : index
    %c0_164 = arith.constant 0 : index
    %260 = vector.load %arg23[%c53, %c0_164] : memref<80x32xf32, #tpu.memory_space<vmem>>, vector<1x32xf32>
    %261 = tpu.concatenate %259, %260 in 0 : vector<1x32xf32>, vector<1x32xf32> -> vector<2x32xf32>
    %262 = vector.extract_strided_slice %251 {offsets = [0, 0], sizes = [2, 32], strides = [1, 1]} : vector<2x128xf32> to vector<2x32xf32>
    %cst_165 = arith.constant dense<0.000000e+00> : vector<2x2xf32>
    %263 = tpu.matmul %261, %262, %cst_165 {dimension_numbers = #tpu.dot_dimension_numbers<[1], [1], [0], [0], [0, 0, 1, 0], [], []>} : vector<2x32xf32>, vector<2x32xf32>, vector<2x2xf32> -> vector<2x2xf32>
    %cst_166 = arith.constant dense<0xFF800000> : vector<2xf32>
    %264 = vector.multi_reduction <maximumf>, %263, %cst_166 [1] : vector<2x2xf32> to vector<2xf32>
    %265 = vector.shape_cast %264 : vector<2xf32> to vector<2x1xf32>
    %266 = vector.broadcast %265 : vector<2x1xf32> to vector<2x2xf32>
    %267 = arith.subf %263, %266 : vector<2x2xf32>
    %268 = math.exp %267 : vector<2x2xf32>
    %cst_167 = arith.constant dense<0.000000e+00> : vector<2xf32>
    %269 = vector.multi_reduction <add>, %268, %cst_167 [1] : vector<2x2xf32> to vector<2xf32>
    %270 = vector.shape_cast %269 : vector<2xf32> to vector<2x1xf32>
    %271 = vector.broadcast %265 : vector<2x1xf32> to vector<2x2xf32>
    %272 = arith.subf %263, %271 : vector<2x2xf32>
    %273 = math.log %270 : vector<2x1xf32>
    %274 = vector.broadcast %273 : vector<2x1xf32> to vector<2x2xf32>
    %275 = arith.subf %272, %274 : vector<2x2xf32>
    %276 = arith.mulf %275, %257 : vector<2x2xf32>
    %277 = vector.shape_cast %276 : vector<2x2xf32> to vector<1x2x2xf32>
    %cst_168 = arith.constant dense<0.000000e+00> : vector<1xf32>
    %278 = vector.multi_reduction <add>, %277, %cst_168 [1, 2] : vector<1x2x2xf32> to vector<1xf32>
    %279 = vector.shape_cast %278 : vector<1xf32> to vector<1x1x1xf32>
    %280 = vector.extract %279[0, 0, 0] : f32 from vector<1x1x1xf32>
    %281 = vector.broadcast %280 : f32 to vector<1x1xf32>
    %282 = arith.addf %258, %281 : vector<1x1xf32>
    %c14 = arith.constant 14 : index
    %c0_169 = arith.constant 0 : index
    %283 = vector.load %arg23[%c14, %c0_169] : memref<80x32xf32, #tpu.memory_space<vmem>>, vector<1x32xf32>
    %c54 = arith.constant 54 : index
    %c0_170 = arith.constant 0 : index
    %284 = vector.load %arg23[%c54, %c0_170] : memref<80x32xf32, #tpu.memory_space<vmem>>, vector<1x32xf32>
    %285 = tpu.concatenate %283, %284 in 0 : vector<1x32xf32>, vector<1x32xf32> -> vector<2x32xf32>
    %286 = vector.extract_strided_slice %251 {offsets = [0, 32], sizes = [2, 32], strides = [1, 1]} : vector<2x128xf32> to vector<2x32xf32>
    %cst_171 = arith.constant dense<0.000000e+00> : vector<2x2xf32>
    %287 = tpu.matmul %285, %286, %cst_171 {dimension_numbers = #tpu.dot_dimension_numbers<[1], [1], [0], [0], [0, 0, 1, 0], [], []>} : vector<2x32xf32>, vector<2x32xf32>, vector<2x2xf32> -> vector<2x2xf32>
    %cst_172 = arith.constant dense<0xFF800000> : vector<2xf32>
    %288 = vector.multi_reduction <maximumf>, %287, %cst_172 [1] : vector<2x2xf32> to vector<2xf32>
    %289 = vector.shape_cast %288 : vector<2xf32> to vector<2x1xf32>
    %290 = vector.broadcast %289 : vector<2x1xf32> to vector<2x2xf32>
    %291 = arith.subf %287, %290 : vector<2x2xf32>
    %292 = math.exp %291 : vector<2x2xf32>
    %cst_173 = arith.constant dense<0.000000e+00> : vector<2xf32>
    %293 = vector.multi_reduction <add>, %292, %cst_173 [1] : vector<2x2xf32> to vector<2xf32>
    %294 = vector.shape_cast %293 : vector<2xf32> to vector<2x1xf32>
    %295 = vector.broadcast %289 : vector<2x1xf32> to vector<2x2xf32>
    %296 = arith.subf %287, %295 : vector<2x2xf32>
    %297 = math.log %294 : vector<2x1xf32>
    %298 = vector.broadcast %297 : vector<2x1xf32> to vector<2x2xf32>
    %299 = arith.subf %296, %298 : vector<2x2xf32>
    %300 = arith.mulf %299, %257 : vector<2x2xf32>
    %301 = vector.shape_cast %300 : vector<2x2xf32> to vector<1x2x2xf32>
    %cst_174 = arith.constant dense<0.000000e+00> : vector<1xf32>
    %302 = vector.multi_reduction <add>, %301, %cst_174 [1, 2] : vector<1x2x2xf32> to vector<1xf32>
    %303 = vector.shape_cast %302 : vector<1xf32> to vector<1x1x1xf32>
    %304 = vector.extract %303[0, 0, 0] : f32 from vector<1x1x1xf32>
    %305 = vector.broadcast %304 : f32 to vector<1x1xf32>
    %306 = arith.addf %282, %305 : vector<1x1xf32>
    %c15 = arith.constant 15 : index
    %c0_175 = arith.constant 0 : index
    %307 = vector.load %arg23[%c15, %c0_175] : memref<80x32xf32, #tpu.memory_space<vmem>>, vector<1x32xf32>
    %c55 = arith.constant 55 : index
    %c0_176 = arith.constant 0 : index
    %308 = vector.load %arg23[%c55, %c0_176] : memref<80x32xf32, #tpu.memory_space<vmem>>, vector<1x32xf32>
    %309 = tpu.concatenate %307, %308 in 0 : vector<1x32xf32>, vector<1x32xf32> -> vector<2x32xf32>
    %310 = vector.extract_strided_slice %251 {offsets = [0, 64], sizes = [2, 32], strides = [1, 1]} : vector<2x128xf32> to vector<2x32xf32>
    %cst_177 = arith.constant dense<0.000000e+00> : vector<2x2xf32>
    %311 = tpu.matmul %309, %310, %cst_177 {dimension_numbers = #tpu.dot_dimension_numbers<[1], [1], [0], [0], [0, 0, 1, 0], [], []>} : vector<2x32xf32>, vector<2x32xf32>, vector<2x2xf32> -> vector<2x2xf32>
    %cst_178 = arith.constant dense<0xFF800000> : vector<2xf32>
    %312 = vector.multi_reduction <maximumf>, %311, %cst_178 [1] : vector<2x2xf32> to vector<2xf32>
    %313 = vector.shape_cast %312 : vector<2xf32> to vector<2x1xf32>
    %314 = vector.broadcast %313 : vector<2x1xf32> to vector<2x2xf32>
    %315 = arith.subf %311, %314 : vector<2x2xf32>
    %316 = math.exp %315 : vector<2x2xf32>
    %cst_179 = arith.constant dense<0.000000e+00> : vector<2xf32>
    %317 = vector.multi_reduction <add>, %316, %cst_179 [1] : vector<2x2xf32> to vector<2xf32>
    %318 = vector.shape_cast %317 : vector<2xf32> to vector<2x1xf32>
    %319 = vector.broadcast %313 : vector<2x1xf32> to vector<2x2xf32>
    %320 = arith.subf %311, %319 : vector<2x2xf32>
    %321 = math.log %318 : vector<2x1xf32>
    %322 = vector.broadcast %321 : vector<2x1xf32> to vector<2x2xf32>
    %323 = arith.subf %320, %322 : vector<2x2xf32>
    %324 = arith.mulf %323, %257 : vector<2x2xf32>
    %325 = vector.shape_cast %324 : vector<2x2xf32> to vector<1x2x2xf32>
    %cst_180 = arith.constant dense<0.000000e+00> : vector<1xf32>
    %326 = vector.multi_reduction <add>, %325, %cst_180 [1, 2] : vector<1x2x2xf32> to vector<1xf32>
    %327 = vector.shape_cast %326 : vector<1xf32> to vector<1x1x1xf32>
    %328 = vector.extract %327[0, 0, 0] : f32 from vector<1x1x1xf32>
    %329 = vector.broadcast %328 : f32 to vector<1x1xf32>
    %330 = arith.addf %306, %329 : vector<1x1xf32>
    %c12 = arith.constant 12 : index
    %c0_181 = arith.constant 0 : index
    %331 = vector.load %arg23[%c12, %c0_181] : memref<80x32xf32, #tpu.memory_space<vmem>>, vector<1x32xf32>
    %c52 = arith.constant 52 : index
    %c0_182 = arith.constant 0 : index
    %332 = vector.load %arg23[%c52, %c0_182] : memref<80x32xf32, #tpu.memory_space<vmem>>, vector<1x32xf32>
    %333 = tpu.concatenate %331, %332 in 0 : vector<1x32xf32>, vector<1x32xf32> -> vector<2x32xf32>
    %334 = vector.extract_strided_slice %251 {offsets = [0, 96], sizes = [2, 32], strides = [1, 1]} : vector<2x128xf32> to vector<2x32xf32>
    %cst_183 = arith.constant dense<0.000000e+00> : vector<2x2xf32>
    %335 = tpu.matmul %333, %334, %cst_183 {dimension_numbers = #tpu.dot_dimension_numbers<[1], [1], [0], [0], [0, 0, 1, 0], [], []>} : vector<2x32xf32>, vector<2x32xf32>, vector<2x2xf32> -> vector<2x2xf32>
    %cst_184 = arith.constant dense<0xFF800000> : vector<2xf32>
    %336 = vector.multi_reduction <maximumf>, %335, %cst_184 [1] : vector<2x2xf32> to vector<2xf32>
    %337 = vector.shape_cast %336 : vector<2xf32> to vector<2x1xf32>
    %338 = vector.broadcast %337 : vector<2x1xf32> to vector<2x2xf32>
    %339 = arith.subf %335, %338 : vector<2x2xf32>
    %340 = math.exp %339 : vector<2x2xf32>
    %cst_185 = arith.constant dense<0.000000e+00> : vector<2xf32>
    %341 = vector.multi_reduction <add>, %340, %cst_185 [1] : vector<2x2xf32> to vector<2xf32>
    %342 = vector.shape_cast %341 : vector<2xf32> to vector<2x1xf32>
    %343 = vector.broadcast %337 : vector<2x1xf32> to vector<2x2xf32>
    %344 = arith.subf %335, %343 : vector<2x2xf32>
    %345 = math.log %342 : vector<2x1xf32>
    %346 = vector.broadcast %345 : vector<2x1xf32> to vector<2x2xf32>
    %347 = arith.subf %344, %346 : vector<2x2xf32>
    %348 = arith.mulf %347, %257 : vector<2x2xf32>
    %349 = vector.shape_cast %348 : vector<2x2xf32> to vector<1x2x2xf32>
    %cst_186 = arith.constant dense<0.000000e+00> : vector<1xf32>
    %350 = vector.multi_reduction <add>, %349, %cst_186 [1, 2] : vector<1x2x2xf32> to vector<1xf32>
    %351 = vector.shape_cast %350 : vector<1xf32> to vector<1x1x1xf32>
    %352 = vector.extract %351[0, 0, 0] : f32 from vector<1x1x1xf32>
    %353 = vector.broadcast %352 : f32 to vector<1x1xf32>
    %354 = arith.addf %330, %353 : vector<1x1xf32>
    %cst_187 = arith.constant dense<0xFF800000> : vector<2xf32>
    %355 = vector.multi_reduction <maximumf>, %347, %cst_187 [0] : vector<2x2xf32> to vector<2xf32>
    %356 = vector.shape_cast %355 : vector<2xf32> to vector<1x2xf32>
    %357 = vector.broadcast %356 : vector<1x2xf32> to vector<2x2xf32>
    %358 = arith.cmpf oge, %347, %357 : vector<2x2xf32>
    %c2_i32 = arith.constant 2 : i32
    %359 = vector.broadcast %c2_i32 : i32 to vector<2x2xi32>
    %360 = arith.select %358, %252, %359 : vector<2x2xi1>, vector<2x2xi32>
    %cst_188 = arith.constant dense<2147483647> : vector<2xi32>
    %361 = vector.multi_reduction <minsi>, %360, %cst_188 [0] : vector<2x2xi32> to vector<2xi32>
    %362 = vector.shape_cast %361 : vector<2xi32> to vector<1x2xi32>
    %363 = tpu.iota {dimensions = array<i32: 1>} : vector<1x2xi32>
    %364 = arith.cmpi eq, %362, %363 : vector<1x2xi32>
    %cst_189 = arith.constant 1.000000e+00 : f32
    %cst_190 = arith.constant 0.000000e+00 : f32
    %365 = vector.broadcast %cst_189 : f32 to vector<1x2xf32>
    %366 = vector.broadcast %cst_190 : f32 to vector<1x2xf32>
    %367 = arith.select %364, %365, %366 : vector<1x2xi1>, vector<1x2xf32>
    %368 = vector.shape_cast %367 : vector<1x2xf32> to vector<1x1x2xf32>
    %cst_191 = arith.constant dense<0.000000e+00> : vector<1xf32>
    %369 = vector.multi_reduction <add>, %368, %cst_191 [1, 2] : vector<1x1x2xf32> to vector<1xf32>
    %370 = vector.shape_cast %369 : vector<1xf32> to vector<1x1x1xf32>
    %371 = vector.extract %370[0, 0, 0] : f32 from vector<1x1x1xf32>
    %372 = vector.broadcast %371 : f32 to vector<1x1xf32>
    %373 = tpu.concatenate %354, %372 in 1 : vector<1x1xf32>, vector<1x1xf32> -> vector<1x2xf32>
    %c0_192 = arith.constant 0 : index
    %c0_193 = arith.constant 0 : index
    %374 = vector.load %arg20[%c0_192, %c0_193] : memref<1x2xf32, #tpu.memory_space<vmem>>, vector<1x2xf32>
    tpu.vector_store %arg20[%c0_192, %c0_193], %373 {strides = array<i32>} : memref<1x2xf32, #tpu.memory_space<vmem>>, vector<1x2xf32>,
    return
  }
}

</mosaic_0001>

<bundles_post_ra>
// kernel: squeeze.5
= control target key start
LH: loop header
LB: loop body
LE: loop exit
PB: predicated region body
PF: predicated region fallthrough
CT: control target
= control target key end

     0   :  { %vm7_vm0 = vcmask 130048   ;;  %vm13_vm1 = vcmask 261248   ;;  %s39_s0 = inlined_call_operand.vmem [shape: f32[1,2,16], index: 0, kind: input, shape index: {}]   ;;  %s40_s1 = inlined_call_operand.vmem [shape: f32[1,32], index: 1, kind: output, shape index: {}]  }
   0x1   :  { %v4_v0 = vld [vmem:[%s39_s0] sm:$0x3]  ;;  %s22_s0 = smov 16  }
   0x2   :  { %5 = vst [vmem:[#allocation1] sm:$0x3] %v4_v0 }
   0x9   :  { %v10_v1 = vld [vmem:[#allocation1 + $0x1] sm:$0x1]   ;;  %v6_v2 = vld [vmem:[#allocation1] sm:$0x1]  }
   0xa   :  { %11 = vrot.lane.b32.xlu0 %v10_v1, %s22_s0  ;;  %8 = vst.msk [vmem:[#allocation0] sm:$0x1] %vm7_vm0, %v6_v2  }
  0x7c   :  { %v12_v3 = vpop.permute.xlu0 %11  }
  0x7d   :  { %14 = vst.msk [vmem:[#allocation0] sm:$0x1] %vm13_vm1, %v12_v3  }
  0x84   :  { %v18_v4 = vld [vmem:[#allocation0] sm:$0x1] }
  0x85   :  { %20 = vst [vmem:[%s40_s1] sm:$0x1] %v18_v4 }

// kernel: my_model_cpc_forward.1
= control target key start
LH: loop header
LB: loop body
LE: loop exit
PB: predicated region body
PF: predicated region fallthrough
CT: control target
= control target key end

     0   :  { %s3936_s0 = inlined_call_operand.vmem [shape: f32[50,5], index: 0, kind: input, shape index: {}]   ;;  %s3937_s1 = inlined_call_operand.vmem [shape: f32[5,32], index: 1, kind: input, shape index: {}]   ;;  %s3938_s2 = inlined_call_operand.vmem [shape: f32[1,32], index: 2, kind: input, shape index: {}]   ;;  %s3939_s3 = inlined_call_operand.vmem [shape: f32[1,32], index: 3, kind: input, shape index: {}]   ;;  %s3940_s4 = inlined_call_operand.vmem [shape: bf16[128,32], index: 4, kind: input, shape index: {}]   ;;  %s3941_s5 = inlined_call_operand.vmem [shape: f32[1,32], index: 5, kind: input, shape index: {}]   ;;  %s3942_s6 = inlined_call_operand.vmem [shape: f32[1,32], index: 6, kind: input, shape index: {}]   ;;  %s3943_s7 = inlined_call_operand.vmem [shape: bf16[96,32], index: 7, kind: input, shape index: {}]   ;;  %s3944_s8 = inlined_call_operand.vmem [shape: f32[1,32], index: 8, kind: input, shape index: {}]   ;;  %s3945_s9 = inlined_call_operand.vmem [shape: f32[1,32], index: 9, kind: input, shape index: {}]   ;;  %s3946_s10 = inlined_call_operand.vmem [shape: bf16[128,32], index: 10, kind: input, shape index: {}]   ;;  %s3947_s11 = inlined_call_operand.vmem [shape: f32[1,32], index: 11, kind: input, shape index: {}]   ;;  %s3948_s12 = inlined_call_operand.vmem [shape: f32[1,32], index: 12, kind: input, shape index: {}]   ;;  %s3949_s13 = inlined_call_operand.vmem [shape: f32[64,96], index: 13, kind: input, shape index: {}]   ;;  %s3950_s14 = inlined_call_operand.vmem [shape: f32[32,96], index: 14, kind: input, shape index: {}]   ;;  %s3951_s15 = inlined_call_operand.vmem [shape: f32[1,96], index: 15, kind: input, shape index: {}]   ;;  %s3952_s16 = inlined_call_operand.vmem [shape: f32[1,96], index: 16, kind: input, shape index: {}]   ;;  %s3953_s17 = inlined_call_operand.vmem [shape: f32[1,32], index: 17, kind: input, shape index: {}]   ;;  %s3954_s18 = inlined_call_operand.vmem [shape: f32[16,128], index: 18, kind: input, shape index: {}]   ;;  %s3955_s19 = inlined_call_operand.vmem [shape: f32[1,128], index: 19, kind: input, shape index: {}]   ;;  %s3956_s20 = inlined_call_operand.vmem [shape: f32[1,2], index: 20, kind: output, shape index: {0}]   ;;  %s3957_s21 = inlined_call_operand.hbm [shape: f32[2,16], index: 21, kind: output, shape index: {1}]  }
   0x1   :  { %3960 = sst [smem:[#allocation8_spill]] %s3936_s0 }
   0x2   :  { %3961 = sst [smem:[#allocation9_spill]] %s3937_s1 }
   0x3   :  { %3962 = sst [smem:[#allocation10_spill]] %s3938_s2 }
   0x4   :  { %3963 = sst [smem:[#allocation11_spill]] %s3939_s3 }
   0x5   :  { %3964 = sst [smem:[#allocation12_spill]] %s3940_s4 }
   0x6   :  { %3965 = sst [smem:[#allocation13_spill]] %s3941_s5 }
   0x7   :  { %27 = vsyncpa [#allocation6], 0  ;;  %s3966_s26 = sld [smem:[#allocation9_spill]]  ;;  %vm104_vm0 = vcmask 1044480   ;;  %v3125_v1 = vmov 0.0   ;;  %s3967_s28 = sld [smem:[#allocation8_spill]] }
   0x8   :  { %2606 = vmatprep.subr.mxu0 %v3125_v1  ;;  %vm82_vm1 = vcmask 39936   ;;  %vm69_vm2 = vcmask 261120   ;;  %vm3126_vm3 = vmmov 0   ;;  %s3968_s29 = sld [smem:[#allocation12_spill]]  ;;  %vm221_vm4 = vcmask 254976   ;;  %s3969_s5 = sld [smem:[#allocation10_spill]] }
   0x9   :  { %2608 = vmatprep.mubr.msk.f32.mxu0 %vm3126_vm3, %v3125_v1  ;;  %70 = vst.msk [vmem:[#allocation2] sm:$0xff] %vm69_vm2, %v3125_v1  ;;  %71 = vst.msk [vmem:[#allocation3] sm:$0xff] %vm69_vm2, %v3125_v1  ;;  %s3970_s1 = sld [smem:[#allocation11_spill]]  ;;  %vm317_vm5 = vcmask 261121   ;;  %vm315_vm6 = vcmask 253952   ;;  %s3127_s27 = smov 32  }
   0xa   :  { %72 = vst.msk [vmem:[#allocation2 + $0x28] sm:$0xff] %vm69_vm2, %v3125_v1  ;;  %73 = vst.msk [vmem:[#allocation3 + $0x28] sm:$0xff] %vm69_vm2, %v3125_v1  ;;  %s3128_s3 = smov 64   ;;  %s3129_s23 = smov 96   ;;  %vm406_vm14 = vcmask 523264   ;;  %vm411_vm15 = vcmask 785408  }
   0xd   :  { %v81_v0 = vld [vmem:[%s3966_s26] sm:$0x1f]  ;;  %v75_v3 = vld [vmem:[%s3967_s28 + $0x8] sm:$0xff]  ;;  %v76_v4 = vld [vmem:[%s3967_s28 + $0x10] sm:$0xff] }
   0xe   :  { %v74_v2 = vld [vmem:[%s3967_s28] sm:$0xff]  ;;  %2607 = vmatpush3.msk.msra.mxu0 %vm104_vm0, %v81_v0  ;;  %v77_v5 = vld [vmem:[%s3967_s28 + $0x18] sm:$0xff]  ;;  %v79_v7 = vld [vmem:[%s3967_s28 + $0x28] sm:$0xff] }
   0xf   :  { %2609 = vmatmul.mubr.msk.f32.vlgmr.msra.gmra.mrb[0].mxu0 %vm82_vm1, %v74_v2  ;;  %v78_v6 = vld [vmem:[%s3967_s28 + $0x20] sm:$0xff]  ;;  %v80_v8 = vld [vmem:[%s3967_s28 + $0x30] sm:$0x3]  ;;  %v3034_v10 = vld [vmem:[%s3968_s29 + $0x8] sm:$0xff]   ;;  %s3971_s28 = sld [smem:[#allocation13_spill]] }
  0x10   :  { %2611 = vmatprep.mubr.msk.f32.mxu0 %vm3126_vm3, %v3125_v1  ;;  %v3033_v9 = vld [vmem:[%s3968_s29] sm:$0xff]  }
  0x11   :  { %2629 = vmatprep.subr.bf16.mxu1 %v3033_v9  ;;  %2649 = vmatprep.subr.bf16.mxu0 %v3033_v9 }
  0x12   :  { %2630 = vmatpush3.bf16.msra.mxu1 %v3033_v9  ;;  %2650 = vmatpush3.bf16.msra.mxu0 %v3033_v9 }
  0x13   :  { %2612 = vmatmul.mubr.msk.f32.gmra.mrb[2].mxu0 %vm82_vm1, %v75_v3  ;;  %2631 = vmatprep.subr.bf16.mxu1 %v3034_v10 }
  0x14   :  { %2614 = vmatprep.mubr.msk.f32.mxu0 %vm3126_vm3, %v3125_v1  ;;  %2651 = vmatprep.subr.bf16.mxu0 %v3034_v10 }
  0x16   :  { %2632 = vmatpush3.bf16.msra.mxu1 %v3034_v10  ;;  %2652 = vmatpush3.bf16.msra.mxu0 %v3034_v10 }
  0x17   :  { %2615 = vmatmul.mubr.msk.f32.gmra.mrb[4].mxu0 %vm82_vm1, %v76_v4 }
  0x18   :  { %2617 = vmatprep.mubr.msk.f32.mxu0 %vm3126_vm3, %v3125_v1 }
  0x1b   :  { %2618 = vmatmul.mubr.msk.f32.gmra.mrb[6].mxu0 %vm82_vm1, %v77_v5 }
  0x1c   :  { %2620 = vmatprep.mubr.msk.f32.mxu0 %vm3126_vm3, %v3125_v1 }
  0x1f   :  { %2621 = vmatmul.mubr.msk.f32.gmra.mrb[8].mxu0 %vm82_vm1, %v78_v6 }
  0x20   :  { %2623 = vmatprep.mubr.msk.f32.mxu0 %vm3126_vm3, %v3125_v1 }
  0x23   :  { %2624 = vmatmul.mubr.msk.f32.gmra.mrb[10].mxu0 %vm82_vm1, %v79_v7 }
  0x24   :  { %2626 = vmatprep.mubr.msk.f32.mxu0 %vm3126_vm3, %v3125_v1 }
  0x27   :  { %2627 = vmatmul.mubr.msk.f32.gmra.mrb[12].mxu0 %vm82_vm1, %v80_v8 }
  0xe2   :  { %v3309_v11 = vpop.f32.mrb[0].mxu0 }
  0xe3   :  { %v2610_v12 = vpop.f32.mrb[1].mxu0  ;;  %v230_v13 = vmul.f32 %v3309_v11, %v3309_v11  ;;  %v210_v15 = vsel %vm69_vm2, %v3309_v11, 0.0 }
  0xe5   :  { %v237_v20 = vsel %vm69_vm2, %v230_v13, 0.0 }
  0xe6   :  { %v3313_v14 = vpop.f32.mrb[2].mxu0 }
  0xe7   :  { %v211_v16 = vsel %vm69_vm2, %v3313_v14, 0.0  ;;  %v231_v17 = vmul.f32 %v3313_v14, %v3313_v14  ;;  %v2613_v18 = vpop.f32.mrb[3].mxu0 }
  0xe8   :  { %v212_v19 = vadd.f32 %v211_v16, %v210_v15  ;;  %v267_v15 = vlaneseq }
  0xe9   :  { %v238_v21 = vsel %vm69_vm2, %v231_v17, 0.0  ;;  %v208_v17 = vld [vmem:[%s3969_s5] sm:$0x1] }
  0xea   :  { %v239_v22 = vadd.f32 %v238_v21, %v237_v20  ;;  %v3323_v23 = vpop.f32.mrb[4].mxu0  ;;  %v3339_v16 = vshrl.u32 %v267_v15, 7  ;;  %v209_v21 = vld [vmem:[%s3970_s1] sm:$0x1] }
  0xeb   :  { %v213_v24 = vsel %vm69_vm2, %v3323_v23, 0.0  ;;  %v232_v25 = vmul.f32 %v3323_v23, %v3323_v23  ;;  %v2616_v26 = vpop.f32.mrb[5].mxu0 }
  0xec   :  { %v214_v27 = vadd.f32 %v213_v24, %v212_v19  ;;  %v3345_v18 = vsub.s32 0, %v3339_v16 }
  0xed   :  { %v240_v28 = vsel %vm69_vm2, %v232_v25, 0.0 }
  0xee   :  { %v241_v29 = vadd.f32 %v240_v28, %v239_v22  ;;  %v189_v30 = vpop.f32.mrb[6].mxu0 }
  0xef   :  { %v215_v31 = vsel %vm69_vm2, %v189_v30, 0.0  ;;  %v233_v32 = vmul.f32 %v189_v30, %v189_v30  ;;  %v2619_v33 = vpop.f32.mrb[7].mxu0 }
  0xf0   :  { %v216_v34 = vadd.f32 %v215_v31, %v214_v27 }
  0xf1   :  { %v242_v35 = vsel %vm69_vm2, %v233_v32, 0.0 }
  0xf2   :  { %v243_v36 = vadd.f32 %v242_v35, %v241_v29  ;;  %v194_v37 = vpop.f32.mrb[8].mxu0 }
  0xf3   :  { %v217_v38 = vsel %vm69_vm2, %v194_v37, 0.0  ;;  %v234_v39 = vmul.f32 %v194_v37, %v194_v37  ;;  %v2622_v40 = vpop.f32.mrb[9].mxu0 }
  0xf4   :  { %v218_v41 = vadd.f32 %v217_v38, %v216_v34 }
  0xf5   :  { %v244_v42 = vsel %vm69_vm2, %v234_v39, 0.0 }
  0xf6   :  { %v245_v43 = vadd.f32 %v244_v42, %v243_v36  ;;  %v199_v44 = vpop.f32.mrb[10].mxu0 }
  0xf7   :  { %v219_v45 = vsel %vm69_vm2, %v199_v44, 0.0  ;;  %v235_v46 = vmul.f32 %v199_v44, %v199_v44  ;;  %v2625_v47 = vpop.f32.mrb[11].mxu0 }
  0xf8   :  { %v220_v48 = vadd.f32 %v219_v45, %v218_v41  ;;  %v3035_v47 = vld [vmem:[%s3968_s29 + $0x10] sm:$0xff]  }
  0xf9   :  { %v246_v49 = vsel %vm69_vm2, %v235_v46, 0.0  ;;  %2633 = vmatprep.subr.bf16.mxu1 %v3035_v47  ;;  %2653 = vmatprep.subr.bf16.mxu0 %v3035_v47 }
  0xfa   :  { %v247_v50 = vadd.f32 %v246_v49, %v245_v43  ;;  %v204_v51 = vpop.f32.mrb[12].mxu0  ;;  %2634 = vmatpush3.bf16.msra.mxu1 %v3035_v47  ;;  %2654 = vmatpush3.bf16.msra.mxu0 %v3035_v47 }
  0xfb   :  { %v222_v52 = vsel %vm221_vm4, %v204_v51, 0.0  ;;  %v236_v53 = vmul.f32 %v204_v51, %v204_v51  ;;  %v2628_v54 = vpop.f32.mrb[13].mxu0 }
  0xfc   :  { %v223_v55 = vadd.f32 %v222_v52, %v220_v48 }
  0xfd   :  { %v248_v56 = vsel %vm221_vm4, %v236_v53, 0.0  ;;  %v3036_v53 = vld [vmem:[%s3968_s29 + $0x18] sm:$0xff]  }
  0xfe   :  { %v224_v57 = vrot.slane %v223_v55, 4  ;;  %v249_v58 = vadd.f32 %v248_v56, %v247_v50  ;;  %2635 = vmatprep.subr.bf16.mxu1 %v3036_v53  ;;  %2655 = vmatprep.subr.bf16.mxu0 %v3036_v53 }
  0xff   :  { %2636 = vmatpush3.bf16.msra.mxu1 %v3036_v53  ;;  %2656 = vmatpush3.bf16.msra.mxu0 %v3036_v53 }
 0x100   :  { %v225_v59 = vadd.f32 %v224_v57, %v223_v55  ;;  %v250_v60 = vrot.slane %v249_v58, 4 }
 0x102   :  { %v226_v61 = vrot.slane %v225_v59, 2  ;;  %v251_v62 = vadd.f32 %v250_v60, %v249_v58 }
 0x104   :  { %v227_v63 = vadd.f32 %v226_v61, %v225_v59  ;;  %v252_v0 = vrot.slane %v251_v62, 2 }
 0x106   :  { %v228_v2 = vrot.slane %v227_v63, 1  ;;  %v253_v3 = vadd.f32 %v252_v0, %v251_v62 }
 0x108   :  { %v229_v4 = vadd.f32 %v228_v2, %v227_v63  ;;  %v254_v5 = vrot.slane %v253_v3, 1 }
 0x10a   :  { %v255_v6 = vadd.f32 %v254_v5, %v253_v3  ;;  %v257_v7 = vmul.f32 0.02, %v229_v4 }
 0x10c   :  { %v258_v8 = vmul.f32 0.02, %v255_v6  ;;  %v259_v9 = vmul.f32 %v257_v7, %v257_v7 }
 0x10e   :  { %v260_v10 = vsub.f32 %v258_v8, %v259_v9  ;;  %v3037_v8 = vld [vmem:[%s3968_s29 + $0x20] sm:$0xff]  }
 0x10f   :  { %2637 = vmatprep.subr.bf16.mxu1 %v3037_v8  ;;  %2657 = vmatprep.subr.bf16.mxu0 %v3037_v8 }
 0x110   :  { %v261_v12 = vmax.f32 %v260_v10, 0.0  ;;  %2638 = vmatpush3.bf16.msra.mxu1 %v3037_v8  ;;  %2658 = vmatpush3.bf16.msra.mxu0 %v3037_v8 }
 0x112   :  { %v262_v13 = vadd.f32 1e-05, %v261_v12 }
 0x114   :  { %3055 = vrsqrt.f32 %v262_v13  ;;  %v3038_v13 = vld [vmem:[%s3968_s29 + $0x28] sm:$0xff]  }
 0x115   :  { %2639 = vmatprep.subr.bf16.mxu1 %v3038_v13  ;;  %2659 = vmatprep.subr.bf16.mxu0 %v3038_v13 }
 0x116   :  { %2640 = vmatpush3.bf16.msra.mxu1 %v3038_v13  ;;  %2660 = vmatpush3.bf16.msra.mxu0 %v3038_v13 }
 0x11e   :  { %v3056_v19 = vpop.eup %3055 }
 0x11f   :  { %v264_v20 = vmul.f32 %v3056_v19, %v208_v17 }
 0x121   :  { %v265_v22 = vmul.f32 %v264_v20, %v257_v7  ;;  %v270_v24 = vrot.slane %v264_v20, %v3345_v18 }
 0x123   :  { %v266_v25 = vsub.f32 %v209_v21, %v265_v22  ;;  %v271_v26 = vmul.f32 %v270_v24, %v3309_v11  ;;  %v272_v27 = vmul.f32 %v270_v24, %v3313_v14  ;;  %v273_v28 = vmul.f32 %v270_v24, %v3323_v23 }
 0x124   :  { %v274_v29 = vmul.f32 %v270_v24, %v189_v30  ;;  %v275_v31 = vmul.f32 %v270_v24, %v194_v37  ;;  %v276_v32 = vmul.f32 %v270_v24, %v199_v44  ;;  %v277_v33 = vmul.f32 %v270_v24, %v204_v51 }
 0x125   :  { %v282_v34 = vrot.slane %v266_v25, %v3345_v18  ;;  %v3039_v25 = vld [vmem:[%s3968_s29 + $0x30] sm:$0xff]  }
 0x126   :  { %2641 = vmatprep.subr.bf16.mxu1 %v3039_v25  ;;  %2661 = vmatprep.subr.bf16.mxu0 %v3039_v25 }
 0x127   :  { %v287_v35 = vadd.f32 %v282_v34, %v274_v29  ;;  %v288_v36 = vadd.f32 %v282_v34, %v275_v31  ;;  %v289_v38 = vadd.f32 %v282_v34, %v276_v32  ;;  %v290_v39 = vadd.f32 %v282_v34, %v277_v33  ;;  %v3040_v33 = vld [vmem:[%s3968_s29 + $0x38] sm:$0xff]   ;;  %2642 = vmatpush3.bf16.msra.mxu1 %v3039_v25 }
 0x128   :  { %v285_v40 = vadd.f32 %v282_v34, %v272_v27  ;;  %v286_v41 = vadd.f32 %v282_v34, %v273_v28  ;;  %v284_v42 = vadd.f32 %v282_v34, %v271_v26  ;;  %2662 = vmatpush3.bf16.msra.mxu0 %v3039_v25  ;;  %2643 = vmatprep.subr.bf16.mxu1 %v3040_v33 }
 0x129   :  { %vm297_vm7 = vcmp.gt.f32.partialorder %v290_v39, 0.0  ;;  %v304_v11 = vmul.f32 0.01, %v290_v39  ;;  %vm294_vm8 = vcmp.gt.f32.partialorder %v287_v35, 0.0  ;;  %vm295_vm9 = vcmp.gt.f32.partialorder %v288_v36, 0.0  ;;  %2663 = vmatprep.subr.bf16.mxu0 %v3040_v33 }
 0x12a   :  { %vm292_vm10 = vcmp.gt.f32.partialorder %v285_v40, 0.0  ;;  %vm293_vm11 = vcmp.gt.f32.partialorder %v286_v41, 0.0  ;;  %v299_v14 = vmul.f32 0.01, %v285_v40  ;;  %v300_v23 = vmul.f32 0.01, %v286_v41 }
 0x12b   :  { %v311_v30 = vsel %vm297_vm7, %v290_v39, %v304_v11  ;;  %vm291_vm12 = vcmp.gt.f32.partialorder %v284_v42, 0.0  ;;  %v298_v37 = vmul.f32 0.01, %v284_v42  ;;  %v301_v43 = vmul.f32 0.01, %v287_v35  ;;  %2644 = vmatpush3.bf16.msra.mxu1 %v3040_v33 }
 0x12c   :  { %321 = vst.msk [vmem:[#allocation2 + $0x47] sm:$0x3] %vm221_vm4, %v311_v30  ;;  %v306_v44 = vsel %vm292_vm10, %v285_v40, %v299_v14  ;;  %v307_v45 = vsel %vm293_vm11, %v286_v41, %v300_v23  ;;  %v302_v46 = vmul.f32 0.01, %v288_v36  ;;  %vm296_vm13 = vcmp.gt.f32.partialorder %v289_v38, 0.0  ;;  %2664 = vmatpush3.bf16.msra.mxu0 %v3040_v33 }
 0x12d   :  { %313 = vst.msk [vmem:[#allocation2 + $0x10] sm:$0xff] %vm69_vm2, %v306_v44  ;;  %314 = vst.msk [vmem:[#allocation2 + $0x18] sm:$0xff] %vm69_vm2, %v307_v45  ;;  %v305_v48 = vsel %vm291_vm12, %v284_v42, %v298_v37  ;;  %v308_v49 = vsel %vm294_vm8, %v287_v35, %v301_v43  ;;  %v303_v50 = vmul.f32 0.01, %v289_v38 }
 0x12e   :  { %312 = vst.msk [vmem:[#allocation2 + $0x8] sm:$0xff] %vm69_vm2, %v305_v48  ;;  %v309_v51 = vsel %vm295_vm9, %v288_v36, %v302_v46 }
 0x12f   :  { %318 = vst.msk [vmem:[#allocation2 + $0x2f] sm:$0xfe] %vm317_vm5, %v308_v49  ;;  %v310_v52 = vsel %vm296_vm13, %v289_v38, %v303_v50 }
 0x130   :  { %316 = vst.msk [vmem:[#allocation2 + $0x20] sm:$0x1] %vm315_vm6, %v308_v49 }
 0x131   :  { %319 = vst.msk [vmem:[#allocation2 + $0x37] sm:$0xff] %vm69_vm2, %v309_v51  ;;  %320 = vst.msk [vmem:[#allocation2 + $0x3f] sm:$0xff] %vm69_vm2, %v310_v52 }
 0x133   :  { %v526_v27 = vld [vmem:[#allocation2 + $0x47] sm:$0x1]  ;;  %v530_v32 = vld [vmem:[#allocation2 + $0x48] sm:$0x1] }
 0x134   :  { %v344_v54 = vld [vmem:[#allocation2 + $0x16] sm:$0xff]  ;;  %v345_v55 = vld [vmem:[#allocation2 + $0x1e] sm:$0x1]  ;;  %v349_v19 = vld [vmem:[#allocation2 + $0x1f] sm:$0x1] }
 0x135   :  { %v2883_v56 = vpack.i.bf16 %v345_v55, %v344_v54  ;;  %v342_v57 = vld [vmem:[#allocation2 + $0x6] sm:$0xff]  ;;  %v343_v58 = vld [vmem:[#allocation2 + $0xe] sm:$0xff]  ;;  %v348_v17 = vld [vmem:[#allocation2 + $0x17] sm:$0xff] }
 0x136   :  { %v2873_v59 = vpack.i.bf16 %v343_v58, %v342_v57  ;;  %v346_v60 = vld [vmem:[#allocation2 + $0x7] sm:$0xff]  ;;  %v347_v61 = vld [vmem:[#allocation2 + $0xf] sm:$0xff]  ;;  %v2903_v21 = vpack.i.bf16 %v349_v19, %v348_v17  ;;  %v352_v34 = vld [vmem:[#allocation2 + $0x18] sm:$0xff] }
 0x137   :  { %2884 = vrot.lane.b32.xlu1 %v2883_v56, %s3127_s27  ;;  %v519_v62 = vld [vmem:[#allocation2 + $0x2e] sm:$0xff]  ;;  %v2888_v0 = vpack.i.bf16 %v347_v61, %v346_v60  ;;  %v353_v35 = vld [vmem:[#allocation2 + $0x20] sm:$0x1]  ;;  %v338_v47 = vld [vmem:[#allocation2 + $0x5] sm:$0xff] }
 0x138   :  { %v520_v63 = vld [vmem:[#allocation2 + $0x36] sm:$0xff]  ;;  %2874 = vrot.lane.b32.xlu0 %v2873_v59, %s3127_s27  ;;  %v521_v5 = vld [vmem:[#allocation2 + $0x3e] sm:$0xff]  ;;  %v522_v6 = vld [vmem:[#allocation2 + $0x46] sm:$0x1]  ;;  %v2923_v38 = vpack.i.bf16 %v353_v35, %v352_v34 }
 0x139   :  { %v2878_v2 = vpack.i.bf16 %v520_v63, %v519_v62  ;;  %v523_v3 = vld [vmem:[#allocation2 + $0x2f] sm:$0xff]  ;;  %v524_v4 = vld [vmem:[#allocation2 + $0x37] sm:$0xff]  ;;  %v2893_v9 = vpack.i.bf16 %v522_v6, %v521_v5  ;;  %v525_v26 = vld [vmem:[#allocation2 + $0x3f] sm:$0xff] }
 0x13a   :  { %v2898_v7 = vpack.i.bf16 %v524_v4, %v523_v3  ;;  %v350_v10 = vld [vmem:[#allocation2 + $0x8] sm:$0xff]  ;;  %v351_v12 = vld [vmem:[#allocation2 + $0x10] sm:$0xff]  ;;  %v528_v24 = vld [vmem:[#allocation2 + $0x38] sm:$0xff]  ;;  %v2913_v29 = vpack.i.bf16 %v526_v27, %v525_v26 }
 0x13b   :  { %2889 = vrot.lane.b32.xlu1 %v2888_v0, %s3128_s3  ;;  %v2908_v20 = vpack.i.bf16 %v351_v12, %v350_v10  ;;  %v527_v22 = vld [vmem:[#allocation2 + $0x30] sm:$0xff]  ;;  %v529_v31 = vld [vmem:[#allocation2 + $0x40] sm:$0xff]  ;;  %v341_v19 = vld [vmem:[#allocation2 + $0x1d] sm:$0x1] }
 0x13c   :  { %2879 = vrot.lane.b32.xlu0 %v2878_v2, %s3127_s27  ;;  %v2918_v28 = vpack.i.bf16 %v528_v24, %v527_v22  ;;  %v2928_v36 = vpack.i.bf16 %v530_v32, %v529_v31  ;;  %v339_v48 = vld [vmem:[#allocation2 + $0xd] sm:$0xff]  ;;  %v516_v60 = vld [vmem:[#allocation2 + $0x35] sm:$0xff] }
 0x13d   :  { %v515_v59 = vld [vmem:[#allocation2 + $0x2d] sm:$0xff] }
 0x13f   :  { %2899 = vrot.lane.b32.xlu1 %v2898_v7, %s3128_s3 }
 0x140   :  { %2894 = vrot.lane.b32.xlu0 %v2893_v9, %s3127_s27 }
 0x143   :  { %2909 = vrot.lane.b32.xlu1 %v2908_v20, %s3129_s23  ;;  %v340_v20 = vld [vmem:[#allocation2 + $0x15] sm:$0xff] }
 0x144   :  { %2904 = vrot.lane.b32.xlu0 %v2903_v21, %s3128_s3 }
 0x147   :  { %2919 = vrot.lane.b32.xlu1 %v2918_v28, %s3129_s23  ;;  %v517_v28 = vld [vmem:[#allocation2 + $0x3d] sm:$0xff] }
 0x148   :  { %2914 = vrot.lane.b32.xlu0 %v2913_v29, %s3128_s3  ;;  %v518_v29 = vld [vmem:[#allocation2 + $0x45] sm:$0x1] }
 0x14b   :  { %2929 = vrot.lane.b32.xlu1 %v2928_v36, %s3129_s23 }
 0x14c   :  { %2924 = vrot.lane.b32.xlu0 %v2923_v38, %s3129_s23 }
 0x1a9   :  { %v2885_v39 = vpop.permute.xlu1 %2884 }
 0x1aa   :  { %v2875_v40 = vpop.permute.xlu0 %2874  ;;  %v2887_v58 = vunpack.i.h.bf16 %v2885_v39  ;;  %v2886_v63 = vunpack.i.l.bf16 %v2885_v39 }
 0x1ab   :  { %v2877_v14 = vunpack.i.h.bf16 %v2875_v40  ;;  %v2876_v23 = vunpack.i.l.bf16 %v2875_v40 }
 0x1ac   :  { %v405_v26 = vsel %vm69_vm2, %v341_v19, %v2887_v58  ;;  %v404_v27 = vsel %vm69_vm2, %v340_v20, %v2886_v63 }
 0x1ad   :  { %v2890_v41 = vpop.permute.xlu1 %2889  ;;  %v402_v52 = vsel %vm69_vm2, %v338_v47, %v2876_v23  ;;  %v403_v53 = vsel %vm69_vm2, %v339_v48, %v2877_v14  ;;  %v3042_v47 = vld [vmem:[%s3943_s7 + $0x8] sm:$0xff]  }
 0x1ae   :  { %v2880_v42 = vpop.permute.xlu0 %2879  ;;  %v2892_v37 = vunpack.i.h.bf16 %v2890_v41  ;;  %v2891_v43 = vunpack.i.l.bf16 %v2890_v41 }
 0x1af   :  { %v2882_v44 = vunpack.i.h.bf16 %v2880_v42  ;;  %v2881_v45 = vunpack.i.l.bf16 %v2880_v42 }
 0x1b0   :  { %v407_v56 = vsel %vm406_vm14, %v402_v52, %v2891_v43  ;;  %v408_v57 = vsel %vm406_vm14, %v403_v53, %v2892_v37 }
 0x1b1   :  { %v2900_v11 = vpop.permute.xlu1 %2899  ;;  %v580_v0 = vsel %vm69_vm2, %v516_v60, %v2882_v44  ;;  %v579_v2 = vsel %vm69_vm2, %v515_v59, %v2881_v45 }
 0x1b2   :  { %v2895_v30 = vpop.permute.xlu0 %2894  ;;  %v2902_v54 = vunpack.i.h.bf16 %v2900_v11  ;;  %v2901_v55 = vunpack.i.l.bf16 %v2900_v11 }
 0x1b3   :  { %v2897_v5 = vunpack.i.h.bf16 %v2895_v30  ;;  %v2896_v6 = vunpack.i.l.bf16 %v2895_v30 }
 0x1b4   :  { %v583_v10 = vsel %vm406_vm14, %v579_v2, %v2901_v55  ;;  %v584_v12 = vsel %vm406_vm14, %v580_v0, %v2902_v54 }
 0x1b5   :  { %v2910_v46 = vpop.permute.xlu1 %2909  ;;  %v582_v33 = vsel %vm69_vm2, %v518_v29, %v2897_v5  ;;  %v581_v34 = vsel %vm69_vm2, %v517_v28, %v2896_v6 }
 0x1b6   :  { %v2912_v49 = vunpack.i.h.bf16 %v2910_v46  ;;  %v2911_v50 = vunpack.i.l.bf16 %v2910_v46  ;;  %v2905_v51 = vpop.permute.xlu0 %2904  ;;  %v3041_v46 = vld [vmem:[%s3943_s7] sm:$0xff]  }
 0x1b7   :  { %v2907_v21 = vunpack.i.h.bf16 %v2905_v51  ;;  %v2906_v22 = vunpack.i.l.bf16 %v2905_v51  ;;  %2669 = vmatprep.subr.bf16.mxu1 %v3041_v46  ;;  %2685 = vmatprep.subr.bf16.mxu0 %v3041_v46 }
 0x1b8   :  { %v412_v61 = vsel %vm411_vm15, %v407_v56, %v2911_v50  ;;  %v413_v62 = vsel %vm411_vm15, %v408_v57, %v2912_v49 }
 0x1b9   :  { %v2920_v3 = vpop.permute.xlu1 %2919  ;;  %v416_v4 = vpack.c.bf16 %v413_v62, %v412_v61  ;;  %v410_v11 = vsel %vm406_vm14, %v405_v26, %v2907_v21  ;;  %v409_v14 = vsel %vm406_vm14, %v404_v27, %v2906_v22 }
 0x1ba   :  { %v2922_v7 = vunpack.i.h.bf16 %v2920_v3  ;;  %v2921_v8 = vunpack.i.l.bf16 %v2920_v3  ;;  %v2915_v9 = vpop.permute.xlu0 %2914 }
 0x1bb   :  { %v2917_v13 = vunpack.i.h.bf16 %v2915_v9  ;;  %v2916_v17 = vunpack.i.l.bf16 %v2915_v9  ;;  %2645 = vmatprep.mubr.bf16.mxu1 %v416_v4 }
 0x1bc   :  { %v587_v24 = vsel %vm411_vm15, %v583_v10, %v2921_v8  ;;  %v588_v25 = vsel %vm411_vm15, %v584_v12, %v2922_v7 }
 0x1bd   :  { %v2930_v31 = vpop.permute.xlu1 %2929  ;;  %v591_v32 = vpack.c.bf16 %v588_v25, %v587_v24  ;;  %v585_v39 = vsel %vm406_vm14, %v581_v34, %v2916_v17  ;;  %v586_v40 = vsel %vm406_vm14, %v582_v33, %v2917_v13 }
 0x1be   :  { %v2932_v35 = vunpack.i.h.bf16 %v2930_v31  ;;  %v2931_v36 = vunpack.i.l.bf16 %v2930_v31  ;;  %v2925_v38 = vpop.permute.xlu0 %2924 }
 0x1bf   :  { %v2927_v41 = vunpack.i.h.bf16 %v2925_v38  ;;  %v2926_v42 = vunpack.i.l.bf16 %v2925_v38  ;;  %2665 = vmatprep.mubr.bf16.mxu0 %v591_v32 }
 0x1c0   :  { %v589_v23 = vsel %vm411_vm15, %v585_v39, %v2931_v36  ;;  %v590_v30 = vsel %vm411_vm15, %v586_v40, %v2932_v35 }
 0x1c1   :  { %v592_v37 = vpack.c.bf16 %v590_v30, %v589_v23  ;;  %v414_v43 = vsel %vm411_vm15, %v409_v14, %v2926_v42  ;;  %v415_v44 = vsel %vm411_vm15, %v410_v11, %v2927_v41 }
 0x1c2   :  { %v417_v45 = vpack.c.bf16 %v415_v44, %v414_v43 }
 0x1c3   :  { %2666 = vmatmul.mubr.bf16.vlgmr.msra.gmra.mrb[16].mxu0 %v592_v37 }
 0x1c4   :  { %2646 = vmatmul.mubr.bf16.vlgmr.msra.gmra.mrb[0].mxu1 %v417_v45  ;;  %2686 = vmatpush3.bf16.msra.mxu0 %v3041_v46 }
 0x1c5   :  { %2670 = vmatpush3.bf16.msra.mxu1 %v3041_v46  ;;  %2687 = vmatprep.subr.bf16.mxu0 %v3042_v47 }
 0x1c6   :  { %2671 = vmatprep.subr.bf16.mxu1 %v3042_v47 }
 0x1c8   :  { %2688 = vmatpush3.bf16.msra.mxu0 %v3042_v47 }
 0x1c9   :  { %2672 = vmatpush3.bf16.msra.mxu1 %v3042_v47 }
 0x296   :  { %v3425_v48 = vpop.f32.mrb[16].mxu0 }
 0x297   :  { %v3427_v49 = vpop.f32.mrb[0].mxu1  ;;  %v3429_v50 = vpop.f32.mrb[17].mxu0  ;;  %v677_v59 = vsel %vm69_vm2, %v3425_v48, 0.0  ;;  %v690_v60 = vmul.f32 %v3425_v48, %v3425_v48 }
 0x298   :  { %v3431_v51 = vpop.f32.mrb[1].mxu1  ;;  %v688_v52 = vmul.f32 %v3429_v50, %v3429_v50  ;;  %v3435_v53 = vpop.f32.mrb[18].mxu0  ;;  %v647_v57 = vsel %vm69_vm2, %v3427_v49, 0.0  ;;  %v659_v58 = vmul.f32 %v3427_v49, %v3427_v49  ;;  %v674_v63 = vsel %vm69_vm2, %v3429_v50, 0.0 }
 0x299   :  { %v657_v54 = vmul.f32 %v3431_v51, %v3431_v51  ;;  %v3439_v55 = vpop.f32.mrb[2].mxu1  ;;  %v3441_v56 = vpop.f32.mrb[19].mxu0  ;;  %v644_v62 = vsel %vm69_vm2, %v3431_v51, 0.0  ;;  %v691_v12 = vmul.f32 %v3435_v53, %v3435_v53  ;;  %v695_v25 = vsel %vm69_vm2, %v690_v60, 0.0 }
 0x29a   :  { %v3451_v61 = vpop.f32.mrb[3].mxu1  ;;  %v692_v3 = vsel %vm69_vm2, %v688_v52, 0.0  ;;  %v675_v5 = vsel %vm69_vm2, %v3441_v56, 0.0  ;;  %v689_v6 = vmul.f32 %v3441_v56, %v3441_v56  ;;  %v660_v8 = vmul.f32 %v3439_v55, %v3439_v55 }
 0x29b   :  { %v645_v0 = vsel %vm69_vm2, %v3451_v61, 0.0  ;;  %v658_v2 = vmul.f32 %v3451_v61, %v3451_v61  ;;  %v661_v7 = vsel %vm69_vm2, %v657_v54, 0.0  ;;  %v676_v10 = vadd.f32 %v675_v5, %v674_v63 }
 0x29c   :  { %v646_v4 = vadd.f32 %v645_v0, %v644_v62  ;;  %v693_v19 = vsel %vm69_vm2, %v689_v6, 0.0  ;;  %v664_v20 = vsel %vm69_vm2, %v659_v58, 0.0  ;;  %v649_v21 = vsel %vm315_vm6, %v3439_v55, 0.0 }
 0x29d   :  { %v662_v9 = vsel %vm69_vm2, %v658_v2, 0.0  ;;  %v678_v22 = vadd.f32 %v677_v59, %v676_v10  ;;  %v694_v24 = vadd.f32 %v693_v19, %v692_v3  ;;  %v679_v26 = vsel %vm315_vm6, %v3435_v53, 0.0 }
 0x29e   :  { %v648_v13 = vadd.f32 %v647_v57, %v646_v4  ;;  %v663_v17 = vadd.f32 %v662_v9, %v661_v7  ;;  %v666_v29 = vsel %vm315_vm6, %v660_v8, 0.0  ;;  %v697_v33 = vsel %vm315_vm6, %v691_v12, 0.0  ;;  %v642_v9 = vld [vmem:[%s3971_s28] sm:$0x1] }
 0x29f   :  { %v680_v31 = vadd.f32 %v679_v26, %v678_v22  ;;  %v696_v32 = vadd.f32 %v695_v25, %v694_v24 }
 0x2a0   :  { %v650_v27 = vadd.f32 %v649_v21, %v648_v13  ;;  %v665_v28 = vadd.f32 %v664_v20, %v663_v17  ;;  %v643_v13 = vld [vmem:[%s3942_s6] sm:$0x1] }
 0x2a1   :  { %v681_v36 = vrot.slane %v680_v31, 4  ;;  %v698_v38 = vadd.f32 %v697_v33, %v696_v32 }
 0x2a2   :  { %v651_v34 = vrot.slane %v650_v27, 4  ;;  %v667_v35 = vadd.f32 %v666_v29, %v665_v28 }
 0x2a3   :  { %v682_v41 = vadd.f32 %v681_v36, %v680_v31  ;;  %v699_v42 = vrot.slane %v698_v38, 4 }
 0x2a4   :  { %v652_v39 = vadd.f32 %v651_v34, %v650_v27  ;;  %v668_v40 = vrot.slane %v667_v35, 4 }
 0x2a5   :  { %v683_v23 = vrot.slane %v682_v41, 2  ;;  %v700_v30 = vadd.f32 %v699_v42, %v698_v38 }
 0x2a6   :  { %v653_v11 = vrot.slane %v652_v39, 2  ;;  %v669_v14 = vadd.f32 %v668_v40, %v667_v35 }
 0x2a7   :  { %v684_v44 = vadd.f32 %v683_v23, %v682_v41  ;;  %v701_v45 = vrot.slane %v700_v30, 2 }
 0x2a8   :  { %v654_v37 = vadd.f32 %v653_v11, %v652_v39  ;;  %v670_v43 = vrot.slane %v669_v14, 2  ;;  %v3043_v11 = vld [vmem:[%s3943_s7 + $0x10] sm:$0xff]  }
 0x2a9   :  { %v685_v52 = vrot.slane %v684_v44, 1  ;;  %v702_v54 = vadd.f32 %v701_v45, %v700_v30  ;;  %2673 = vmatprep.subr.bf16.mxu1 %v3043_v11  ;;  %2689 = vmatprep.subr.bf16.mxu0 %v3043_v11  ;;  %v3044_v45 = vld [vmem:[%s3943_s7 + $0x18] sm:$0xff]  }
 0x2aa   :  { %v655_v46 = vrot.slane %v654_v37, 1  ;;  %v671_v47 = vadd.f32 %v670_v43, %v669_v14  ;;  %2674 = vmatpush3.bf16.msra.mxu1 %v3043_v11  ;;  %2690 = vmatpush3.bf16.msra.mxu0 %v3043_v11 }
 0x2ab   :  { %v686_v59 = vadd.f32 %v685_v52, %v684_v44  ;;  %v703_v60 = vrot.slane %v702_v54, 1  ;;  %2675 = vmatprep.subr.bf16.mxu1 %v3044_v45  ;;  %2691 = vmatprep.subr.bf16.mxu0 %v3044_v45 }
 0x2ac   :  { %v656_v57 = vadd.f32 %v655_v46, %v654_v37  ;;  %v672_v58 = vrot.slane %v671_v47, 1 }
 0x2ad   :  { %v704_v0 = vadd.f32 %v703_v60, %v702_v54 }
 0x2ae   :  { %v673_v62 = vadd.f32 %v672_v58, %v671_v47  ;;  %v687_v63 = vadd.f32 %v686_v59, %v656_v57  ;;  %2676 = vmatpush3.bf16.msra.mxu1 %v3044_v45  ;;  %2692 = vmatpush3.bf16.msra.mxu0 %v3044_v45 }
 0x2b0   :  { %v705_v2 = vadd.f32 %v704_v0, %v673_v62  ;;  %v706_v3 = vmul.f32 0.02, %v687_v63 }
 0x2b2   :  { %v707_v4 = vmul.f32 0.02, %v705_v2  ;;  %v708_v5 = vmul.f32 %v706_v3, %v706_v3 }
 0x2b4   :  { %v709_v6 = vsub.f32 %v707_v4, %v708_v5 }
 0x2b6   :  { %v710_v7 = vmax.f32 %v709_v6, 0.0 }
 0x2b8   :  { %v711_v8 = vadd.f32 1e-05, %v710_v7  ;;  %v3045_v7 = vld [vmem:[%s3943_s7 + $0x20] sm:$0xff]  }
 0x2b9   :  { %2677 = vmatprep.subr.bf16.mxu1 %v3045_v7  ;;  %2693 = vmatprep.subr.bf16.mxu0 %v3045_v7 }
 0x2ba   :  { %3057 = vrsqrt.f32 %v711_v8  ;;  %2678 = vmatpush3.bf16.msra.mxu1 %v3045_v7  ;;  %2694 = vmatpush3.bf16.msra.mxu0 %v3045_v7 }
 0x2c4   :  { %v3058_v10 = vpop.eup %3057 }
 0x2c5   :  { %v713_v12 = vmul.f32 %v3058_v10, %v642_v9  ;;  %v3046_v9 = vld [vmem:[%s3943_s7 + $0x28] sm:$0xff]  }
 0x2c6   :  { %2679 = vmatprep.subr.bf16.mxu1 %v3046_v9  ;;  %2695 = vmatprep.subr.bf16.mxu0 %v3046_v9 }
 0x2c7   :  { %v714_v17 = vmul.f32 %v713_v12, %v706_v3  ;;  %v719_v19 = vrot.slane %v713_v12, %v3345_v18  ;;  %2680 = vmatpush3.bf16.msra.mxu1 %v3046_v9  ;;  %2696 = vmatpush3.bf16.msra.mxu0 %v3046_v9  ;;  %v3047_v9 = vld [vmem:[%s3946_s10] sm:$0xff]  }
 0x2c8   :  { %2701 = vmatprep.subr.bf16.mxu1 %v3047_v9  ;;  %2721 = vmatprep.subr.bf16.mxu0 %v3047_v9 }
 0x2c9   :  { %v715_v20 = vsub.f32 %v643_v13, %v714_v17  ;;  %v751_v21 = vmul.f32 %v719_v19, %v3441_v56  ;;  %v750_v22 = vmul.f32 %v719_v19, %v3429_v50  ;;  %v720_v24 = vmul.f32 %v719_v19, %v3431_v51 }
 0x2ca   :  { %v721_v25 = vmul.f32 %v719_v19, %v3451_v61  ;;  %v722_v26 = vmul.f32 %v3427_v49, %v719_v19  ;;  %v752_v27 = vmul.f32 %v3425_v48, %v719_v19  ;;  %v753_v28 = vmul.f32 %v3435_v53, %v719_v19 }
 0x2cb   :  { %v728_v29 = vrot.slane %v715_v20, %v3345_v18  ;;  %v723_v31 = vmul.f32 %v3439_v55, %v719_v19 }
 0x2cd   :  { %v755_v32 = vadd.f32 %v751_v21, %v728_v29  ;;  %v754_v33 = vadd.f32 %v750_v22, %v728_v29  ;;  %v730_v34 = vadd.f32 %v728_v29, %v720_v24  ;;  %v731_v56 = vadd.f32 %v728_v29, %v721_v25 }
 0x2ce   :  { %v732_v35 = vadd.f32 %v728_v29, %v722_v26  ;;  %v756_v50 = vadd.f32 %v752_v27, %v728_v29  ;;  %v757_v36 = vadd.f32 %v753_v28, %v728_v29  ;;  %v733_v51 = vadd.f32 %v728_v29, %v723_v31 }
 0x2cf   :  { %vm759_vm0 = vcmp.gt.f32.partialorder %v755_v32, 0.0  ;;  %v763_v61 = vmul.f32 0.01, %v755_v32  ;;  %vm758_vm1 = vcmp.gt.f32.partialorder %v754_v33, 0.0  ;;  %v762_v49 = vmul.f32 0.01, %v754_v33 }
 0x2d0   :  { %vm734_vm4 = vcmp.gt.f32.partialorder %v730_v34, 0.0  ;;  %vm735_vm5 = vcmp.gt.f32.partialorder %v731_v56, 0.0  ;;  %v738_v48 = vmul.f32 0.01, %v730_v34  ;;  %v739_v53 = vmul.f32 0.01, %v731_v56 }
 0x2d1   :  { %v767_v38 = vsel %vm759_vm0, %v755_v32, %v763_v61  ;;  %v766_v39 = vsel %vm758_vm1, %v754_v33, %v762_v49  ;;  %vm736_vm7 = vcmp.gt.f32.partialorder %v732_v35, 0.0  ;;  %v740_v55 = vmul.f32 0.01, %v732_v35 }
 0x2d2   :  { %771 = vst.msk [vmem:[#allocation3 + $0x38] sm:$0xff] %vm69_vm2, %v767_v38  ;;  %770 = vst.msk [vmem:[#allocation3 + $0x30] sm:$0xff] %vm69_vm2, %v766_v39  ;;  %v742_v40 = vsel %vm734_vm4, %v730_v34, %v738_v48  ;;  %v743_v41 = vsel %vm735_vm5, %v731_v56, %v739_v53  ;;  %vm760_vm8 = vcmp.gt.f32.partialorder %v756_v50, 0.0  ;;  %v764_v42 = vmul.f32 0.01, %v756_v50 }
 0x2d3   :  { %746 = vst.msk [vmem:[#allocation3 + $0x8] sm:$0xff] %vm69_vm2, %v742_v40  ;;  %747 = vst.msk [vmem:[#allocation3 + $0x10] sm:$0xff] %vm69_vm2, %v743_v41  ;;  %v744_v14 = vsel %vm736_vm7, %v732_v35, %v740_v55  ;;  %vm761_vm9 = vcmp.gt.f32.partialorder %v757_v36, 0.0  ;;  %v765_v23 = vmul.f32 0.01, %v757_v36  ;;  %vm737_vm10 = vcmp.gt.f32.partialorder %v733_v51, 0.0 }
 0x2d4   :  { %748 = vst.msk [vmem:[#allocation3 + $0x18] sm:$0xff] %vm69_vm2, %v744_v14  ;;  %v768_v30 = vsel %vm760_vm8, %v756_v50, %v764_v42  ;;  %v741_v37 = vmul.f32 0.01, %v733_v51 }
 0x2d5   :  { %772 = vst.msk [vmem:[#allocation3 + $0x40] sm:$0xff] %vm69_vm2, %v768_v30  ;;  %v769_v43 = vsel %vm761_vm9, %v757_v36, %v765_v23 }
 0x2d6   :  { %773 = vst.msk [vmem:[#allocation3 + $0x48] sm:$0x1] %vm315_vm6, %v769_v43  ;;  %v745_v44 = vsel %vm737_vm10, %v733_v51, %v741_v37 }
 0x2d7   :  { %749 = vst.msk [vmem:[#allocation3 + $0x20] sm:$0x1] %vm315_vm6, %v745_v44 }
 0x2d9   :  { %v935_v46 = vld [vmem:[#allocation3 + $0x2f] sm:$0xff]  ;;  %v936_v47 = vld [vmem:[#allocation3 + $0x37] sm:$0xff] }
 0x2da   :  { %v2938_v52 = vpack.i.bf16 %v936_v47, %v935_v46  ;;  %v790_v54 = vld [vmem:[#allocation3 + $0x7] sm:$0xff]  ;;  %v791_v57 = vld [vmem:[#allocation3 + $0xf] sm:$0xff]  ;;  %v940_v4 = vld [vmem:[#allocation3 + $0x38] sm:$0xff] }
 0x2db   :  { %v2933_v58 = vpack.i.bf16 %v791_v57, %v790_v54  ;;  %v794_v59 = vld [vmem:[#allocation3 + $0x8] sm:$0xff]  ;;  %v795_v60 = vld [vmem:[#allocation3 + $0x10] sm:$0xff]  ;;  %v793_v63 = vld [vmem:[#allocation3 + $0x1f] sm:$0x1] }
 0x2dc   :  { %2939 = vrot.lane.b32.xlu1 %v2938_v52, %s3127_s27  ;;  %v792_v62 = vld [vmem:[#allocation3 + $0x17] sm:$0xff]  ;;  %v2948_v0 = vpack.i.bf16 %v795_v60, %v794_v59  ;;  %v937_v5 = vld [vmem:[#allocation3 + $0x3f] sm:$0xff]  ;;  %v938_v6 = vld [vmem:[#allocation3 + $0x47] sm:$0x1] }
 0x2dd   :  { %2934 = vrot.lane.b32.xlu0 %v2933_v58, %s3127_s27  ;;  %v2943_v2 = vpack.i.bf16 %v793_v63, %v792_v62  ;;  %v939_v3 = vld [vmem:[#allocation3 + $0x30] sm:$0xff]  ;;  %v2953_v10 = vpack.i.bf16 %v938_v6, %v937_v5  ;;  %v941_v12 = vld [vmem:[#allocation3 + $0x40] sm:$0xff]  ;;  %v942_v13 = vld [vmem:[#allocation3 + $0x48] sm:$0x1] }
 0x2de   :  { %v2958_v8 = vpack.i.bf16 %v940_v4, %v939_v3  ;;  %v796_v17 = vld [vmem:[#allocation3 + $0x18] sm:$0xff]  ;;  %v797_v19 = vld [vmem:[#allocation3 + $0x20] sm:$0x1]  ;;  %v2968_v20 = vpack.i.bf16 %v942_v13, %v941_v12  ;;  %v786_v28 = vld [vmem:[#allocation3 + $0x6] sm:$0xff] }
 0x2df   :  { %v2963_v21 = vpack.i.bf16 %v797_v19, %v796_v17  ;;  %v787_v29 = vld [vmem:[#allocation3 + $0xe] sm:$0xff]  ;;  %v932_v53 = vld [vmem:[#allocation3 + $0x36] sm:$0xff]  ;;  %v933_v45 = vld [vmem:[#allocation3 + $0x3e] sm:$0xff] }
 0x2e0   :  { %2949 = vrot.lane.b32.xlu1 %v2948_v0, %s3128_s3  ;;  %v931_v48 = vld [vmem:[#allocation3 + $0x2e] sm:$0xff]  ;;  %v934_v46 = vld [vmem:[#allocation3 + $0x46] sm:$0x1]  ;;  %v788_v57 = vld [vmem:[#allocation3 + $0x16] sm:$0xff] }
 0x2e1   :  { %2944 = vrot.lane.b32.xlu0 %v2943_v2, %s3127_s27  ;;  %v789_v58 = vld [vmem:[#allocation3 + $0x1e] sm:$0x1] }
 0x2e4   :  { %2959 = vrot.lane.b32.xlu1 %v2958_v8, %s3128_s3 }
 0x2e5   :  { %2954 = vrot.lane.b32.xlu0 %v2953_v10, %s3127_s27  ;;  %v3048_v10 = vld [vmem:[%s3946_s10 + $0x8] sm:$0xff]  }
 0x2e8   :  { %2969 = vrot.lane.b32.xlu1 %v2968_v20, %s3128_s3 }
 0x2e9   :  { %2964 = vrot.lane.b32.xlu0 %v2963_v21, %s3128_s3 }
 0x34e   :  { %v2940_v22 = vpop.permute.xlu1 %2939 }
 0x34f   :  { %v2935_v24 = vpop.permute.xlu0 %2934  ;;  %v2942_v34 = vunpack.i.h.bf16 %v2940_v22  ;;  %v2941_v56 = vunpack.i.l.bf16 %v2940_v22 }
 0x350   :  { %v2937_v25 = vunpack.i.h.bf16 %v2935_v24  ;;  %v2936_v26 = vunpack.i.l.bf16 %v2935_v24 }
 0x351   :  { %v975_v40 = vsel %vm69_vm2, %v931_v48, %v2941_v56  ;;  %v976_v41 = vsel %vm69_vm2, %v932_v53, %v2942_v34 }
 0x352   :  { %v2950_v27 = vpop.permute.xlu1 %2949  ;;  %v830_v35 = vsel %vm69_vm2, %v786_v28, %v2936_v26  ;;  %v831_v50 = vsel %vm69_vm2, %v787_v29, %v2937_v25 }
 0x353   :  { %v2952_v31 = vunpack.i.h.bf16 %v2950_v27  ;;  %v2951_v32 = vunpack.i.l.bf16 %v2950_v27  ;;  %v2945_v33 = vpop.permute.xlu0 %2944 }
 0x354   :  { %v2947_v14 = vunpack.i.h.bf16 %v2945_v33  ;;  %v2946_v23 = vunpack.i.l.bf16 %v2945_v33 }
 0x355   :  { %v834_v36 = vsel %vm406_vm14, %v830_v35, %v2951_v32  ;;  %v835_v51 = vsel %vm406_vm14, %v831_v50, %v2952_v31 }
 0x356   :  { %v838_v61 = vpack.c.bf16 %v835_v51, %v834_v36  ;;  %v2960_v49 = vpop.permute.xlu1 %2959  ;;  %v833_v0 = vsel %vm69_vm2, %v789_v58, %v2947_v14  ;;  %v832_v2 = vsel %vm69_vm2, %v788_v57, %v2946_v23 }
 0x357   :  { %v2962_v38 = vunpack.i.h.bf16 %v2960_v49  ;;  %v2961_v39 = vunpack.i.l.bf16 %v2960_v49  ;;  %v2955_v55 = vpop.permute.xlu0 %2954 }
 0x358   :  { %v2957_v42 = vunpack.i.h.bf16 %v2955_v55  ;;  %v2956_v11 = vunpack.i.l.bf16 %v2955_v55  ;;  %2681 = vmatprep.mubr.msk.bf16.mxu1 %vm411_vm15, %v838_v61 }
 0x359   :  { %v980_v30 = vsel %vm406_vm14, %v976_v41, %v2962_v38  ;;  %v979_v37 = vsel %vm406_vm14, %v975_v40, %v2961_v39 }
 0x35a   :  { %v983_v43 = vpack.c.bf16 %v980_v30, %v979_v37  ;;  %v2970_v44 = vpop.permute.xlu1 %2969  ;;  %v978_v59 = vsel %vm69_vm2, %v934_v46, %v2957_v42  ;;  %v977_v60 = vsel %vm69_vm2, %v933_v45, %v2956_v11 }
 0x35b   :  { %v2972_v47 = vunpack.i.h.bf16 %v2970_v44  ;;  %v2971_v52 = vunpack.i.l.bf16 %v2970_v44  ;;  %v2965_v54 = vpop.permute.xlu0 %2964 }
 0x35c   :  { %v2967_v62 = vunpack.i.h.bf16 %v2965_v54  ;;  %v2966_v63 = vunpack.i.l.bf16 %v2965_v54  ;;  %2697 = vmatprep.mubr.msk.bf16.mxu0 %vm411_vm15, %v983_v43 }
 0x35d   :  { %v981_v3 = vsel %vm406_vm14, %v977_v60, %v2971_v52  ;;  %v982_v4 = vsel %vm406_vm14, %v978_v59, %v2972_v47 }
 0x35e   :  { %v984_v5 = vpack.c.bf16 %v982_v4, %v981_v3  ;;  %v836_v6 = vsel %vm406_vm14, %v832_v2, %v2966_v63  ;;  %v837_v7 = vsel %vm406_vm14, %v833_v0, %v2967_v62 }
 0x35f   :  { %v839_v8 = vpack.c.bf16 %v837_v7, %v836_v6 }
 0x360   :  { %2698 = vmatmul.mubr.msk.bf16.vlgmr.msra.gmra.mrb[20].mxu0 %vm411_vm15, %v984_v5 }
 0x361   :  { %2682 = vmatmul.mubr.msk.bf16.vlgmr.msra.gmra.mrb[4].mxu1 %vm411_vm15, %v839_v8  ;;  %2722 = vmatpush3.bf16.msra.mxu0 %v3047_v9 }
 0x362   :  { %2702 = vmatpush3.bf16.msra.mxu1 %v3047_v9  ;;  %2723 = vmatprep.subr.bf16.mxu0 %v3048_v10 }
 0x363   :  { %2703 = vmatprep.subr.bf16.mxu1 %v3048_v10 }
 0x365   :  { %2724 = vmatpush3.bf16.msra.mxu0 %v3048_v10 }
 0x366   :  { %2704 = vmatpush3.bf16.msra.mxu1 %v3048_v10 }
 0x433   :  { %v3551_v12 = vpop.f32.mrb[20].mxu0 }
 0x434   :  { %v3553_v13 = vpop.f32.mrb[4].mxu1  ;;  %v3555_v17 = vpop.f32.mrb[21].mxu0  ;;  %v1075_v28 = vsel %vm69_vm2, %v3551_v12, 0.0  ;;  %v1088_v29 = vmul.f32 %v3551_v12, %v3551_v12 }
 0x435   :  { %v3557_v19 = vpop.f32.mrb[5].mxu1  ;;  %v1086_v20 = vmul.f32 %v3555_v17, %v3555_v17  ;;  %v3561_v21 = vpop.f32.mrb[22].mxu0  ;;  %v1045_v26 = vsel %vm69_vm2, %v3553_v13, 0.0  ;;  %v1057_v27 = vmul.f32 %v3553_v13, %v3553_v13  ;;  %v1072_v33 = vsel %vm69_vm2, %v3555_v17, 0.0 }
 0x436   :  { %v1055_v22 = vmul.f32 %v3557_v19, %v3557_v19  ;;  %v3565_v24 = vpop.f32.mrb[6].mxu1  ;;  %v3567_v25 = vpop.f32.mrb[23].mxu0  ;;  %v1042_v32 = vsel %vm69_vm2, %v3557_v19, 0.0  ;;  %v1089_v38 = vmul.f32 %v3561_v21, %v3561_v21  ;;  %v1093_v23 = vsel %vm69_vm2, %v1088_v29, 0.0 }
 0x437   :  { %v3577_v31 = vpop.f32.mrb[7].mxu1  ;;  %v1090_v35 = vsel %vm69_vm2, %v1086_v20, 0.0  ;;  %v1073_v36 = vsel %vm69_vm2, %v3567_v25, 0.0  ;;  %v1087_v51 = vmul.f32 %v3567_v25, %v3567_v25  ;;  %v1058_v49 = vmul.f32 %v3565_v24, %v3565_v24 }
 0x438   :  { %v1043_v34 = vsel %vm69_vm2, %v3577_v31, 0.0  ;;  %v1056_v56 = vmul.f32 %v3577_v31, %v3577_v31  ;;  %v1059_v61 = vsel %vm69_vm2, %v1055_v22, 0.0  ;;  %v1074_v53 = vadd.f32 %v1073_v36, %v1072_v33 }
 0x439   :  { %v1044_v50 = vadd.f32 %v1043_v34, %v1042_v32  ;;  %v1091_v40 = vsel %vm69_vm2, %v1087_v51, 0.0  ;;  %v1062_v41 = vsel %vm69_vm2, %v1057_v27, 0.0  ;;  %v1047_v42 = vsel %vm315_vm6, %v3565_v24, 0.0 }
 0x43a   :  { %v1060_v48 = vsel %vm69_vm2, %v1056_v56, 0.0  ;;  %v1076_v11 = vadd.f32 %v1075_v28, %v1074_v53  ;;  %v1092_v14 = vadd.f32 %v1091_v40, %v1090_v35  ;;  %v1077_v30 = vsel %vm315_vm6, %v3561_v21, 0.0 }
 0x43b   :  { %v1046_v39 = vadd.f32 %v1045_v26, %v1044_v50  ;;  %v1061_v55 = vadd.f32 %v1060_v48, %v1059_v61  ;;  %v1064_v44 = vsel %vm315_vm6, %v1058_v49, 0.0  ;;  %v1095_v47 = vsel %vm315_vm6, %v1089_v38, 0.0  ;;  %v1040_v48 = vld [vmem:[%s3944_s8] sm:$0x1] }
 0x43c   :  { %v1078_v45 = vadd.f32 %v1077_v30, %v1076_v11  ;;  %v1094_v46 = vadd.f32 %v1093_v23, %v1092_v14 }
 0x43d   :  { %v1048_v37 = vadd.f32 %v1047_v42, %v1046_v39  ;;  %v1063_v43 = vadd.f32 %v1062_v41, %v1061_v55  ;;  %v1041_v39 = vld [vmem:[%s3945_s9] sm:$0x1] }
 0x43e   :  { %v1079_v57 = vrot.slane %v1078_v45, 4  ;;  %v1096_v58 = vadd.f32 %v1095_v47, %v1094_v46 }
 0x43f   :  { %v1049_v52 = vrot.slane %v1048_v37, 4  ;;  %v1065_v54 = vadd.f32 %v1064_v44, %v1063_v43 }
 0x440   :  { %v1080_v62 = vadd.f32 %v1079_v57, %v1078_v45  ;;  %v1097_v63 = vrot.slane %v1096_v58, 4 }
 0x441   :  { %v1050_v59 = vadd.f32 %v1049_v52, %v1048_v37  ;;  %v1066_v60 = vrot.slane %v1065_v54, 4 }
 0x442   :  { %v1081_v3 = vrot.slane %v1080_v62, 2  ;;  %v1098_v4 = vadd.f32 %v1097_v63, %v1096_v58 }
 0x443   :  { %v1051_v0 = vrot.slane %v1050_v59, 2  ;;  %v1067_v2 = vadd.f32 %v1066_v60, %v1065_v54 }
 0x444   :  { %v1082_v7 = vadd.f32 %v1081_v3, %v1080_v62  ;;  %v1099_v8 = vrot.slane %v1098_v4, 2  ;;  %v3049_v3 = vld [vmem:[%s3946_s10 + $0x10] sm:$0xff]  }
 0x445   :  { %v1052_v5 = vadd.f32 %v1051_v0, %v1050_v59  ;;  %v1068_v6 = vrot.slane %v1067_v2, 2  ;;  %2705 = vmatprep.subr.bf16.mxu1 %v3049_v3  ;;  %2725 = vmatprep.subr.bf16.mxu0 %v3049_v3 }
 0x446   :  { %v1083_v20 = vrot.slane %v1082_v7, 1  ;;  %v1100_v22 = vadd.f32 %v1099_v8, %v1098_v4  ;;  %2706 = vmatpush3.bf16.msra.mxu1 %v3049_v3  ;;  %2726 = vmatpush3.bf16.msra.mxu0 %v3049_v3  ;;  %v3050_v8 = vld [vmem:[%s3946_s10 + $0x18] sm:$0xff]  }
 0x447   :  { %v1053_v9 = vrot.slane %v1052_v5, 1  ;;  %v1069_v10 = vadd.f32 %v1068_v6, %v1067_v2  ;;  %2707 = vmatprep.subr.bf16.mxu1 %v3050_v8  ;;  %2727 = vmatprep.subr.bf16.mxu0 %v3050_v8 }
 0x448   :  { %v1084_v28 = vadd.f32 %v1083_v20, %v1082_v7  ;;  %v1101_v29 = vrot.slane %v1100_v22, 1 }
 0x449   :  { %v1054_v26 = vadd.f32 %v1053_v9, %v1052_v5  ;;  %v1070_v27 = vrot.slane %v1069_v10, 1 }
 0x44a   :  { %v1102_v34 = vadd.f32 %v1101_v29, %v1100_v22  ;;  %2708 = vmatpush3.bf16.msra.mxu1 %v3050_v8  ;;  %2728 = vmatpush3.bf16.msra.mxu0 %v3050_v8 }
 0x44b   :  { %v1071_v32 = vadd.f32 %v1070_v27, %v1069_v10  ;;  %v1085_v33 = vadd.f32 %v1084_v28, %v1054_v26 }
 0x44d   :  { %v1103_v56 = vadd.f32 %v1102_v34, %v1071_v32  ;;  %v1104_v35 = vmul.f32 0.02, %v1085_v33 }
 0x44f   :  { %v1105_v50 = vmul.f32 0.02, %v1103_v56  ;;  %v1106_v36 = vmul.f32 %v1104_v35, %v1104_v35 }
 0x451   :  { %v1107_v51 = vsub.f32 %v1105_v50, %v1106_v36 }
 0x453   :  { %v1108_v61 = vmax.f32 %v1107_v51, 0.0 }
 0x455   :  { %v1109_v49 = vadd.f32 1e-05, %v1108_v61 }
 0x457   :  { %3059 = vrsqrt.f32 %v1109_v49  ;;  %v3051_v49 = vld [vmem:[%s3946_s10 + $0x20] sm:$0xff]  }
 0x458   :  { %2709 = vmatprep.subr.bf16.mxu1 %v3051_v49  ;;  %2729 = vmatprep.subr.bf16.mxu0 %v3051_v49 }
 0x459   :  { %2710 = vmatpush3.bf16.msra.mxu1 %v3051_v49  ;;  %2730 = vmatpush3.bf16.msra.mxu0 %v3051_v49 }
 0x461   :  { %v3060_v53 = vpop.eup %3059 }
 0x462   :  { %v1111_v38 = vmul.f32 %v3060_v53, %v1040_v48 }
 0x464   :  { %v1112_v55 = vmul.f32 %v1111_v38, %v1104_v35  ;;  %v1117_v40 = vrot.slane %v1111_v38, %v3345_v18 }
 0x466   :  { %v1113_v41 = vsub.f32 %v1041_v39, %v1112_v55  ;;  %v1118_v42 = vmul.f32 %v1117_v40, %v3557_v19  ;;  %v1119_v11 = vmul.f32 %v1117_v40, %v3577_v31  ;;  %v1120_v14 = vmul.f32 %v3553_v13, %v1117_v40  ;;  %v3052_v39 = vld [vmem:[%s3946_s10 + $0x28] sm:$0xff]  }
 0x467   :  { %v1148_v23 = vmul.f32 %v1117_v40, %v3555_v17  ;;  %v1149_v30 = vmul.f32 %v1117_v40, %v3567_v25  ;;  %v1150_v37 = vmul.f32 %v3551_v12, %v1117_v40  ;;  %v1151_v43 = vmul.f32 %v3561_v21, %v1117_v40  ;;  %2711 = vmatprep.subr.bf16.mxu1 %v3052_v39 }
 0x468   :  { %v1126_v44 = vrot.slane %v1113_v41, %v3345_v18  ;;  %v1121_v45 = vmul.f32 %v3565_v24, %v1117_v40  ;;  %2731 = vmatprep.subr.bf16.mxu0 %v3052_v39  ;;  %2712 = vmatpush3.bf16.msra.mxu1 %v3052_v39 }
 0x469   :  { %2732 = vmatpush3.bf16.msra.mxu0 %v3052_v39 }
 0x46a   :  { %v1128_v46 = vadd.f32 %v1126_v44, %v1118_v42  ;;  %v1129_v47 = vadd.f32 %v1126_v44, %v1119_v11  ;;  %v1130_v52 = vadd.f32 %v1126_v44, %v1120_v14  ;;  %v1152_v19 = vadd.f32 %v1148_v23, %v1126_v44  ;;  %v3053_v23 = vld [vmem:[%s3946_s10 + $0x30] sm:$0xff]  }
 0x46b   :  { %v1153_v54 = vadd.f32 %v1149_v30, %v1126_v44  ;;  %v1154_v31 = vadd.f32 %v1150_v37, %v1126_v44  ;;  %v1155_v57 = vadd.f32 %v1151_v43, %v1126_v44  ;;  %v1131_v13 = vadd.f32 %v1126_v44, %v1121_v45  ;;  %2713 = vmatprep.subr.bf16.mxu1 %v3053_v23 }
 0x46c   :  { %vm1132_vm11 = vcmp.gt.f32.partialorder %v1128_v46, 0.0  ;;  %vm1133_vm12 = vcmp.gt.f32.partialorder %v1129_v47, 0.0  ;;  %vm1134_vm13 = vcmp.gt.f32.partialorder %v1130_v52, 0.0  ;;  %v1136_v17 = vmul.f32 0.01, %v1128_v46  ;;  %2733 = vmatprep.subr.bf16.mxu0 %v3053_v23  ;;  %2714 = vmatpush3.bf16.msra.mxu1 %v3053_v23 }
 0x46d   :  { %v1137_v25 = vmul.f32 0.01, %v1129_v47  ;;  %v1138_v12 = vmul.f32 0.01, %v1130_v52  ;;  %vm1156_vm0 = vcmp.gt.f32.partialorder %v1152_v19, 0.0  ;;  %vm1157_vm1 = vcmp.gt.f32.partialorder %v1153_v54, 0.0  ;;  %2734 = vmatpush3.bf16.msra.mxu0 %v3053_v23 }
 0x46e   :  { %v1140_v21 = vsel %vm1132_vm11, %v1128_v46, %v1136_v17  ;;  %vm1158_vm4 = vcmp.gt.f32.partialorder %v1154_v31, 0.0  ;;  %v1160_v58 = vmul.f32 0.01, %v1152_v19  ;;  %v1161_v24 = vmul.f32 0.01, %v1153_v54 }
 0x46f   :  { %v1141_v59 = vsel %vm1133_vm12, %v1129_v47, %v1137_v25  ;;  %v1142_v60 = vsel %vm1134_vm13, %v1130_v52, %v1138_v12  ;;  %v1162_v62 = vmul.f32 0.01, %v1154_v31  ;;  %1144 = vst.msk [vmem:[#allocation2 + $0x8] sm:$0xff] %vm69_vm2, %v1140_v21  ;;  %vm1159_vm5 = vcmp.gt.f32.partialorder %v1155_v57, 0.0  ;;  %v3054_v47 = vld [vmem:[%s3946_s10 + $0x38] sm:$0xff]  }
 0x470   :  { %v1164_v63 = vsel %vm1156_vm0, %v1152_v19, %v1160_v58  ;;  %v1165_v0 = vsel %vm1157_vm1, %v1153_v54, %v1161_v24  ;;  %1145 = vst.msk [vmem:[#allocation2 + $0x10] sm:$0xff] %vm69_vm2, %v1141_v59  ;;  %1146 = vst.msk [vmem:[#allocation2 + $0x18] sm:$0xff] %vm69_vm2, %v1142_v60  ;;  %v1163_v2 = vmul.f32 0.01, %v1155_v57  ;;  %vm1135_vm7 = vcmp.gt.f32.partialorder %v1131_v13, 0.0  ;;  %2715 = vmatprep.subr.bf16.mxu1 %v3054_v47 }
 0x471   :  { %v1166_v4 = vsel %vm1158_vm4, %v1154_v31, %v1162_v62  ;;  %1168 = vst.msk [vmem:[#allocation2 + $0x30] sm:$0xff] %vm69_vm2, %v1164_v63  ;;  %1169 = vst.msk [vmem:[#allocation2 + $0x38] sm:$0xff] %vm69_vm2, %v1165_v0  ;;  %v1139_v5 = vmul.f32 0.01, %v1131_v13  ;;  %2735 = vmatprep.subr.bf16.mxu0 %v3054_v47  ;;  %2716 = vmatpush3.bf16.msra.mxu1 %v3054_v47 }
 0x472   :  { %1170 = vst.msk [vmem:[#allocation2 + $0x40] sm:$0xff] %vm69_vm2, %v1166_v4  ;;  %v1167_v6 = vsel %vm1159_vm5, %v1155_v57, %v1163_v2  ;;  %2736 = vmatpush3.bf16.msra.mxu0 %v3054_v47 }
 0x473   :  { %1171 = vst.msk [vmem:[#allocation2 + $0x48] sm:$0x1] %vm315_vm6, %v1167_v6  ;;  %v1143_v7 = vsel %vm1135_vm7, %v1131_v13, %v1139_v5 }
 0x474   :  { %1147 = vst.msk [vmem:[#allocation2 + $0x20] sm:$0x1] %vm315_vm6, %v1143_v7 }
 0x476   :  { %v1192_v9 = vld [vmem:[#allocation2 + $0x6] sm:$0xff] }
 0x477   :  { %v1193_v10 = vld [vmem:[#allocation2 + $0xe] sm:$0xff]  ;;  %v1194_v28 = vld [vmem:[#allocation2 + $0x16] sm:$0xff]  ;;  %v1195_v29 = vld [vmem:[#allocation2 + $0x1e] sm:$0x1] }
 0x478   :  { %v1367_v20 = vld [vmem:[#allocation2 + $0x2e] sm:$0xff]  ;;  %v1368_v22 = vld [vmem:[#allocation2 + $0x36] sm:$0xff]  ;;  %v2973_v26 = vpack.i.bf16 %v1193_v10, %v1192_v9  ;;  %v2983_v34 = vpack.i.bf16 %v1195_v29, %v1194_v28  ;;  %v1199_v38 = vld [vmem:[#allocation2 + $0x1f] sm:$0x1] }
 0x479   :  { %v2978_v27 = vpack.i.bf16 %v1368_v22, %v1367_v20  ;;  %v1196_v32 = vld [vmem:[#allocation2 + $0x7] sm:$0xff]  ;;  %v1197_v33 = vld [vmem:[#allocation2 + $0xf] sm:$0xff]  ;;  %v1369_v35 = vld [vmem:[#allocation2 + $0x3e] sm:$0xff] }
 0x47a   :  { %2974 = vrot.lane.b32.xlu0 %v2973_v26, %s3127_s27  ;;  %v2988_v56 = vpack.i.bf16 %v1197_v33, %v1196_v32  ;;  %v1370_v50 = vld [vmem:[#allocation2 + $0x46] sm:$0x1]  ;;  %v1371_v36 = vld [vmem:[#allocation2 + $0x2f] sm:$0xff]  ;;  %v1372_v51 = vld [vmem:[#allocation2 + $0x37] sm:$0xff] }
 0x47b   :  { %2979 = vrot.lane.b32.xlu1 %v2978_v27, %s3127_s27  ;;  %v2993_v61 = vpack.i.bf16 %v1370_v50, %v1369_v35  ;;  %v2998_v48 = vpack.i.bf16 %v1372_v51, %v1371_v36  ;;  %v1198_v53 = vld [vmem:[#allocation2 + $0x17] sm:$0xff]  ;;  %v1200_v55 = vld [vmem:[#allocation2 + $0x8] sm:$0xff]  ;;  %v1373_v11 = vld [vmem:[#allocation2 + $0x3f] sm:$0xff] }
 0x47c   :  { %v1201_v40 = vld [vmem:[#allocation2 + $0x10] sm:$0xff]  ;;  %v3003_v41 = vpack.i.bf16 %v1199_v38, %v1198_v53  ;;  %v1374_v14 = vld [vmem:[#allocation2 + $0x47] sm:$0x1]  ;;  %v1376_v37 = vld [vmem:[#allocation2 + $0x38] sm:$0xff] }
 0x47d   :  { %v3008_v42 = vpack.i.bf16 %v1201_v40, %v1200_v55  ;;  %v1375_v30 = vld [vmem:[#allocation2 + $0x30] sm:$0xff]  ;;  %v3013_v43 = vpack.i.bf16 %v1374_v14, %v1373_v11  ;;  %v1202_v45 = vld [vmem:[#allocation2 + $0x18] sm:$0xff]  ;;  %v1203_v46 = vld [vmem:[#allocation2 + $0x20] sm:$0x1] }
 0x47e   :  { %2984 = vrot.lane.b32.xlu0 %v2983_v34, %s3127_s27  ;;  %v3018_v44 = vpack.i.bf16 %v1376_v37, %v1375_v30  ;;  %v1377_v52 = vld [vmem:[#allocation2 + $0x40] sm:$0xff]  ;;  %v1378_v19 = vld [vmem:[#allocation2 + $0x48] sm:$0x1]  ;;  %v3023_v54 = vpack.i.bf16 %v1203_v46, %v1202_v45  ;;  %v1363_v3 = vld [vmem:[#allocation2 + $0x2d] sm:$0xff] }
 0x47f   :  { %2989 = vrot.lane.b32.xlu1 %v2988_v56, %s3128_s3  ;;  %v3028_v31 = vpack.i.bf16 %v1378_v19, %v1377_v52  ;;  %v1188_v63 = vld [vmem:[#allocation2 + $0x5] sm:$0xff]  ;;  %v1189_v4 = vld [vmem:[#allocation2 + $0xd] sm:$0xff]  ;;  %v1364_v29 = vld [vmem:[#allocation2 + $0x35] sm:$0xff] }
 0x480   :  { %v1191_v32 = vld [vmem:[#allocation2 + $0x1d] sm:$0x1]  ;;  %v1190_v40 = vld [vmem:[#allocation2 + $0x15] sm:$0xff]  ;;  %v1366_v11 = vld [vmem:[#allocation2 + $0x45] sm:$0x1] }
 0x481   :  { %v1365_v37 = vld [vmem:[#allocation2 + $0x3d] sm:$0xff] }
 0x482   :  { %2994 = vrot.lane.b32.xlu0 %v2993_v61, %s3127_s27 }
 0x483   :  { %2999 = vrot.lane.b32.xlu1 %v2998_v48, %s3128_s3 }
 0x486   :  { %3004 = vrot.lane.b32.xlu0 %v3003_v41, %s3128_s3 }
 0x487   :  { %3009 = vrot.lane.b32.xlu1 %v3008_v42, %s3129_s23 }
 0x48a   :  { %3014 = vrot.lane.b32.xlu0 %v3013_v43, %s3128_s3 }
 0x48b   :  { %3019 = vrot.lane.b32.xlu1 %v3018_v44, %s3129_s23 }
 0x48e   :  { %3024 = vrot.lane.b32.xlu0 %v3023_v54, %s3129_s23 }
 0x48f   :  { %3029 = vrot.lane.b32.xlu1 %v3028_v31, %s3129_s23 }
 0x4ec   :  { %v2975_v57 = vpop.permute.xlu0 %2974 }
 0x4ed   :  { %v2980_v13 = vpop.permute.xlu1 %2979  ;;  %v2976_v21 = vunpack.i.l.bf16 %v2975_v57  ;;  %v2977_v59 = vunpack.i.h.bf16 %v2975_v57 }
 0x4ee   :  { %v2981_v24 = vunpack.i.l.bf16 %v2980_v13  ;;  %v2982_v2 = vunpack.i.h.bf16 %v2980_v13 }
 0x4ef   :  { %v1252_v5 = vsel %vm69_vm2, %v1188_v63, %v2976_v21  ;;  %v1253_v9 = vsel %vm69_vm2, %v1189_v4, %v2977_v59  ;;  %v3130_v4 = vmov 0.0|0.0  }
 0x4f0   :  { %v2985_v17 = vpop.permute.xlu0 %2984  ;;  %v1427_v8 = vsel %vm69_vm2, %v1363_v3, %v2981_v24  ;;  %v1428_v36 = vsel %vm69_vm2, %v1364_v29, %v2982_v2  ;;  %v1644_v2 = vld [vmem:[%s3949_s13 + $0x8] sm:$0xff]  ;;  %v1645_v3 = vld [vmem:[%s3949_s13 + $0x10] sm:$0xff]  ;;  %2804 = vmatprep.subr.bf16.mxu0 %v3130_v4  ;;  %2825 = vmatprep.subr.bf16.mxu1 %v3130_v4 }
 0x4f1   :  { %v2990_v25 = vpop.permute.xlu1 %2989  ;;  %v2987_v6 = vunpack.i.h.bf16 %v2985_v17  ;;  %v2986_v33 = vunpack.i.l.bf16 %v2985_v17 }
 0x4f2   :  { %v2992_v60 = vunpack.i.h.bf16 %v2990_v25  ;;  %v2991_v62 = vunpack.i.l.bf16 %v2990_v25 }
 0x4f3   :  { %v1255_v51 = vsel %vm69_vm2, %v1191_v32, %v2987_v6  ;;  %v1254_v30 = vsel %vm69_vm2, %v1190_v40, %v2986_v33  ;;  %v1646_v6 = vld [vmem:[%s3949_s13 + $0x18] sm:$0xff] }
 0x4f4   :  { %v2995_v12 = vpop.permute.xlu0 %2994  ;;  %v1256_v22 = vsel %vm406_vm14, %v1252_v5, %v2991_v62  ;;  %v1257_v26 = vsel %vm406_vm14, %v1253_v9, %v2992_v60  ;;  %v1648_v9 = vld [vmem:[%s3949_s13 + $0x28] sm:$0xff] }
 0x4f5   :  { %v3000_v58 = vpop.permute.xlu1 %2999  ;;  %v2997_v34 = vunpack.i.h.bf16 %v2995_v12  ;;  %v2996_v61 = vunpack.i.l.bf16 %v2995_v12 }
 0x4f6   :  { %v3002_v27 = vunpack.i.h.bf16 %v3000_v58  ;;  %v3001_v28 = vunpack.i.l.bf16 %v3000_v58 }
 0x4f7   :  { %v1430_v43 = vsel %vm69_vm2, %v1366_v11, %v2997_v34  ;;  %v1429_v47 = vsel %vm69_vm2, %v1365_v37, %v2996_v61 }
 0x4f8   :  { %v3005_v0 = vpop.permute.xlu0 %3004  ;;  %v1432_v41 = vsel %vm406_vm14, %v1428_v36, %v3002_v27  ;;  %v1431_v42 = vsel %vm406_vm14, %v1427_v8, %v3001_v28  ;;  %v1647_v8 = vld [vmem:[%s3949_s13 + $0x20] sm:$0xff] }
 0x4f9   :  { %v3010_v7 = vpop.permute.xlu1 %3009  ;;  %v3007_v53 = vunpack.i.h.bf16 %v3005_v0  ;;  %v3006_v38 = vunpack.i.l.bf16 %v3005_v0  ;;  %v1643_v0 = vld [vmem:[%s3949_s13] sm:$0xff] }
 0x4fa   :  { %v3012_v10 = vunpack.i.h.bf16 %v3010_v7  ;;  %v3011_v20 = vunpack.i.l.bf16 %v3010_v7  ;;  %v2805_v5 = vpack.c.bf16 %v1644_v2, %v1643_v0  ;;  %v2808_v7 = vpack.c.bf16 %v1646_v6, %v1645_v3 }
 0x4fb   :  { %v1258_v57 = vsel %vm406_vm14, %v1254_v30, %v3006_v38  ;;  %v1259_v13 = vsel %vm406_vm14, %v1255_v51, %v3007_v53 }
 0x4fc   :  { %v3015_v56 = vpop.permute.xlu0 %3014  ;;  %v1260_v35 = vsel %vm411_vm15, %v1256_v22, %v3011_v20  ;;  %v1261_v50 = vsel %vm411_vm15, %v1257_v26, %v3012_v10  ;;  %v2811_v10 = vpack.c.bf16 %v1648_v9, %v1647_v8  ;;  %v1649_v20 = vld [vmem:[%s3949_s13 + $0x30] sm:$0xff]  ;;  %v1650_v22 = vld [vmem:[%s3949_s13 + $0x38] sm:$0xff] }
 0x4fd   :  { %v3020_v49 = vpop.permute.xlu1 %3019  ;;  %v1264_v48 = vpack.c.bf16 %v1261_v50, %v1260_v35  ;;  %v3017_v14 = vunpack.i.h.bf16 %v3015_v56  ;;  %v3016_v23 = vunpack.i.l.bf16 %v3015_v56  ;;  %v2814_v26 = vpack.c.bf16 %v1650_v22, %v1649_v20 }
 0x4fe   :  { %v3022_v39 = vunpack.i.h.bf16 %v3020_v49  ;;  %v3021_v55 = vunpack.i.l.bf16 %v3020_v49 }
 0x4ff   :  { %2717 = vmatprep.mubr.bf16.mxu1 %v1264_v48  ;;  %v1433_v12 = vsel %vm406_vm14, %v1429_v47, %v3016_v23  ;;  %v1434_v21 = vsel %vm406_vm14, %v1430_v43, %v3017_v14 }
 0x500   :  { %v3025_v44 = vpop.permute.xlu0 %3024  ;;  %v1435_v45 = vsel %vm411_vm15, %v1431_v42, %v3021_v55  ;;  %v1436_v46 = vsel %vm411_vm15, %v1432_v41, %v3022_v39 }
 0x501   :  { %v3030_v52 = vpop.permute.xlu1 %3029  ;;  %v3027_v19 = vunpack.i.h.bf16 %v3025_v44  ;;  %v3026_v54 = vunpack.i.l.bf16 %v3025_v44  ;;  %v1439_v31 = vpack.c.bf16 %v1436_v46, %v1435_v45 }
 0x502   :  { %v3032_v17 = vunpack.i.h.bf16 %v3030_v52  ;;  %v3031_v25 = vunpack.i.l.bf16 %v3030_v52 }
 0x503   :  { %v1262_v58 = vsel %vm411_vm15, %v1258_v57, %v3026_v54  ;;  %v1263_v24 = vsel %vm411_vm15, %v1259_v13, %v3027_v19  ;;  %2737 = vmatprep.mubr.bf16.mxu0 %v1439_v31 }
 0x504   :  { %v1437_v59 = vsel %vm411_vm15, %v1433_v12, %v3031_v25  ;;  %v1438_v60 = vsel %vm411_vm15, %v1434_v21, %v3032_v17  ;;  %v1265_v62 = vpack.c.bf16 %v1263_v24, %v1262_v58 }
 0x505   :  { %v1440_v63 = vpack.c.bf16 %v1438_v60, %v1437_v59 }
 0x506   :  { %2718 = vmatmul.mubr.bf16.vlgmr.msra.gmra.mrb[8].mxu1 %v1265_v62 }
 0x507   :  { %2738 = vmatmul.mubr.bf16.vlgmr.msra.gmra.mrb[24].mxu0 %v1440_v63  ;;  %2760 = vmatprep.mubr.msk.f32.mxu1 %vm3126_vm3, %v3125_v1 }
 0x508   :  { %2757 = vmatprep.mubr.msk.f32.mxu0 %vm3126_vm3, %v3125_v1  ;;  %2806 = vmatpush3.bf16.msra.mxu0 %v2805_v5 }
 0x509   :  { %2829 = vmatpush3.bf16.msra.mxu1 %v2805_v5  ;;  %2807 = vmatprep.subr.bf16.mxu0 %v3130_v4 }
 0x50a   :  { %2826 = vmatprep.subr.bf16.mxu1 %v3130_v4 }
 0x50c   :  { %2809 = vmatpush3.bf16.msra.mxu0 %v2808_v7 }
 0x50d   :  { %2830 = vmatpush3.bf16.msra.mxu1 %v2808_v7  ;;  %2810 = vmatprep.subr.bf16.mxu0 %v3130_v4 }
 0x50e   :  { %2827 = vmatprep.subr.bf16.mxu1 %v3130_v4 }
 0x510   :  { %2812 = vmatpush3.bf16.msra.mxu0 %v2811_v10 }
 0x511   :  { %2831 = vmatpush3.bf16.msra.mxu1 %v2811_v10  ;;  %2813 = vmatprep.subr.bf16.mxu0 %v3130_v4 }
 0x512   :  { %2828 = vmatprep.subr.bf16.mxu1 %v3130_v4 }
 0x514   :  { %2815 = vmatpush3.bf16.msra.mxu0 %v2814_v26 }
 0x515   :  { %2832 = vmatpush3.bf16.msra.mxu1 %v2814_v26 }
 0x5d9   :  { %v3721_v27 = vpop.f32.mrb[8].mxu1 }
 0x5da   :  { %v3723_v28 = vpop.f32.mrb[24].mxu0  ;;  %v3725_v29 = vpop.f32.mrb[9].mxu1  ;;  %v1495_v36 = vsel %vm69_vm2, %v3721_v27, 0.0  ;;  %v1507_v51 = vmul.f32 %v3721_v27, %v3721_v27 }
 0x5db   :  { %v1505_v32 = vmul.f32 %v3725_v29, %v3725_v29  ;;  %v3729_v33 = vpop.f32.mrb[25].mxu0  ;;  %v3731_v34 = vpop.f32.mrb[10].mxu1  ;;  %v1525_v61 = vsel %vm69_vm2, %v3723_v28, 0.0  ;;  %v1538_v49 = vmul.f32 %v3723_v28, %v3723_v28  ;;  %v1492_v53 = vsel %vm69_vm2, %v3725_v29, 0.0 }
 0x5dc   :  { %v1536_v56 = vmul.f32 %v3729_v33, %v3729_v33  ;;  %v3735_v35 = vpop.f32.mrb[26].mxu0  ;;  %v3737_v50 = vpop.f32.mrb[11].mxu1  ;;  %v1522_v38 = vsel %vm69_vm2, %v3729_v33, 0.0  ;;  %v1508_v23 = vmul.f32 %v3731_v34, %v3731_v34  ;;  %v1512_v47 = vsel %vm69_vm2, %v1507_v51, 0.0 }
 0x5dd   :  { %v3747_v48 = vpop.f32.mrb[27].mxu0  ;;  %v1493_v39 = vsel %vm69_vm2, %v3737_v50, 0.0  ;;  %v1506_v55 = vmul.f32 %v3737_v50, %v3737_v50  ;;  %v1509_v40 = vsel %vm69_vm2, %v1505_v32, 0.0  ;;  %v1539_v43 = vmul.f32 %v3735_v35, %v3735_v35 }
 0x5de   :  { %v1494_v41 = vadd.f32 %v1493_v39, %v1492_v53  ;;  %v1523_v42 = vsel %vm69_vm2, %v3747_v48, 0.0  ;;  %v1537_v11 = vmul.f32 %v3747_v48, %v3747_v48  ;;  %v1540_v14 = vsel %vm69_vm2, %v1536_v56, 0.0 }
 0x5df   :  { %v1510_v30 = vsel %vm69_vm2, %v1506_v55, 0.0  ;;  %v1524_v37 = vadd.f32 %v1523_v42, %v1522_v38  ;;  %v1497_v52 = vsel %vm315_vm6, %v3731_v34, 0.0  ;;  %v1543_v31 = vsel %vm69_vm2, %v1538_v49, 0.0 }
 0x5e0   :  { %v1496_v44 = vadd.f32 %v1495_v36, %v1494_v41  ;;  %v1511_v45 = vadd.f32 %v1510_v30, %v1509_v40  ;;  %v1541_v46 = vsel %vm69_vm2, %v1537_v11, 0.0  ;;  %v1527_v57 = vsel %vm315_vm6, %v3735_v35, 0.0 }
 0x5e1   :  { %v1526_v19 = vadd.f32 %v1525_v61, %v1524_v37  ;;  %v1542_v54 = vadd.f32 %v1541_v46, %v1540_v14  ;;  %v1514_v25 = vsel %vm315_vm6, %v1508_v23, 0.0  ;;  %v1545_v58 = vsel %vm315_vm6, %v1539_v43, 0.0  ;;  %v1490_v37 = vld [vmem:[%s3947_s11] sm:$0x1] }
 0x5e2   :  { %v1498_v13 = vadd.f32 %v1497_v52, %v1496_v44  ;;  %v1513_v17 = vadd.f32 %v1512_v47, %v1511_v45  ;;  %v1491_v45 = vld [vmem:[%s3948_s12] sm:$0x1] }
 0x5e3   :  { %v1528_v12 = vadd.f32 %v1527_v57, %v1526_v19  ;;  %v1544_v21 = vadd.f32 %v1543_v31, %v1542_v54 }
 0x5e4   :  { %v1499_v24 = vrot.slane %v1498_v13, 4  ;;  %v1515_v59 = vadd.f32 %v1514_v25, %v1513_v17 }
 0x5e5   :  { %v1529_v60 = vrot.slane %v1528_v12, 4  ;;  %v1546_v62 = vadd.f32 %v1545_v58, %v1544_v21 }
 0x5e6   :  { %v1500_v63 = vadd.f32 %v1499_v24, %v1498_v13  ;;  %v1516_v0 = vrot.slane %v1515_v59, 4 }
 0x5e7   :  { %v1530_v2 = vadd.f32 %v1529_v60, %v1528_v12  ;;  %v1547_v3 = vrot.slane %v1546_v62, 4 }
 0x5e8   :  { %v1501_v5 = vrot.slane %v1500_v63, 2  ;;  %v1517_v6 = vadd.f32 %v1516_v0, %v1515_v59 }
 0x5e9   :  { %v1531_v7 = vrot.slane %v1530_v2, 2  ;;  %v1548_v8 = vadd.f32 %v1547_v3, %v1546_v62 }
 0x5ea   :  { %v1502_v9 = vadd.f32 %v1501_v5, %v1500_v63  ;;  %v1518_v10 = vrot.slane %v1517_v6, 2 }
 0x5eb   :  { %v1532_v20 = vadd.f32 %v1531_v7, %v1530_v2  ;;  %v1549_v22 = vrot.slane %v1548_v8, 2 }
 0x5ec   :  { %v1503_v26 = vrot.slane %v1502_v9, 1  ;;  %v1519_v32 = vadd.f32 %v1518_v10, %v1517_v6 }
 0x5ed   :  { %v1533_v56 = vrot.slane %v1532_v20, 1  ;;  %v1550_v36 = vadd.f32 %v1549_v22, %v1548_v8 }
 0x5ee   :  { %v1504_v51 = vadd.f32 %v1503_v26, %v1502_v9  ;;  %v1520_v61 = vrot.slane %v1519_v32, 1 }
 0x5ef   :  { %v1534_v49 = vadd.f32 %v1533_v56, %v1532_v20  ;;  %v1551_v53 = vrot.slane %v1550_v36, 1 }
 0x5f0   :  { %v1521_v38 = vadd.f32 %v1520_v61, %v1519_v32 }
 0x5f1   :  { %v1535_v39 = vadd.f32 %v1534_v49, %v1504_v51  ;;  %v1552_v55 = vadd.f32 %v1551_v53, %v1550_v36 }
 0x5f3   :  { %v1553_v40 = vadd.f32 %v1552_v55, %v1521_v38  ;;  %v1554_v41 = vmul.f32 0.02, %v1535_v39  ;;  %v3815_v55 = vld [vmem:[%s3950_s14] sm:$0xff] }
 0x5f5   :  { %v1555_v42 = vmul.f32 0.02, %v1553_v40  ;;  %v1556_v11 = vmul.f32 %v1554_v41, %v1554_v41  ;;  %v3820_v40 = vld [vmem:[%s3950_s14 + $0x8] sm:$0xff] }
 0x5f7   :  { %v1557_v14 = vsub.f32 %v1555_v42, %v1556_v11  ;;  %v3830_v42 = vld [vmem:[%s3950_s14 + $0x18] sm:$0xff]  ;;  %v3835_v11 = vld [vmem:[%s3952_s16] sm:$0x1] }
 0x5f9   :  { %v1558_v23 = vmax.f32 %v1557_v14, 0.0  ;;  %v1756_v14 = vld [vmem:[%s3953_s17] sm:$0x1]  }
 0x5fb   :  { %v1559_v30 = vadd.f32 1e-05, %v1558_v23  ;;  %v2499_v23 = vld [vmem:[%s3951_s15] ss:$0 sm:$0xff] }
 0x5fd   :  { %3061 = vrsqrt.f32 %v1559_v30 }
 0x607   :  { %v3062_v43 = vpop.eup %3061 }
 0x608   :  { %v1561_v44 = vmul.f32 %v3062_v43, %v1490_v37 }
 0x60a   :  { %v1562_v46 = vmul.f32 %v1561_v44, %v1554_v41  ;;  %v1567_v47 = vrot.slane %v1561_v44, %v3345_v18  ;;  %v3825_v41 = vld [vmem:[%s3950_s14 + $0x10] sm:$0xff]  ;;  %s3845_s14 = smov 0  }
 0x60c   :  { %v1563_v52 = vsub.f32 %v1491_v45, %v1562_v46  ;;  %v1568_v19 = vmul.f32 %v1567_v47, %v3725_v29  ;;  %v1569_v54 = vmul.f32 %v1567_v47, %v3737_v50  ;;  %v1570_v31 = vmul.f32 %v3721_v27, %v1567_v47 }
 0x60d   :  { %v1571_v57 = vmul.f32 %v3731_v34, %v1567_v47  ;;  %v1598_v13 = vmul.f32 %v1567_v47, %v3729_v33  ;;  %v1599_v17 = vmul.f32 %v1567_v47, %v3747_v48  ;;  %v1600_v25 = vmul.f32 %v3723_v28, %v1567_v47 }
 0x60e   :  { %v1576_v12 = vrot.slane %v1563_v52, %v3345_v18  ;;  %v1601_v21 = vmul.f32 %v3735_v35, %v1567_v47 }
 0x610   :  { %v1578_v58 = vadd.f32 %v1576_v12, %v1568_v19  ;;  %v1579_v24 = vadd.f32 %v1576_v12, %v1569_v54  ;;  %v1580_v59 = vadd.f32 %v1576_v12, %v1570_v31  ;;  %v1581_v29 = vadd.f32 %v1576_v12, %v1571_v57 }
 0x611   :  { %v1603_v60 = vadd.f32 %v1599_v17, %v1576_v12  ;;  %v1605_v50 = vadd.f32 %v1601_v21, %v1576_v12  ;;  %v1602_v62 = vadd.f32 %v1598_v13, %v1576_v12  ;;  %v1604_v27 = vadd.f32 %v1600_v25, %v1576_v12 }
 0x612   :  { %vm1585_vm8 = vcmp.gt.f32.partialorder %v1581_v29, 0.0  ;;  %v1589_v34 = vmul.f32 0.01, %v1581_v29  ;;  %vm1583_vm9 = vcmp.gt.f32.partialorder %v1579_v24, 0.0  ;;  %v1587_v33 = vmul.f32 0.01, %v1579_v24 }
 0x613   :  { %vm1607_vm10 = vcmp.gt.f32.partialorder %v1603_v60, 0.0  ;;  %vm1609_vm11 = vcmp.gt.f32.partialorder %v1605_v50, 0.0  ;;  %v1611_v48 = vmul.f32 0.01, %v1603_v60  ;;  %v1613_v28 = vmul.f32 0.01, %v1605_v50 }
 0x614   :  { %v1593_v63 = vsel %vm1585_vm8, %v1581_v29, %v1589_v34  ;;  %vm1606_vm12 = vcmp.gt.f32.partialorder %v1602_v62, 0.0  ;;  %v1610_v18 = vmul.f32 0.01, %v1602_v62  ;;  %vm1608_vm13 = vcmp.gt.f32.partialorder %v1604_v27, 0.0 }
 0x615   :  { %1597 = vst.msk [vmem:[#allocation3 + $0x20] sm:$0x1] %vm315_vm6, %v1593_v63  ;;  %v1615_v35 = vsel %vm1607_vm10, %v1603_v60, %v1611_v48  ;;  %v1617_v0 = vsel %vm1609_vm11, %v1605_v50, %v1613_v28  ;;  %v1612_v2 = vmul.f32 0.01, %v1604_v27  ;;  %v1591_v3 = vsel %vm1583_vm9, %v1579_v24, %v1587_v33 }
 0x616   :  { %1619 = vst.msk [vmem:[#allocation3 + $0x38] sm:$0xff] %vm69_vm2, %v1615_v35  ;;  %v1614_v5 = vsel %vm1606_vm12, %v1602_v62, %v1610_v18  ;;  %1595 = vst.msk [vmem:[#allocation3 + $0x10] sm:$0xff] %vm69_vm2, %v1591_v3  ;;  %vm1582_vm0 = vcmp.gt.f32.partialorder %v1578_v58, 0.0  ;;  %v1586_v6 = vmul.f32 0.01, %v1578_v58  ;;  %vm1584_vm1 = vcmp.gt.f32.partialorder %v1580_v59, 0.0 }
 0x617   :  { %1621 = vst.msk [vmem:[#allocation3 + $0x48] sm:$0x1] %vm315_vm6, %v1617_v0  ;;  %v1616_v7 = vsel %vm1608_vm13, %v1604_v27, %v1612_v2  ;;  %v1588_v8 = vmul.f32 0.01, %v1580_v59  ;;  %vm1749_vm6 = vcmask 781312   ;;  %v3117_v54 = vmov %v1756_v14  }
 0x618   :  { %1618 = vst.msk [vmem:[#allocation3 + $0x30] sm:$0xff] %vm69_vm2, %v1614_v5  ;;  %1620 = vst.msk [vmem:[#allocation3 + $0x40] sm:$0xff] %vm69_vm2, %v1616_v7  ;;  %v1590_v9 = vsel %vm1582_vm0, %v1578_v58, %v1586_v6 }
 0x619   :  { %1594 = vst.msk [vmem:[#allocation3 + $0x8] sm:$0xff] %vm69_vm2, %v1590_v9  ;;  %v1592_v10 = vsel %vm1584_vm1, %v1580_v59, %v1588_v8 }
 0x61a   :  { %1596 = vst.msk [vmem:[#allocation3 + $0x18] sm:$0xff] %vm69_vm2, %v1592_v10 }
 0x61d   :  { %v1626_v20 = vld [vmem:[#allocation3 + $0x38] sm:$0xff]  ;;  %v1623_v56 = vld [vmem:[#allocation3 + $0x10] sm:$0xff] }
 0x61e   :  { %1633 = vrot.lane.b32.xlu0 %v1626_v20, %s3127_s27 }
 0x61f   :  { %v1625_v22 = vld [vmem:[#allocation3 + $0x30] sm:$0xff]  ;;  %v1627_v26 = vld [vmem:[#allocation3 + $0x40] sm:$0xf] }
 0x620   :  { %1631 = vrot.lane.b32.xlu1 %v1625_v22, %s3127_s27  ;;  %v1622_v61 = vld [vmem:[#allocation3 + $0x8] sm:$0xff] }
 0x621   :  { %v1624_v38 = vld [vmem:[#allocation3 + $0x18] sm:$0xf] }
 0x622   :  { %1635 = vrot.lane.b32.xlu0 %v1627_v26, %s3127_s27 }
 0x690   :  { %v1634_v32 = vpop.permute.xlu0 %1633 }
 0x691   :  { %v1641_v36 = vsel %vm69_vm2, %v1623_v56, %v1634_v32 }
 0x692   :  { %v1632_v51 = vpop.permute.xlu1 %1631  ;;  %2761 = vmatmul.mubr.msk.f32.vlgmr.msra.gmra.mrb[12].mxu1 %vm406_vm14, %v1641_v36 }
 0x693   :  { %v1640_v49 = vsel %vm69_vm2, %v1622_v61, %v1632_v51  ;;  %2763 = vmatprep.mubr.msk.f32.mxu1 %vm3126_vm3, %v3125_v1 }
 0x694   :  { %2758 = vmatmul.mubr.msk.f32.vlgmr.msra.gmra.mrb[14].mxu0 %vm406_vm14, %v1640_v49  ;;  %v1636_v53 = vpop.permute.xlu0 %1635 }
 0x695   :  { %v1642_v39 = vsel %vm69_vm2, %v1624_v38, %v1636_v53 }
 0x696   :  { %2764 = vmatmul.mubr.msk.f32.gmra.mrb[14].mxu1 %vm406_vm14, %v1642_v39 }
 0x765   :  { %v1738_v30 = vpop.f32.mrb[12].mxu1 }
 0x766   :  { %v1739_v43 = vadd.f32 %v2499_v23, %v1738_v30  ;;  %v2762_v44 = vpop.f32.mrb[13].mxu1 }
 0x767   :  { %v1733_v37 = vpop.f32.mrb[14].mxu0 }
 0x768   :  { %v1734_v45 = vadd.f32 %v2499_v23, %v1733_v37  ;;  %v2759_v46 = vpop.f32.mrb[15].mxu0  ;;  %1748 = vst.msk [vmem:[#allocation4 + $0x8] sm:$0xff] %vm411_vm15, %v1739_v43 }
 0x769   :  { %v1743_v47 = vpop.f32.mrb[14].mxu1 }
 0x76a   :  { %1747 = vst.msk [vmem:[#allocation4] sm:$0xff] %vm411_vm15, %v1734_v45  ;;  %v1744_v52 = vadd.f32 %v2499_v23, %v1743_v47  ;;  %v2765_v19 = vpop.f32.mrb[15].mxu1 }
 0x76c   :  { %1750 = vst.msk [vmem:[#allocation4 + $0x10] sm:$0xf] %vm1749_vm6, %v1744_v52 }
 0x76d LB: > { %v2817_v31 = vpack.c.bf16 %v3820_v40, %v3815_v55  ;;  %v3131_v57 = vmov 0.0|0.0   ;;  %v2820_v13 = vpack.c.bf16 %v3830_v42, %v3825_v41  ;;  %vm3132_vm14 = vmmov 0   ;;  %s3134_s15 = smov 64   ;;  %s1764_s16 = scalar_lea.vmem [#allocation4], %s3123_s14  ;;  %s3123_s14 = sphi %s3845_s14, %s1762_s14   ;;  %v3119_v54 = vphi %v3117_v54, %v3118_v54  }
 0x76e   : > { %2816 = vmatprep.subr.bf16.mxu0 %v3131_v57  ;;  %v3133_v17 = vmov 0.0   ;;  %s3135_s17 = smov 96   ;;  %s3136_s0 = smov 32  }
 0x76f   : > { %2818 = vmatpush3.bf16.msra.mxu0 %v2817_v31  ;;  %2774 = vmatprep.mubr.msk.f32.mxu0 %vm3132_vm14, %v3133_v17  ;;  %s1762_s14 = sadd.s32 1, %s3123_s14  }
 0x770   : > { %2819 = vmatprep.subr.bf16.mxu0 %v3131_v57  ;;  %p1759_p0 = scmp.ge.s32.totalorder %s1762_s14, 20  }
 0x771   :  { %v1881_v6 = vld [vmem:[%s3954_s18] sm:$0xff] (%p1759_p0)  ;;  %v1882_v7 = vld [vmem:[%s3954_s18 + $0x8] sm:$0xff] (%p1759_p0)  ;;  %2784 = vmatprep.subr.mxu1 (%p1759_p0), %v3125_v1  ;;  %2786 = vmatprep.mubr.msk.f32.mxu1 (%p1759_p0), %vm3126_vm3, %v3125_v1  ;;  %s3137_s30 = smov (%p1759_p0), 112   ;;  %vm1877_vm15 = vcmask (%p1759_p0), 1040384   ;;  %vm1890_vm4 = vcmask (%p1759_p0), 130048   ;;  %vm1879_vm5 = vcmask (%p1759_p0), 123904  }
 0x772   :  { %v2823_v8 = vpack.c.bf16 (%p1759_p0), %v1882_v7, %v1881_v6  ;;  %v1971_v10 = vld [vmem:[#allocation3 + $0x35] sm:$0x1] (%p1759_p0)  ;;  %v2505_v20 = vld [vmem:[%s3955_s19] ss:$0 sm:$0xff] (%p1759_p0)  ;;  %v1970_v36 = vld [vmem:[#allocation3 + $0xd] sm:$0x1] (%p1759_p0) }
 0x773   : > { %2821 = vmatpush3.bf16.msra.mxu0 %v2820_v13  ;;  %v1765_v58 = vld [vmem:[%s1764_s16] sm:$0x1]  ;;  %v1973_v26 = vrot.slane (%p1759_p0), %v1971_v10, 7  ;;  %v2079_v61 = vld [vmem:[#allocation3 + $0x36] sm:$0x1] (%p1759_p0)  ;;  %vm2052_vm7 = vcmask (%p1759_p0), 9216  }
 0x774   :  { %2822 = vmatprep.subr.bf16.mxu0 (%p1759_p0), %v3130_v4  ;;  %v2081_v49 = vrot.slane (%p1759_p0), %v2079_v61, 7  ;;  %v2078_v53 = vld [vmem:[#allocation3 + $0xe] sm:$0x1] (%p1759_p0)  ;;  %v2295_v38 = vld [vmem:[#allocation3 + $0x34] sm:$0x1] (%p1759_p0)  ;;  %v1967_v6 = vand.u32 (%p1759_p0), 127, %v267_v15 }
 0x775   :  { %v1975_v51 = vsel (%p1759_p0), %vm1877_vm15, %v1970_v36, %v1973_v26  ;;  %v2187_v39 = vld [vmem:[#allocation3 + $0x37] sm:$0x1] (%p1759_p0)  ;;  %v2297_v42 = vrot.slane (%p1759_p0), %v2295_v38, 7  ;;  %v2294_v14 = vld [vmem:[#allocation3 + $0xc] sm:$0x1] (%p1759_p0)  ;;  %vm2423_vm11 = vcmask (%p1759_p0), 8192  }
 0x776   : > { %2775 = vmatmul.mubr.msk.f32.vlgmr.msra.gmra.mrb[0].mxu0 %vm69_vm2, %v3119_v54  ;;  %v2083_v41 = vsel (%p1759_p0), %vm1877_vm15, %v2078_v53, %v2081_v49  ;;  %v2186_v23 = vld [vmem:[#allocation3 + $0xf] sm:$0x1] (%p1759_p0)  ;;  %s3138_s19 = smov (%p1759_p0), [#allocation5]  }
 0x777   :  { %2781 = vmatprep.mubr.msk.f32.mxu0 (%p1759_p0), %vm3126_vm3, %v3125_v1  ;;  %2824 = vmatpush3.bf16.msra.mxu0 (%p1759_p0), %v2823_v8  ;;  %v2299_v37 = vsel (%p1759_p0), %vm1877_vm15, %v2294_v14, %v2297_v42 }
 0x778   :  { %2789 = vmatprep.subr.mxu0 (%p1759_p0), %v3125_v1 }
 0x849   : > { %v1835_v25 = vpop.f32.mrb[0].mxu0 }
 0x84a   : > { %v1836_v12 = vadd.f32 %v1835_v25, %v3835_v11  ;;  %v2776_v21 = vpop.f32.mrb[1].mxu0  ;;  %v2189_v11 = vrot.slane (%p1759_p0), %v2187_v39, 7 }
 0x84c   : > { %1847 = vrot.lane.b32.xlu0 %v1836_v12, %s3134_s15  ;;  %v1839_v24 = vadd.f32 %v1836_v12, %v1765_v58  ;;  %v2191_v43 = vsel (%p1759_p0), %vm1877_vm15, %v2186_v23, %v2189_v11 }
 0x84e   : > { %v2504_v59 = vmul.f32 -1.442695, %v1839_v24 }
 0x850   : > { %3063 = vpow2.f32 %v2504_v59 }
 0x85a   : > { %v3064_v29 = vpop.eup %3063 }
 0x85b   : > { %v1843_v60 = vadd.f32 1.0, %v3064_v29 }
 0x85d   : > { %3065 = vrcp.f32 %v1843_v60 }
 0x867   : > { %v3066_v50 = vpop.eup %3065 }
 0x868   : > { %v1857_v63 = vsub.f32 1.0, %v3066_v50 }
 0x8be   : > { %v1848_v62 = vpop.permute.xlu0 %1847 }
 0x8bf   : > { %v1850_v27 = vmul.f32 %v3066_v50, %v1848_v62 }
 0x8c1   : > { %1852 = vrot.lane.b32.xlu0 %v1850_v27, %s3134_s15 }
 0x933   : > { %v1853_v34 = vpop.permute.xlu0 %1852 }
 0x934   : > { %v1855_v33 = vadd.f32 %v1853_v34, %v1765_v58 }
 0x936   : > { %3067 = vtanh.f32 %v1855_v33 }
 0x940   : > { %v3068_v48 = vpop.eup %3067 }
 0x941   : > { %1859 = vrot.lane.b32.xlu1 %v3068_v48, %s3135_s17 }
 0x945   : > { %1863 = vrot.lane.b32.xlu1 %v3119_v54, %s3136_s0 }
 0x9b3   : > { %v1860_v28 = vpop.permute.xlu1 %1859 }
 0x9b4   : > { %v1862_v35 = vmul.f32 %v1860_v28, %v1857_v63 }
 0x9b7   : > { %v1864_v18 = vpop.permute.xlu1 %1863 }
 0x9b8   : > { %v1866_v0 = vmul.f32 %v3066_v50, %v1864_v18 }
 0x9ba   : > { %v1867_v2 = vadd.f32 %v1866_v0, %v1862_v35 }
 0x9bc   : > { %1869 = vrot.lane.b32.xlu0 %v1867_v2, %s3135_s17 }
 0xa29   :  { %1761 = sbr.rel (!%p1759_p0) target bundleno = 1901 (0x76d), region = 116 }
 0xa2e   : > { %v1870_v3 = vpop.permute.xlu0 %1869  }
 0xa2f   : > { %v3118_v54 = vmov %v1870_v3   ;;  %v1873_v5 = vrot.slane (%p1759_p0), %v1870_v3, 7 }
 0xa31   :  { %1874 = vrot.lane.b32.xlu0 %v1873_v5, %s3137_s30 }
 0xaa3   :  { %v1875_v4 = vpop.permute.xlu0 %1874 }
 0xaa4   :  { %v1878_v9 = vsel %vm1877_vm15, %v1870_v3, %v1875_v4 }
 0xaa5   :  { %2782 = vmatmul.mubr.msk.f32.vlgmr.msra.gmra.mrb[0].mxu0 %vm1890_vm4, %v1878_v9  ;;  %1880 = vst.msk [vmem:[#allocation5] sm:$0x3] %vm1879_vm5, %v1878_v9 }
 0xaa6   :  { %2791 = vmatprep.mubr.msk.f32.mxu0 %vm3126_vm3, %v3125_v1 }
 0xb78   :  { %v1960_v22 = vpop.f32.mrb[0].mxu0 }
 0xb79   :  { %v1961_v32 = vadd.f32 %v2505_v20, %v1960_v22  ;;  %v2783_v56 = vpop.f32.mrb[1].mxu0 }
 0xb7b   :  { %2300 = vrot.lane.b32.xlu1 %v1961_v32, %s3127_s27  ;;  %2084 = vrot.lane.b32.xlu0 %v1961_v32, %s3129_s23  ;;  %s2446_s27 = sshll.u32 %s3138_s19, 4  ;;  %s2447_s27 = int_to_ptr.vmem [resolvable:$true] %s2446_s27 }
 0xb7c   :  { %2785 = vmatpush3.xpose.msk.msra.mxu1 %vm69_vm2, %v1961_v32  ;;  %p3090_p2 = scmp.lt.s32.totalorder %s2447_s27, %s2447_s27 }
 0xb7d   :  { %2794 = vmatprep.subr.mxu1 %v3125_v1 }
 0xb7f   :  { %2787 = vmatmul.mubr.msk.f32.vlgmr.msra.gmra.mrb[0].mxu1 %vm69_vm2, %v1975_v51  ;;  %2192 = vrot.lane.b32.xlu1 %v1961_v32, %s3128_s3  ;;  %s3085_s3 = scalar_lea.vmem %s2447_s27, 32 }
 0xb80   :  { %2796 = vmatprep.mubr.msk.f32.mxu1 %vm3126_vm3, %v3125_v1  ;;  %p3086_p1 = scmp.ne.s32.totalorder %s2447_s27, %s3085_s3  ;;  %p3091_p3 = scmp.lt.s32.totalorder %s3085_s3, %s3085_s3 }
 0xb82   :  { %p3092_p4 = por %p3091_p3, %p3090_p2 }
 0xb84   :  { %p3093_p5 = pnand %p3092_p4, %p3086_p1 }
 0xbed   :  { %v2301_v55 = vpop.permute.xlu1 %2300  ;;  %v2085_v40 = vpop.permute.xlu0 %2084 }
 0xbee   :  { %2790 = vmatpush3.xpose.msk.msra.mxu0 %vm69_vm2, %v2085_v40 }
 0xbef   :  { %2799 = vmatprep.subr.mxu0 %v3125_v1 }
 0xbf1   :  { %v2193_v30 = vpop.permute.xlu1 %2192  ;;  %2792 = vmatmul.mubr.msk.f32.vlgmr.msra.gmra.mrb[2].mxu0 %vm69_vm2, %v2083_v41 }
 0xbf2   :  { %2795 = vmatpush3.xpose.msk.msra.mxu1 %vm69_vm2, %v2193_v30  ;;  %2800 = vmatpush3.xpose.msk.msra.mxu0 %vm69_vm2, %v2301_v55 }
 0xbf3   :  { %2801 = vmatprep.mubr.msk.f32.mxu0 %vm3126_vm3, %v3125_v1 }
 0xbf5   :  { %2802 = vmatmul.mubr.msk.f32.vlgmr.msra.gmra.mrb[4].mxu0 %vm69_vm2, %v2299_v37  ;;  %2797 = vmatmul.mubr.msk.f32.vlgmr.msra.gmra.mrb[2].mxu1 %vm69_vm2, %v2191_v43  ;;  %vm1968_vm2 = vcmp.eq.s32.totalorder %v3339_v16, %v1967_v6 }
 0xbf6   :  { %v1969_v4 = vsel %vm1968_vm2, 1.0, %v3125_v1 }
 0xc52   :  { %v2048_v44 = vpop.f32.mrb[0].mxu1 }
 0xc53   :  { %v2053_v45 = vsel %vm2052_vm7, %v2048_v44, -inf  ;;  %v2788_v46 = vpop.f32.mrb[1].mxu1 }
 0xc54   :  { %2054 = vmax.xlane.f32.xlu1 %v2053_v45 }
 0xcc4   :  { %v2157_v47 = vpop.f32.mrb[2].mxu0 }
 0xcc5   :  { %v2793_v52 = vpop.f32.mrb[3].mxu0  ;;  %v2161_v17 = vsel %vm2052_vm7, %v2157_v47, -inf }
 0xcc8   :  { %v2373_v19 = vpop.f32.mrb[4].mxu0  ;;  %v2265_v54 = vpop.f32.mrb[2].mxu1 }
 0xcc9   :  { %v2803_v31 = vpop.f32.mrb[5].mxu0  ;;  %v2377_v57 = vsel %vm2052_vm7, %v2373_v19, -inf  ;;  %v2798_v13 = vpop.f32.mrb[3].mxu1  ;;  %v2269_v25 = vsel %vm2052_vm7, %v2265_v54, -inf }
 0xcca   :  { %2378 = vmax.xlane.f32.xlu0 %v2377_v57 }
 0xcce   :  { %2162 = vmax.xlane.f32.xlu0 %v2161_v17 }
 0xcd2   :  { %2270 = vmax.xlane.f32.xlu0 %v2269_v25 }
 0xce1   :  { %v2055_v12 = vpop.xlane.xlu1 %2054 }
 0xce2   :  { %v2056_v21 = vsub.f32 %v2048_v44, %v2055_v12 }
 0xce4   :  { %v2057_v58 = vmul.f32 1.442695, %v2056_v21 }
 0xce6   :  { %3069 = vpow2.f32 %v2057_v58 }
 0xcf0   :  { %v3070_v24 = vpop.eup %3069 }
 0xcf1   :  { %v2059_v59 = vsel %vm2052_vm7, %v3070_v24, 0.0 }
 0xcf2   :  { %2060 = vadd.xlane.f32.xlu0 %v2059_v59 }
 0xd57   :  { %v2379_v29 = vpop.xlane.xlu0 %2378 }
 0xd58   :  { %v2380_v60 = vsub.f32 %v2373_v19, %v2379_v29 }
 0xd5a   :  { %v2381_v50 = vmul.f32 1.442695, %v2380_v60 }
 0xd5b   :  { %v2163_v62 = vpop.xlane.xlu0 %2162 }
 0xd5c   :  { %3071 = vpow2.f32 %v2381_v50  ;;  %v2164_v27 = vsub.f32 %v2157_v47, %v2163_v62 }
 0xd5e   :  { %v2165_v34 = vmul.f32 1.442695, %v2164_v27 }
 0xd5f   :  { %v2271_v33 = vpop.xlane.xlu0 %2270 }
 0xd60   :  { %3073 = vpow2.f32 %v2165_v34  ;;  %v2272_v48 = vsub.f32 %v2265_v54, %v2271_v33 }
 0xd62   :  { %v2273_v28 = vmul.f32 1.442695, %v2272_v48 }
 0xd64   :  { %3075 = vpow2.f32 %v2273_v28 }
 0xd66   :  { %v3072_v63 = vpop.eup %3071 }
 0xd67   :  { %v2383_v18 = vsel %vm2052_vm7, %v3072_v63, 0.0 }
 0xd68   :  { %2384 = vadd.xlane.f32.xlu1 %v2383_v18 }
 0xd6a   :  { %v3074_v35 = vpop.eup %3073 }
 0xd6b   :  { %v2167_v0 = vsel %vm2052_vm7, %v3074_v35, 0.0 }
 0xd6c   :  { %2168 = vadd.xlane.f32.xlu1 %v2167_v0 }
 0xd6e   :  { %v3076_v2 = vpop.eup %3075 }
 0xd6f   :  { %v2275_v3 = vsel %vm2052_vm7, %v3076_v2, 0.0 }
 0xd70   :  { %2276 = vadd.xlane.f32.xlu0 %v2275_v3 }
 0xd7f   :  { %v2061_v5 = vpop.xlane.xlu0 %2060 }
 0xd80   :  { %3077 = vlog2.f32 %v2061_v5 }
 0xd8a   :  { %v3078_v7 = vpop.eup %3077 }
 0xd8b   :  { %v2063_v8 = vmul.f32 0.6931472, %v3078_v7 }
 0xd8d   :  { %v2064_v9 = vsub.f32 %v2056_v21, %v2063_v8 }
 0xd8f   :  { %v2065_v10 = vmul.f32 %v2064_v9, %v1969_v4 }
 0xd91   :  { %v2066_v20 = vsel %vm2052_vm7, %v2065_v10, 0.0 }
 0xd92   :  { %2067 = vadd.xlane.f32.xlu1 %v2066_v20 }
 0xdf5   :  { %v2385_v22 = vpop.xlane.xlu1 %2384 }
 0xdf6   :  { %3079 = vlog2.f32 %v2385_v22 }
 0xdf9   :  { %v2169_v26 = vpop.xlane.xlu1 %2168 }
 0xdfa   :  { %3081 = vlog2.f32 %v2169_v26 }
 0xdfd   :  { %v2277_v32 = vpop.xlane.xlu0 %2276 }
 0xdfe   :  { %3083 = vlog2.f32 %v2277_v32 }
 0xe00   :  { %v3080_v56 = vpop.eup %3079 }
 0xe01   :  { %v2387_v36 = vmul.f32 0.6931472, %v3080_v56 }
 0xe03   :  { %v2388_v15 = vsub.f32 %v2380_v60, %v2387_v36 }
 0xe04   :  { %v3082_v51 = vpop.eup %3081 }
 0xe05   :  { %v2402_v61 = vsel %vm2052_vm7, %v2388_v15, -inf  ;;  %v2171_v49 = vmul.f32 0.6931472, %v3082_v51  ;;  %v2389_v14 = vmul.f32 %v2388_v15, %v1969_v4 }
 0xe06   :  { %v2403_v53 = vrot.slane %v2402_v61, 4 }
 0xe07   :  { %v2172_v38 = vsub.f32 %v2164_v27, %v2171_v49  ;;  %v2390_v44 = vsel %vm2052_vm7, %v2389_v14, 0.0 }
 0xe08   :  { %v3084_v39 = vpop.eup %3083  ;;  %v2404_v55 = vmax.f32 %v2402_v61, %v2403_v53 }
 0xe09   :  { %v2279_v40 = vmul.f32 0.6931472, %v3084_v39  ;;  %v2173_v41 = vmul.f32 %v2172_v38, %v1969_v4 }
 0xe0a   :  { %v2405_v42 = vrot.slane %v2404_v55, 2 }
 0xe0b   :  { %v2174_v11 = vsel %vm2052_vm7, %v2173_v41, 0.0  ;;  %v2280_v23 = vsub.f32 %v2272_v48, %v2279_v40 }
 0xe0c   :  { %v2406_v30 = vmax.f32 %v2404_v55, %v2405_v42  ;;  %2175 = vadd.xlane.f32.xlu0 %v2174_v11 }
 0xe0d   :  { %v2281_v37 = vmul.f32 %v2280_v23, %v1969_v4 }
 0xe0e   :  { %v2407_v43 = vrot.slane %v2406_v30, 1 }
 0xe0f   :  { %v2282_v45 = vsel %vm2052_vm7, %v2281_v37, 0.0 }
 0xe10   :  { %v2408_v46 = vmax.f32 %v2406_v30, %v2407_v43  ;;  %2391 = vadd.xlane.f32.xlu0 %v2390_v44  ;;  %2283 = vadd.xlane.f32.xlu1 %v2282_v45 }
 0xe12   :  { %vm2409_vm3 = vcmp.ge.f32.partialorder %v2388_v15, %v2408_v46 }
 0xe13   :  { %v2410_v47 = vsel %vm2409_vm3, %v3339_v16, 2 }
 0xe14   :  { %v2411_v52 = vsel %vm2052_vm7, %v2410_v47, 2147483647 }
 0xe15   :  { %v2412_v19 = vrot.slane %v2411_v52, 4 }
 0xe17   :  { %vm2413_vm8 = vcmp.lt.s32.totalorder %v2411_v52, %v2412_v19 }
 0xe18   :  { %v2414_v54 = vsel %vm2413_vm8, %v2411_v52, %v2412_v19 }
 0xe19   :  { %v2415_v31 = vrot.slane %v2414_v54, 2 }
 0xe1b   :  { %vm2416_vm9 = vcmp.lt.s32.totalorder %v2414_v54, %v2415_v31 }
 0xe1c   :  { %v2417_v57 = vsel %vm2416_vm9, %v2414_v54, %v2415_v31 }
 0xe1d   :  { %v2418_v13 = vrot.slane %v2417_v57, 1 }
 0xe1f   :  { %v2068_v17 = vpop.xlane.xlu1 %2067  ;;  %vm2419_vm10 = vcmp.lt.s32.totalorder %v2417_v57, %v2418_v13 }
 0xe20   :  { %v2069_v25 = vrot.slane %v2068_v17, 4  ;;  %v2420_v12 = vsel %vm2419_vm10, %v2417_v57, %v2418_v13 }
 0xe21   :  { %vm2421_vm12 = vcmp.eq.s32.totalorder %v2420_v12, %v1967_v6 }
 0xe22   :  { %v2070_v21 = vadd.f32 %v2069_v25, %v2068_v17  ;;  %v2422_v58 = vsel %vm2421_vm12, 1.0, %v3125_v1 }
 0xe23   :  { %v2424_v16 = vsel %vm2423_vm11, %v2422_v58, 0.0 }
 0xe24   :  { %v2071_v24 = vrot.slane %v2070_v21, 2  ;;  %2425 = vadd.xlane.f32.xlu1 %v2424_v16 }
 0xe26   :  { %v2072_v59 = vadd.f32 %v2071_v24, %v2070_v21 }
 0xe28   :  { %v2073_v29 = vrot.slane %v2072_v59, 1 }
 0xe2a   :  { %v2074_v60 = vadd.f32 %v2073_v29, %v2072_v59 }
 0xe2c   :  { %2833 = vpush %v2074_v60 }
 0xe2d   :  { %3096 = shalt.err (!%p3093_p5)
}
 0xe2e   :  { %s3097_s5 = scalar_lea.hbm %s3957_s21, 32 }
 0xe2f   :  { %p3098_p6 = scmp.ne.s32.totalorder %s3957_s21, %s3097_s5  ;;  %p3101_p7 = scmp.lt.u32.totalorder %s3097_s5, %s3957_s21 }
 0xe31   :  { %p3103_p8 = pnand %p3101_p7, %p3098_p6 }
 0xe33   :  { %3106 = shalt.err (!%p3103_p8)
}
 0xe34   :  { %2449 = dma.vmem_to_hbm [thread:$0]  %s2447_s27, 32, %s3957_s21, [#allocation6]   ;;  %vm2435_vm13 = vcmask 7168  }
 0xe5d   :  { %s2834_s21 = spop %2833 }
 0xe5e   :  { %v2076_v61 = vstv %s2834_s21 }
 0xe99   :  { %v2176_v1 = vpop.xlane.xlu0 %2175 }
 0xe9a   :  { %v2177_v50 = vrot.slane %v2176_v1, 4 }
 0xe9c   :  { %v2178_v62 = vadd.f32 %v2177_v50, %v2176_v1 }
 0xe9d   :  { %v2284_v27 = vpop.xlane.xlu1 %2283  ;;  %v2392_v34 = vpop.xlane.xlu0 %2391 }
 0xe9e   :  { %v2179_v33 = vrot.slane %v2178_v62, 2  ;;  %v2285_v48 = vrot.slane %v2284_v27, 4  ;;  %v2393_v28 = vrot.slane %v2392_v34, 4 }
 0xea0   :  { %v2286_v63 = vadd.f32 %v2285_v48, %v2284_v27  ;;  %v2394_v18 = vadd.f32 %v2393_v28, %v2392_v34  ;;  %v2180_v35 = vadd.f32 %v2179_v33, %v2178_v62 }
 0xea2   :  { %v2287_v0 = vrot.slane %v2286_v63, 2  ;;  %v2395_v2 = vrot.slane %v2394_v18, 2  ;;  %v2181_v3 = vrot.slane %v2180_v35, 1 }
 0xea4   :  { %v2396_v5 = vadd.f32 %v2395_v2, %v2394_v18  ;;  %v2182_v6 = vadd.f32 %v2181_v3, %v2180_v35  ;;  %v2288_v7 = vadd.f32 %v2287_v0, %v2286_v63 }
 0xea6   :  { %2835 = vpush %v2182_v6  ;;  %v2289_v8 = vrot.slane %v2288_v7, 1  ;;  %v2397_v4 = vrot.slane %v2396_v5, 1 }
 0xea8   :  { %v2290_v9 = vadd.f32 %v2289_v8, %v2288_v7  ;;  %v2398_v10 = vadd.f32 %v2397_v4, %v2396_v5 }
 0xeaa   :  { %2837 = vpush %v2290_v9 }
 0xeab   :  { %2839 = vpush %v2398_v10 }
 0xeb1   :  { %v2426_v20 = vpop.xlane.xlu1 %2425 }
 0xeb2   :  { %v2427_v22 = vrot.slane %v2426_v20, 4 }
 0xeb4   :  { %v2428_v26 = vadd.f32 %v2427_v22, %v2426_v20 }
 0xeb6   :  { %v2429_v32 = vrot.slane %v2428_v26, 2 }
 0xeb8   :  { %v2430_v56 = vadd.f32 %v2429_v32, %v2428_v26 }
 0xeba   :  { %v2431_v36 = vrot.slane %v2430_v56, 1 }
 0xebc   :  { %v2432_v15 = vadd.f32 %v2431_v36, %v2430_v56 }
 0xebe   :  { %2841 = vpush %v2432_v15 }
 0xed7   :  { %s2836_s29 = spop %2835 }
 0xed8   :  { %v2184_v51 = vstv %s2836_s29 }
 0xed9   :  { %v2185_v53 = vadd.f32 %v2184_v51, %v2076_v61 }
 0xedb   :  { %s2838_s2 = spop %2837 }
 0xedc   :  { %v2292_v49 = vstv %s2838_s2  ;;  %s2840_s25 = spop %2839 }
 0xedd   :  { %v2293_v38 = vadd.f32 %v2292_v49, %v2185_v53  ;;  %v2400_v39 = vstv %s2840_s25 }
 0xedf   :  { %v2401_v55 = vadd.f32 %v2400_v39, %v2293_v38 }
 0xeef   :  { %s2842_s26 = spop %2841 }
 0xef0   :  { %v2434_v40 = vstv %s2842_s26 }
 0xef1   :  { %v2436_v41 = vsel %vm2435_vm13, %v2401_v55, %v2434_v40 }
 0xef2   :  { %2437 = vst.msk [vmem:[%s3956_s20] sm:$0x1] %vm2423_vm11, %v2436_v41 }
 0xef3   :  { %3115 = dma.done.wait [#allocation6], 32  }
 0xef4   :  { %3116 = vsyncadd [#allocation6], 4294967264 }
 0xef5   :  { %2455 = vsyncpa [#allocation6], 1 }

</bundles_post_ra>
